<compile_context>
chip_gen: v7x
topology: tpu7x:2x2x1
jax: 0.10.0
libtpu: 0.0.40
codegen_flags: <defaults>
</compile_context>

<pallas_src>
import jax
import jax.numpy as jnp
from jax.experimental import pallas as pl
from jax.experimental.pallas import tpu as pltpu


# --------------------------------------------------------------------------
# Wrapper-side layout plumbing
# --------------------------------------------------------------------------
def _round_up(x, m):
    return ((x + m - 1) // m) * m


def _pad_last(x, target):
    pad = target - x.shape[-1]
    if pad == 0:
        return x
    cfg = [(0, 0)] * (x.ndim - 1) + [(0, pad)]
    return jnp.pad(x, cfg)


def _pad_batch(x, b_pad):
    pad = b_pad - x.shape[0]
    if pad == 0:
        return x
    cfg = [(0, pad)] + [(0, 0)] * (x.ndim - 1)
    return jnp.pad(x, cfg)


def patchify_nchw(img, patch):
    """NCHW image -> (B, num_patches, C*patch*patch) flattened patches."""
    B, C, H, W = img.shape
    ph, pw = H // patch, W // patch
    x = img.reshape(B, C, ph, patch, pw, patch)
    x = x.transpose(0, 2, 4, 1, 3, 5)               # B, ph, pw, C, p, p
    return x.reshape(B, ph * pw, C * patch * patch)


# --------------------------------------------------------------------------
# Fused Pallas kernel (one grid step == BB batch samples)
# --------------------------------------------------------------------------
def _make_fused_kernel(has_s, has_v, has_t, BB, T, P, L, H, c_pad):
    def kernel(*refs):
        pos = 1 if has_t else 0
        ids_ref = refs[0] if has_t else None
        if has_t:
            in_refs = refs[pos:-2]
            o_ref = refs[-2]
            emb_scratch = refs[-1]
        else:
            in_refs = refs[pos:-1]
            o_ref = refs[-1]
        it = iter(in_refs)

        def encode_pool(x2d_bf16, w_ref, b_ref, rows):
            # relu(x @ w + b) in f32, then mean over the per-sample rows.
            h = jnp.dot(x2d_bf16, w_ref[...], preferred_element_type=jnp.float32)
            h = jnp.maximum(h + b_ref[...], 0.0)
            return jnp.sum(h.reshape(BB, rows, H), axis=1) * (1.0 / rows)  # (BB, H)

        zero_feat = jnp.zeros((BB, H), jnp.float32)

        # --- speech: (BB, T, Dpad) bf16 ---
        if has_s:
            xs_ref, ws_ref, bs_ref = next(it), next(it), next(it)
            xs = xs_ref[...].reshape(BB * T, xs_ref.shape[-1])
            feat_s = encode_pool(xs, ws_ref, bs_ref, T)
        else:
            feat_s = zero_feat

        # --- vision: (BB, P, PDpad) bf16 flattened patches ---
        if has_v:
            xv_ref, wv_ref, bv_ref = next(it), next(it), next(it)
            xv = xv_ref[...].reshape(BB * P, xv_ref.shape[-1])
            feat_v = encode_pool(xv, wv_ref, bv_ref, P)
        else:
            feat_v = zero_feat

        # --- text: ids in SMEM (scalar prefetch); gather rows from f32 table ---
        if has_t:
            emb_ref, wt_ref, bt_ref = next(it), next(it), next(it)
            base = pl.program_id(0) * BB
            for i in range(BB):
                for l in range(L):
                    tok = ids_ref[base + i, l]                       # SMEM scalar
                    emb_scratch[pl.ds(i * L + l, 1), :] = emb_ref[pl.ds(tok, 1), :]
            emb_bf = emb_scratch[...].astype(jnp.bfloat16)           # (BB*L, H)
            feat_t = encode_pool(emb_bf, wt_ref, bt_ref, L)
        else:
            feat_t = zero_feat

        wf_ref, bf_ref = next(it), next(it)
        w1_ref, b1_ref, w2_ref, b2_ref = next(it), next(it), next(it), next(it)

        # --- fusion: tanh(concat([s, v, t]) @ Wf + bf), one (BB, 3H) matmul ---
        fused_in = jnp.concatenate([feat_s, feat_v, feat_t], axis=1)   # (BB, 3H)
        fused = jnp.tanh(
            jnp.dot(fused_in.astype(jnp.bfloat16), wf_ref[...],
                    preferred_element_type=jnp.float32) + bf_ref[...])

        # --- classifier: Linear -> ReLU -> (Dropout: eval identity) -> Linear ---
        h1 = jnp.maximum(
            jnp.dot(fused.astype(jnp.bfloat16), w1_ref[...],
                    preferred_element_type=jnp.float32) + b1_ref[...], 0.0)
        logits = jnp.dot(h1.astype(jnp.bfloat16), w2_ref[...],
                         preferred_element_type=jnp.float32) + b2_ref[...]

        o_ref[...] = logits                 # (BB, c_pad) sublane/lane-dense store

    return kernel


# --------------------------------------------------------------------------
# Parameters (deterministic init; weights stored pre-padded)
# --------------------------------------------------------------------------
def init_params(key, hidden_dim=128, num_classes=8, speech_dim=80,
                image_channels=3, patch=8, vocab_size=1000):
    ks = jax.random.split(key, 16)
    H = hidden_dim

    def dense(kw, kb, din, dout, din_pad=None, dout_pad=None):
        din_pad = din if din_pad is None else din_pad
        dout_pad = dout if dout_pad is None else dout_pad
        w = jax.random.normal(kw, (din, dout), jnp.float32) / jnp.sqrt(float(din))
        w = jnp.pad(w, ((0, din_pad - din), (0, dout_pad - dout)))
        b = jax.random.normal(kb, (1, dout), jnp.float32) * 0.02
        b = jnp.pad(b, ((0, 0), (0, dout_pad - dout)))
        return w.astype(jnp.bfloat16), b

    p = {}
    d_pad = _round_up(speech_dim, 128)
    p["speech_w"], p["speech_b"] = dense(ks[0], ks[1], speech_dim, H, din_pad=d_pad)

    patch_dim = image_channels * patch * patch
    pd_pad = _round_up(patch_dim, 128)
    p["vision_w"], p["vision_b"] = dense(ks[2], ks[3], patch_dim, H, din_pad=pd_pad)

    vocab_pad = _round_up(vocab_size, 8)
    emb = jax.random.normal(ks[4], (vocab_size, H), jnp.float32) * 0.02
    p["embed"] = jnp.pad(emb, ((0, vocab_pad - vocab_size), (0, 0)))   # f32 table
    p["text_w"], p["text_b"] = dense(ks[5], ks[6], H, H)

    p["fuse_w"], p["fuse_b"] = dense(ks[7], ks[8], 3 * H, H)

    p["cls_w1"], p["cls_b1"] = dense(ks[9], ks[10], H, 2 * H)
    c_pad = _round_up(num_classes, 128)
    p["cls_w2"], p["cls_b2"] = dense(ks[11], ks[12], 2 * H, num_classes, dout_pad=c_pad)

    p["patch"] = patch
    p["hidden_dim"] = H
    p["num_classes"] = num_classes
    p["vocab_size"] = vocab_size
    return p


# --------------------------------------------------------------------------
# Forward pass (mirrors MultimodalClassifier.forward, eval mode)
# --------------------------------------------------------------------------
def multimodal_classifier(params, speech_input=None, vision_input=None,
                          text_input=None, block_batch=32):
    has_s = speech_input is not None
    has_v = vision_input is not None
    has_t = text_input is not None
    assert has_s or has_v or has_t, "at least one modality must be provided"

    H = params["hidden_dim"]
    C = params["num_classes"]
    c_pad = params["cls_b2"].shape[-1]
    vocab = params["vocab_size"]
    B = next(a.shape[0]
             for a in (speech_input, vision_input, text_input) if a is not None)

    # Batch block: multiple of 8 (sublane-dense output), sized to fill the MXU.
    BB = _round_up(min(block_batch, B), 8)
    B_pad = _round_up(B, BB)
    grid = (B_pad // BB,)

    inputs, in_specs = [], []

    def add_full(arr):
        nd = arr.ndim
        inputs.append(arr)
        in_specs.append(pl.BlockSpec(arr.shape, lambda b, *_, _nd=nd: (0,) * _nd))

    def add_batched(arr):               # arr: (B_pad, R, Cc) -> block (BB, R, Cc)
        inputs.append(arr)
        in_specs.append(pl.BlockSpec((BB,) + arr.shape[1:], lambda b, *_: (b, 0, 0)))

    T = P = L = 0
    if has_s:
        xs = _pad_last(speech_input, params["speech_w"].shape[0]).astype(jnp.bfloat16)
        xs = _pad_batch(xs, B_pad)
        T = xs.shape[1]
        add_batched(xs)
        add_full(params["speech_w"]); add_full(params["speech_b"])
    if has_v:
        patches = patchify_nchw(vision_input, params["patch"])
        xv = _pad_last(patches, params["vision_w"].shape[0]).astype(jnp.bfloat16)
        xv = _pad_batch(xv, B_pad)
        P = xv.shape[1]
        add_batched(xv)
        add_full(params["vision_w"]); add_full(params["vision_b"])
    ids_padded = None
    if has_t:
        ids = jnp.clip(text_input.astype(jnp.int32), 0, vocab - 1)   # bounds-safe gather
        L = ids.shape[1]
        ids_padded = _pad_batch(ids, B_pad)                          # scalar-prefetch (SMEM)
        add_full(params["embed"]); add_full(params["text_w"]); add_full(params["text_b"])

    add_full(params["fuse_w"]); add_full(params["fuse_b"])
    add_full(params["cls_w1"]); add_full(params["cls_b1"])
    add_full(params["cls_w2"]); add_full(params["cls_b2"])

    kernel = _make_fused_kernel(has_s, has_v, has_t, BB, T, P, L, H, c_pad)

    grid_spec = pltpu.PrefetchScalarGridSpec(
        num_scalar_prefetch=1 if has_t else 0,
        grid=grid,
        in_specs=in_specs,
        out_specs=pl.BlockSpec((BB, c_pad), lambda b, *_: (b, 0)),
        scratch_shapes=([pltpu.VMEM((BB * L, H), jnp.float32)] if has_t else []),
    )

    call_args = ([ids_padded] if has_t else []) + inputs
    out_padded = pl.pallas_call(
        kernel,
        grid_spec=grid_spec,
        out_shape=jax.ShapeDtypeStruct((B_pad, c_pad), jnp.float32),
        compiler_params=pltpu.CompilerParams(
            dimension_semantics=("parallel",)),
    )(*call_args)

    return out_padded[:B, :C]


# --------------------------------------------------------------------------
if __name__ == "__main__":
    key = jax.random.PRNGKey(0)
    k_param, k_speech, k_vision, k_text = jax.random.split(key, 4)

    B, T, SPEECH_DIM = 16, 8, 80
    IMG = 32
    L, VOCAB = 8, 1000
    NUM_CLASSES, HIDDEN = 8, 128

    params = init_params(k_param, hidden_dim=HIDDEN, num_classes=NUM_CLASSES,
                         speech_dim=SPEECH_DIM, image_channels=3, patch=8,
                         vocab_size=VOCAB)

    speech = jax.random.normal(k_speech, (B, T, SPEECH_DIM), jnp.float32)
    vision = jax.random.normal(k_vision, (B, 3, IMG, IMG), jnp.float32)   # NCHW
    text = jax.random.randint(k_text, (B, L), 0, VOCAB, jnp.int32)

    # BB=8 -> grid=(2,): two independent batch blocks (keeps both v7x TCs busy),
    # sublane-dense (8, 128) output stores, encoder matmul M-dims of 64/128.
    out = multimodal_classifier(params, speech_input=speech,
                                vision_input=vision, text_input=text,
                                block_batch=8)
    out = jax.block_until_ready(out)
    assert out.shape == (B, NUM_CLASSES) and out.dtype == jnp.float32
    assert bool(jnp.all(jnp.isfinite(out)))
    print("KERNEL_OK")
</pallas_src>

<mosaic_0001>
module attributes {stable_mosaic.version = 11 : i64} {
  func.func @kernel(%arg0: i32, %arg1: memref<16x8xi32, #tpu.memory_space<smem>>, %arg2: memref<8x8x128xbf16, #tpu.memory_space<vmem>>, %arg3: memref<128x128xbf16, #tpu.memory_space<vmem>>, %arg4: memref<1x128xf32, #tpu.memory_space<vmem>>, %arg5: memref<8x16x256xbf16, #tpu.memory_space<vmem>>, %arg6: memref<256x128xbf16, #tpu.memory_space<vmem>>, %arg7: memref<1x128xf32, #tpu.memory_space<vmem>>, %arg8: memref<1000x128xf32, #tpu.memory_space<vmem>>, %arg9: memref<128x128xbf16, #tpu.memory_space<vmem>>, %arg10: memref<1x128xf32, #tpu.memory_space<vmem>>, %arg11: memref<384x128xbf16, #tpu.memory_space<vmem>>, %arg12: memref<1x128xf32, #tpu.memory_space<vmem>>, %arg13: memref<128x256xbf16, #tpu.memory_space<vmem>>, %arg14: memref<1x256xf32, #tpu.memory_space<vmem>>, %arg15: memref<256x128xbf16, #tpu.memory_space<vmem>>, %arg16: memref<1x128xf32, #tpu.memory_space<vmem>>, %arg17: memref<8x128xf32, #tpu.memory_space<vmem>>, %arg18: memref<64x128xf32, #tpu.memory_space<vmem>>) attributes {dimension_semantics = [#tpu.dimension_semantics<parallel>], iteration_bounds = array<i64: 2>, scalar_prefetch = 1 : i64, scratch_operands = 1 : i64, tpu.core_type = #tpu.core_type<tc>, window_params = [{transform_indices = @transform_0, window_bounds = array<i64: 8, 8, 128>}, {pipeline_mode = #tpu.pipeline_mode<synchronous>, transform_indices = @transform_1, window_bounds = array<i64: 128, 128>}, {pipeline_mode = #tpu.pipeline_mode<synchronous>, transform_indices = @transform_2, window_bounds = array<i64: 1, 128>}, {transform_indices = @transform_3, window_bounds = array<i64: 8, 16, 256>}, {pipeline_mode = #tpu.pipeline_mode<synchronous>, transform_indices = @transform_4, window_bounds = array<i64: 256, 128>}, {pipeline_mode = #tpu.pipeline_mode<synchronous>, transform_indices = @transform_5, window_bounds = array<i64: 1, 128>}, {pipeline_mode = #tpu.pipeline_mode<synchronous>, transform_indices = @transform_6, window_bounds = array<i64: 1000, 128>}, {pipeline_mode = #tpu.pipeline_mode<synchronous>, transform_indices = @transform_7, window_bounds = array<i64: 128, 128>}, {pipeline_mode = #tpu.pipeline_mode<synchronous>, transform_indices = @transform_8, window_bounds = array<i64: 1, 128>}, {pipeline_mode = #tpu.pipeline_mode<synchronous>, transform_indices = @transform_9, window_bounds = array<i64: 384, 128>}, {pipeline_mode = #tpu.pipeline_mode<synchronous>, transform_indices = @transform_10, window_bounds = array<i64: 1, 128>}, {pipeline_mode = #tpu.pipeline_mode<synchronous>, transform_indices = @transform_11, window_bounds = array<i64: 128, 256>}, {pipeline_mode = #tpu.pipeline_mode<synchronous>, transform_indices = @transform_12, window_bounds = array<i64: 1, 256>}, {pipeline_mode = #tpu.pipeline_mode<synchronous>, transform_indices = @transform_13, window_bounds = array<i64: 256, 128>}, {pipeline_mode = #tpu.pipeline_mode<synchronous>, transform_indices = @transform_14, window_bounds = array<i64: 1, 128>}, {transform_indices = @transform_15, window_bounds = array<i64: 8, 128>}]} {
    %c0 = arith.constant 0 : index
    %c0_0 = arith.constant 0 : index
    %c0_1 = arith.constant 0 : index
    %0 = vector.load %arg2[%c0, %c0_0, %c0_1] : memref<8x8x128xbf16, #tpu.memory_space<vmem>>, vector<8x8x128xbf16>
    %1 = vector.shape_cast %0 : vector<8x8x128xbf16> to vector<64x128xbf16>
    %c0_2 = arith.constant 0 : index
    %c0_3 = arith.constant 0 : index
    %2 = vector.load %arg3[%c0_2, %c0_3] : memref<128x128xbf16, #tpu.memory_space<vmem>>, vector<128x128xbf16>
    %cst = arith.constant dense<0.000000e+00> : vector<64x128xf32>
    %3 = tpu.matmul %1, %2, %cst {dimension_numbers = #tpu.dot_dimension_numbers<[1], [0], [0], [1], [0, 0, 1, 1], [], []>} : vector<64x128xbf16>, vector<128x128xbf16>, vector<64x128xf32> -> vector<64x128xf32>
    %c0_4 = arith.constant 0 : index
    %c0_5 = arith.constant 0 : index
    %4 = vector.load %arg4[%c0_4, %c0_5] : memref<1x128xf32, #tpu.memory_space<vmem>>, vector<1x128xf32>
    %5 = vector.broadcast %4 : vector<1x128xf32> to vector<64x128xf32>
    %6 = arith.addf %3, %5 : vector<64x128xf32>
    %cst_6 = arith.constant 0.000000e+00 : f32
    %7 = vector.broadcast %cst_6 : f32 to vector<64x128xf32>
    %8 = arith.maximumf %6, %7 : vector<64x128xf32>
    %9 = vector.shape_cast %8 : vector<64x128xf32> to vector<8x8x128xf32>
    %cst_7 = arith.constant dense<0.000000e+00> : vector<8x128xf32>
    %10 = vector.multi_reduction <add>, %9, %cst_7 [1] : vector<8x8x128xf32> to vector<8x128xf32>
    %cst_8 = arith.constant 1.250000e-01 : f32
    %11 = vector.broadcast %cst_8 : f32 to vector<8x128xf32>
    %12 = arith.mulf %10, %11 : vector<8x128xf32>
    %c0_9 = arith.constant 0 : index
    %c0_10 = arith.constant 0 : index
    %c0_11 = arith.constant 0 : index
    %13 = vector.load %arg5[%c0_9, %c0_10, %c0_11] : memref<8x16x256xbf16, #tpu.memory_space<vmem>>, vector<8x16x256xbf16>
    %14 = vector.shape_cast %13 : vector<8x16x256xbf16> to vector<128x256xbf16>
    %c0_12 = arith.constant 0 : index
    %c0_13 = arith.constant 0 : index
    %15 = vector.load %arg6[%c0_12, %c0_13] : memref<256x128xbf16, #tpu.memory_space<vmem>>, vector<256x128xbf16>
    %cst_14 = arith.constant dense<0.000000e+00> : vector<128x128xf32>
    %16 = tpu.matmul %14, %15, %cst_14 {dimension_numbers = #tpu.dot_dimension_numbers<[1], [0], [0], [1], [0, 0, 1, 1], [], []>} : vector<128x256xbf16>, vector<256x128xbf16>, vector<128x128xf32> -> vector<128x128xf32>
    %c0_15 = arith.constant 0 : index
    %c0_16 = arith.constant 0 : index
    %17 = vector.load %arg7[%c0_15, %c0_16] : memref<1x128xf32, #tpu.memory_space<vmem>>, vector<1x128xf32>
    %18 = vector.broadcast %17 : vector<1x128xf32> to vector<128x128xf32>
    %19 = arith.addf %16, %18 : vector<128x128xf32>
    %cst_17 = arith.constant 0.000000e+00 : f32
    %20 = vector.broadcast %cst_17 : f32 to vector<128x128xf32>
    %21 = arith.maximumf %19, %20 : vector<128x128xf32>
    %22 = vector.shape_cast %21 : vector<128x128xf32> to vector<8x16x128xf32>
    %cst_18 = arith.constant dense<0.000000e+00> : vector<8x128xf32>
    %23 = vector.multi_reduction <add>, %22, %cst_18 [1] : vector<8x16x128xf32> to vector<8x128xf32>
    %cst_19 = arith.constant 6.250000e-02 : f32
    %24 = vector.broadcast %cst_19 : f32 to vector<8x128xf32>
    %25 = arith.mulf %23, %24 : vector<8x128xf32>
    %c8_i32 = arith.constant 8 : i32
    %26 = arith.muli %arg0, %c8_i32 : i32
    %c0_i32 = arith.constant 0 : i32
    %27 = arith.addi %26, %c0_i32 : i32
    %28 = arith.index_cast %27 : i32 to index
    %c0_20 = arith.constant 0 : index
    %29 = memref.load %arg1[%28, %c0_20] : memref<16x8xi32, #tpu.memory_space<smem>>
    %30 = arith.index_cast %29 : i32 to index
    %c0_21 = arith.constant 0 : index
    %31 = vector.load %arg8[%30, %c0_21] : memref<1000x128xf32, #tpu.memory_space<vmem>>, vector<1x128xf32>
    %c0_22 = arith.constant 0 : index
    %c0_23 = arith.constant 0 : index
    %32 = vector.load %arg18[%c0_22, %c0_23] : memref<64x128xf32, #tpu.memory_space<vmem>>, vector<1x128xf32>
    tpu.vector_store %arg18[%c0_22, %c0_23], %31 {strides = array<i32>} : memref<64x128xf32, #tpu.memory_space<vmem>>, vector<1x128xf32>,
    %c0_i32_24 = arith.constant 0 : i32
    %33 = arith.addi %26, %c0_i32_24 : i32
    %34 = arith.index_cast %33 : i32 to index
    %c1 = arith.constant 1 : index
    %35 = memref.load %arg1[%34, %c1] : memref<16x8xi32, #tpu.memory_space<smem>>
    %36 = arith.index_cast %35 : i32 to index
    %c0_25 = arith.constant 0 : index
    %37 = vector.load %arg8[%36, %c0_25] : memref<1000x128xf32, #tpu.memory_space<vmem>>, vector<1x128xf32>
    %c1_26 = arith.constant 1 : index
    %c0_27 = arith.constant 0 : index
    %38 = vector.load %arg18[%c1_26, %c0_27] : memref<64x128xf32, #tpu.memory_space<vmem>>, vector<1x128xf32>
    tpu.vector_store %arg18[%c1_26, %c0_27], %37 {strides = array<i32>} : memref<64x128xf32, #tpu.memory_space<vmem>>, vector<1x128xf32>,
    %c0_i32_28 = arith.constant 0 : i32
    %39 = arith.addi %26, %c0_i32_28 : i32
    %40 = arith.index_cast %39 : i32 to index
    %c2 = arith.constant 2 : index
    %41 = memref.load %arg1[%40, %c2] : memref<16x8xi32, #tpu.memory_space<smem>>
    %42 = arith.index_cast %41 : i32 to index
    %c0_29 = arith.constant 0 : index
    %43 = vector.load %arg8[%42, %c0_29] : memref<1000x128xf32, #tpu.memory_space<vmem>>, vector<1x128xf32>
    %c2_30 = arith.constant 2 : index
    %c0_31 = arith.constant 0 : index
    %44 = vector.load %arg18[%c2_30, %c0_31] : memref<64x128xf32, #tpu.memory_space<vmem>>, vector<1x128xf32>
    tpu.vector_store %arg18[%c2_30, %c0_31], %43 {strides = array<i32>} : memref<64x128xf32, #tpu.memory_space<vmem>>, vector<1x128xf32>,
    %c0_i32_32 = arith.constant 0 : i32
    %45 = arith.addi %26, %c0_i32_32 : i32
    %46 = arith.index_cast %45 : i32 to index
    %c3 = arith.constant 3 : index
    %47 = memref.load %arg1[%46, %c3] : memref<16x8xi32, #tpu.memory_space<smem>>
    %48 = arith.index_cast %47 : i32 to index
    %c0_33 = arith.constant 0 : index
    %49 = vector.load %arg8[%48, %c0_33] : memref<1000x128xf32, #tpu.memory_space<vmem>>, vector<1x128xf32>
    %c3_34 = arith.constant 3 : index
    %c0_35 = arith.constant 0 : index
    %50 = vector.load %arg18[%c3_34, %c0_35] : memref<64x128xf32, #tpu.memory_space<vmem>>, vector<1x128xf32>
    tpu.vector_store %arg18[%c3_34, %c0_35], %49 {strides = array<i32>} : memref<64x128xf32, #tpu.memory_space<vmem>>, vector<1x128xf32>,
    %c0_i32_36 = arith.constant 0 : i32
    %51 = arith.addi %26, %c0_i32_36 : i32
    %52 = arith.index_cast %51 : i32 to index
    %c4 = arith.constant 4 : index
    %53 = memref.load %arg1[%52, %c4] : memref<16x8xi32, #tpu.memory_space<smem>>
    %54 = arith.index_cast %53 : i32 to index
    %c0_37 = arith.constant 0 : index
    %55 = vector.load %arg8[%54, %c0_37] : memref<1000x128xf32, #tpu.memory_space<vmem>>, vector<1x128xf32>
    %c4_38 = arith.constant 4 : index
    %c0_39 = arith.constant 0 : index
    %56 = vector.load %arg18[%c4_38, %c0_39] : memref<64x128xf32, #tpu.memory_space<vmem>>, vector<1x128xf32>
    tpu.vector_store %arg18[%c4_38, %c0_39], %55 {strides = array<i32>} : memref<64x128xf32, #tpu.memory_space<vmem>>, vector<1x128xf32>,
    %c0_i32_40 = arith.constant 0 : i32
    %57 = arith.addi %26, %c0_i32_40 : i32
    %58 = arith.index_cast %57 : i32 to index
    %c5 = arith.constant 5 : index
    %59 = memref.load %arg1[%58, %c5] : memref<16x8xi32, #tpu.memory_space<smem>>
    %60 = arith.index_cast %59 : i32 to index
    %c0_41 = arith.constant 0 : index
    %61 = vector.load %arg8[%60, %c0_41] : memref<1000x128xf32, #tpu.memory_space<vmem>>, vector<1x128xf32>
    %c5_42 = arith.constant 5 : index
    %c0_43 = arith.constant 0 : index
    %62 = vector.load %arg18[%c5_42, %c0_43] : memref<64x128xf32, #tpu.memory_space<vmem>>, vector<1x128xf32>
    tpu.vector_store %arg18[%c5_42, %c0_43], %61 {strides = array<i32>} : memref<64x128xf32, #tpu.memory_space<vmem>>, vector<1x128xf32>,
    %c0_i32_44 = arith.constant 0 : i32
    %63 = arith.addi %26, %c0_i32_44 : i32
    %64 = arith.index_cast %63 : i32 to index
    %c6 = arith.constant 6 : index
    %65 = memref.load %arg1[%64, %c6] : memref<16x8xi32, #tpu.memory_space<smem>>
    %66 = arith.index_cast %65 : i32 to index
    %c0_45 = arith.constant 0 : index
    %67 = vector.load %arg8[%66, %c0_45] : memref<1000x128xf32, #tpu.memory_space<vmem>>, vector<1x128xf32>
    %c6_46 = arith.constant 6 : index
    %c0_47 = arith.constant 0 : index
    %68 = vector.load %arg18[%c6_46, %c0_47] : memref<64x128xf32, #tpu.memory_space<vmem>>, vector<1x128xf32>
    tpu.vector_store %arg18[%c6_46, %c0_47], %67 {strides = array<i32>} : memref<64x128xf32, #tpu.memory_space<vmem>>, vector<1x128xf32>,
    %c0_i32_48 = arith.constant 0 : i32
    %69 = arith.addi %26, %c0_i32_48 : i32
    %70 = arith.index_cast %69 : i32 to index
    %c7 = arith.constant 7 : index
    %71 = memref.load %arg1[%70, %c7] : memref<16x8xi32, #tpu.memory_space<smem>>
    %72 = arith.index_cast %71 : i32 to index
    %c0_49 = arith.constant 0 : index
    %73 = vector.load %arg8[%72, %c0_49] : memref<1000x128xf32, #tpu.memory_space<vmem>>, vector<1x128xf32>
    %c7_50 = arith.constant 7 : index
    %c0_51 = arith.constant 0 : index
    %74 = vector.load %arg18[%c7_50, %c0_51] : memref<64x128xf32, #tpu.memory_space<vmem>>, vector<1x128xf32>
    tpu.vector_store %arg18[%c7_50, %c0_51], %73 {strides = array<i32>} : memref<64x128xf32, #tpu.memory_space<vmem>>, vector<1x128xf32>,
    %c1_i32 = arith.constant 1 : i32
    %75 = arith.addi %26, %c1_i32 : i32
    %76 = arith.index_cast %75 : i32 to index
    %c0_52 = arith.constant 0 : index
    %77 = memref.load %arg1[%76, %c0_52] : memref<16x8xi32, #tpu.memory_space<smem>>
    %78 = arith.index_cast %77 : i32 to index
    %c0_53 = arith.constant 0 : index
    %79 = vector.load %arg8[%78, %c0_53] : memref<1000x128xf32, #tpu.memory_space<vmem>>, vector<1x128xf32>
    %c8 = arith.constant 8 : index
    %c0_54 = arith.constant 0 : index
    %80 = vector.load %arg18[%c8, %c0_54] : memref<64x128xf32, #tpu.memory_space<vmem>>, vector<1x128xf32>
    tpu.vector_store %arg18[%c8, %c0_54], %79 {strides = array<i32>} : memref<64x128xf32, #tpu.memory_space<vmem>>, vector<1x128xf32>,
    %c1_i32_55 = arith.constant 1 : i32
    %81 = arith.addi %26, %c1_i32_55 : i32
    %82 = arith.index_cast %81 : i32 to index
    %c1_56 = arith.constant 1 : index
    %83 = memref.load %arg1[%82, %c1_56] : memref<16x8xi32, #tpu.memory_space<smem>>
    %84 = arith.index_cast %83 : i32 to index
    %c0_57 = arith.constant 0 : index
    %85 = vector.load %arg8[%84, %c0_57] : memref<1000x128xf32, #tpu.memory_space<vmem>>, vector<1x128xf32>
    %c9 = arith.constant 9 : index
    %c0_58 = arith.constant 0 : index
    %86 = vector.load %arg18[%c9, %c0_58] : memref<64x128xf32, #tpu.memory_space<vmem>>, vector<1x128xf32>
    tpu.vector_store %arg18[%c9, %c0_58], %85 {strides = array<i32>} : memref<64x128xf32, #tpu.memory_space<vmem>>, vector<1x128xf32>,
    %c1_i32_59 = arith.constant 1 : i32
    %87 = arith.addi %26, %c1_i32_59 : i32
    %88 = arith.index_cast %87 : i32 to index
    %c2_60 = arith.constant 2 : index
    %89 = memref.load %arg1[%88, %c2_60] : memref<16x8xi32, #tpu.memory_space<smem>>
    %90 = arith.index_cast %89 : i32 to index
    %c0_61 = arith.constant 0 : index
    %91 = vector.load %arg8[%90, %c0_61] : memref<1000x128xf32, #tpu.memory_space<vmem>>, vector<1x128xf32>
    %c10 = arith.constant 10 : index
    %c0_62 = arith.constant 0 : index
    %92 = vector.load %arg18[%c10, %c0_62] : memref<64x128xf32, #tpu.memory_space<vmem>>, vector<1x128xf32>
    tpu.vector_store %arg18[%c10, %c0_62], %91 {strides = array<i32>} : memref<64x128xf32, #tpu.memory_space<vmem>>, vector<1x128xf32>,
    %c1_i32_63 = arith.constant 1 : i32
    %93 = arith.addi %26, %c1_i32_63 : i32
    %94 = arith.index_cast %93 : i32 to index
    %c3_64 = arith.constant 3 : index
    %95 = memref.load %arg1[%94, %c3_64] : memref<16x8xi32, #tpu.memory_space<smem>>
    %96 = arith.index_cast %95 : i32 to index
    %c0_65 = arith.constant 0 : index
    %97 = vector.load %arg8[%96, %c0_65] : memref<1000x128xf32, #tpu.memory_space<vmem>>, vector<1x128xf32>
    %c11 = arith.constant 11 : index
    %c0_66 = arith.constant 0 : index
    %98 = vector.load %arg18[%c11, %c0_66] : memref<64x128xf32, #tpu.memory_space<vmem>>, vector<1x128xf32>
    tpu.vector_store %arg18[%c11, %c0_66], %97 {strides = array<i32>} : memref<64x128xf32, #tpu.memory_space<vmem>>, vector<1x128xf32>,
    %c1_i32_67 = arith.constant 1 : i32
    %99 = arith.addi %26, %c1_i32_67 : i32
    %100 = arith.index_cast %99 : i32 to index
    %c4_68 = arith.constant 4 : index
    %101 = memref.load %arg1[%100, %c4_68] : memref<16x8xi32, #tpu.memory_space<smem>>
    %102 = arith.index_cast %101 : i32 to index
    %c0_69 = arith.constant 0 : index
    %103 = vector.load %arg8[%102, %c0_69] : memref<1000x128xf32, #tpu.memory_space<vmem>>, vector<1x128xf32>
    %c12 = arith.constant 12 : index
    %c0_70 = arith.constant 0 : index
    %104 = vector.load %arg18[%c12, %c0_70] : memref<64x128xf32, #tpu.memory_space<vmem>>, vector<1x128xf32>
    tpu.vector_store %arg18[%c12, %c0_70], %103 {strides = array<i32>} : memref<64x128xf32, #tpu.memory_space<vmem>>, vector<1x128xf32>,
    %c1_i32_71 = arith.constant 1 : i32
    %105 = arith.addi %26, %c1_i32_71 : i32
    %106 = arith.index_cast %105 : i32 to index
    %c5_72 = arith.constant 5 : index
    %107 = memref.load %arg1[%106, %c5_72] : memref<16x8xi32, #tpu.memory_space<smem>>
    %108 = arith.index_cast %107 : i32 to index
    %c0_73 = arith.constant 0 : index
    %109 = vector.load %arg8[%108, %c0_73] : memref<1000x128xf32, #tpu.memory_space<vmem>>, vector<1x128xf32>
    %c13 = arith.constant 13 : index
    %c0_74 = arith.constant 0 : index
    %110 = vector.load %arg18[%c13, %c0_74] : memref<64x128xf32, #tpu.memory_space<vmem>>, vector<1x128xf32>
    tpu.vector_store %arg18[%c13, %c0_74], %109 {strides = array<i32>} : memref<64x128xf32, #tpu.memory_space<vmem>>, vector<1x128xf32>,
    %c1_i32_75 = arith.constant 1 : i32
    %111 = arith.addi %26, %c1_i32_75 : i32
    %112 = arith.index_cast %111 : i32 to index
    %c6_76 = arith.constant 6 : index
    %113 = memref.load %arg1[%112, %c6_76] : memref<16x8xi32, #tpu.memory_space<smem>>
    %114 = arith.index_cast %113 : i32 to index
    %c0_77 = arith.constant 0 : index
    %115 = vector.load %arg8[%114, %c0_77] : memref<1000x128xf32, #tpu.memory_space<vmem>>, vector<1x128xf32>
    %c14 = arith.constant 14 : index
    %c0_78 = arith.constant 0 : index
    %116 = vector.load %arg18[%c14, %c0_78] : memref<64x128xf32, #tpu.memory_space<vmem>>, vector<1x128xf32>
    tpu.vector_store %arg18[%c14, %c0_78], %115 {strides = array<i32>} : memref<64x128xf32, #tpu.memory_space<vmem>>, vector<1x128xf32>,
    %c1_i32_79 = arith.constant 1 : i32
    %117 = arith.addi %26, %c1_i32_79 : i32
    %118 = arith.index_cast %117 : i32 to index
    %c7_80 = arith.constant 7 : index
    %119 = memref.load %arg1[%118, %c7_80] : memref<16x8xi32, #tpu.memory_space<smem>>
    %120 = arith.index_cast %119 : i32 to index
    %c0_81 = arith.constant 0 : index
    %121 = vector.load %arg8[%120, %c0_81] : memref<1000x128xf32, #tpu.memory_space<vmem>>, vector<1x128xf32>
    %c15 = arith.constant 15 : index
    %c0_82 = arith.constant 0 : index
    %122 = vector.load %arg18[%c15, %c0_82] : memref<64x128xf32, #tpu.memory_space<vmem>>, vector<1x128xf32>
    tpu.vector_store %arg18[%c15, %c0_82], %121 {strides = array<i32>} : memref<64x128xf32, #tpu.memory_space<vmem>>, vector<1x128xf32>,
    %c2_i32 = arith.constant 2 : i32
    %123 = arith.addi %26, %c2_i32 : i32
    %124 = arith.index_cast %123 : i32 to index
    %c0_83 = arith.constant 0 : index
    %125 = memref.load %arg1[%124, %c0_83] : memref<16x8xi32, #tpu.memory_space<smem>>
    %126 = arith.index_cast %125 : i32 to index
    %c0_84 = arith.constant 0 : index
    %127 = vector.load %arg8[%126, %c0_84] : memref<1000x128xf32, #tpu.memory_space<vmem>>, vector<1x128xf32>
    %c16 = arith.constant 16 : index
    %c0_85 = arith.constant 0 : index
    %128 = vector.load %arg18[%c16, %c0_85] : memref<64x128xf32, #tpu.memory_space<vmem>>, vector<1x128xf32>
    tpu.vector_store %arg18[%c16, %c0_85], %127 {strides = array<i32>} : memref<64x128xf32, #tpu.memory_space<vmem>>, vector<1x128xf32>,
    %c2_i32_86 = arith.constant 2 : i32
    %129 = arith.addi %26, %c2_i32_86 : i32
    %130 = arith.index_cast %129 : i32 to index
    %c1_87 = arith.constant 1 : index
    %131 = memref.load %arg1[%130, %c1_87] : memref<16x8xi32, #tpu.memory_space<smem>>
    %132 = arith.index_cast %131 : i32 to index
    %c0_88 = arith.constant 0 : index
    %133 = vector.load %arg8[%132, %c0_88] : memref<1000x128xf32, #tpu.memory_space<vmem>>, vector<1x128xf32>
    %c17 = arith.constant 17 : index
    %c0_89 = arith.constant 0 : index
    %134 = vector.load %arg18[%c17, %c0_89] : memref<64x128xf32, #tpu.memory_space<vmem>>, vector<1x128xf32>
    tpu.vector_store %arg18[%c17, %c0_89], %133 {strides = array<i32>} : memref<64x128xf32, #tpu.memory_space<vmem>>, vector<1x128xf32>,
    %c2_i32_90 = arith.constant 2 : i32
    %135 = arith.addi %26, %c2_i32_90 : i32
    %136 = arith.index_cast %135 : i32 to index
    %c2_91 = arith.constant 2 : index
    %137 = memref.load %arg1[%136, %c2_91] : memref<16x8xi32, #tpu.memory_space<smem>>
    %138 = arith.index_cast %137 : i32 to index
    %c0_92 = arith.constant 0 : index
    %139 = vector.load %arg8[%138, %c0_92] : memref<1000x128xf32, #tpu.memory_space<vmem>>, vector<1x128xf32>
    %c18 = arith.constant 18 : index
    %c0_93 = arith.constant 0 : index
    %140 = vector.load %arg18[%c18, %c0_93] : memref<64x128xf32, #tpu.memory_space<vmem>>, vector<1x128xf32>
    tpu.vector_store %arg18[%c18, %c0_93], %139 {strides = array<i32>} : memref<64x128xf32, #tpu.memory_space<vmem>>, vector<1x128xf32>,
    %c2_i32_94 = arith.constant 2 : i32
    %141 = arith.addi %26, %c2_i32_94 : i32
    %142 = arith.index_cast %141 : i32 to index
    %c3_95 = arith.constant 3 : index
    %143 = memref.load %arg1[%142, %c3_95] : memref<16x8xi32, #tpu.memory_space<smem>>
    %144 = arith.index_cast %143 : i32 to index
    %c0_96 = arith.constant 0 : index
    %145 = vector.load %arg8[%144, %c0_96] : memref<1000x128xf32, #tpu.memory_space<vmem>>, vector<1x128xf32>
    %c19 = arith.constant 19 : index
    %c0_97 = arith.constant 0 : index
    %146 = vector.load %arg18[%c19, %c0_97] : memref<64x128xf32, #tpu.memory_space<vmem>>, vector<1x128xf32>
    tpu.vector_store %arg18[%c19, %c0_97], %145 {strides = array<i32>} : memref<64x128xf32, #tpu.memory_space<vmem>>, vector<1x128xf32>,
    %c2_i32_98 = arith.constant 2 : i32
    %147 = arith.addi %26, %c2_i32_98 : i32
    %148 = arith.index_cast %147 : i32 to index
    %c4_99 = arith.constant 4 : index
    %149 = memref.load %arg1[%148, %c4_99] : memref<16x8xi32, #tpu.memory_space<smem>>
    %150 = arith.index_cast %149 : i32 to index
    %c0_100 = arith.constant 0 : index
    %151 = vector.load %arg8[%150, %c0_100] : memref<1000x128xf32, #tpu.memory_space<vmem>>, vector<1x128xf32>
    %c20 = arith.constant 20 : index
    %c0_101 = arith.constant 0 : index
    %152 = vector.load %arg18[%c20, %c0_101] : memref<64x128xf32, #tpu.memory_space<vmem>>, vector<1x128xf32>
    tpu.vector_store %arg18[%c20, %c0_101], %151 {strides = array<i32>} : memref<64x128xf32, #tpu.memory_space<vmem>>, vector<1x128xf32>,
    %c2_i32_102 = arith.constant 2 : i32
    %153 = arith.addi %26, %c2_i32_102 : i32
    %154 = arith.index_cast %153 : i32 to index
    %c5_103 = arith.constant 5 : index
    %155 = memref.load %arg1[%154, %c5_103] : memref<16x8xi32, #tpu.memory_space<smem>>
    %156 = arith.index_cast %155 : i32 to index
    %c0_104 = arith.constant 0 : index
    %157 = vector.load %arg8[%156, %c0_104] : memref<1000x128xf32, #tpu.memory_space<vmem>>, vector<1x128xf32>
    %c21 = arith.constant 21 : index
    %c0_105 = arith.constant 0 : index
    %158 = vector.load %arg18[%c21, %c0_105] : memref<64x128xf32, #tpu.memory_space<vmem>>, vector<1x128xf32>
    tpu.vector_store %arg18[%c21, %c0_105], %157 {strides = array<i32>} : memref<64x128xf32, #tpu.memory_space<vmem>>, vector<1x128xf32>,
    %c2_i32_106 = arith.constant 2 : i32
    %159 = arith.addi %26, %c2_i32_106 : i32
    %160 = arith.index_cast %159 : i32 to index
    %c6_107 = arith.constant 6 : index
    %161 = memref.load %arg1[%160, %c6_107] : memref<16x8xi32, #tpu.memory_space<smem>>
    %162 = arith.index_cast %161 : i32 to index
    %c0_108 = arith.constant 0 : index
    %163 = vector.load %arg8[%162, %c0_108] : memref<1000x128xf32, #tpu.memory_space<vmem>>, vector<1x128xf32>
    %c22 = arith.constant 22 : index
    %c0_109 = arith.constant 0 : index
    %164 = vector.load %arg18[%c22, %c0_109] : memref<64x128xf32, #tpu.memory_space<vmem>>, vector<1x128xf32>
    tpu.vector_store %arg18[%c22, %c0_109], %163 {strides = array<i32>} : memref<64x128xf32, #tpu.memory_space<vmem>>, vector<1x128xf32>,
    %c2_i32_110 = arith.constant 2 : i32
    %165 = arith.addi %26, %c2_i32_110 : i32
    %166 = arith.index_cast %165 : i32 to index
    %c7_111 = arith.constant 7 : index
    %167 = memref.load %arg1[%166, %c7_111] : memref<16x8xi32, #tpu.memory_space<smem>>
    %168 = arith.index_cast %167 : i32 to index
    %c0_112 = arith.constant 0 : index
    %169 = vector.load %arg8[%168, %c0_112] : memref<1000x128xf32, #tpu.memory_space<vmem>>, vector<1x128xf32>
    %c23 = arith.constant 23 : index
    %c0_113 = arith.constant 0 : index
    %170 = vector.load %arg18[%c23, %c0_113] : memref<64x128xf32, #tpu.memory_space<vmem>>, vector<1x128xf32>
    tpu.vector_store %arg18[%c23, %c0_113], %169 {strides = array<i32>} : memref<64x128xf32, #tpu.memory_space<vmem>>, vector<1x128xf32>,
    %c3_i32 = arith.constant 3 : i32
    %171 = arith.addi %26, %c3_i32 : i32
    %172 = arith.index_cast %171 : i32 to index
    %c0_114 = arith.constant 0 : index
    %173 = memref.load %arg1[%172, %c0_114] : memref<16x8xi32, #tpu.memory_space<smem>>
    %174 = arith.index_cast %173 : i32 to index
    %c0_115 = arith.constant 0 : index
    %175 = vector.load %arg8[%174, %c0_115] : memref<1000x128xf32, #tpu.memory_space<vmem>>, vector<1x128xf32>
    %c24 = arith.constant 24 : index
    %c0_116 = arith.constant 0 : index
    %176 = vector.load %arg18[%c24, %c0_116] : memref<64x128xf32, #tpu.memory_space<vmem>>, vector<1x128xf32>
    tpu.vector_store %arg18[%c24, %c0_116], %175 {strides = array<i32>} : memref<64x128xf32, #tpu.memory_space<vmem>>, vector<1x128xf32>,
    %c3_i32_117 = arith.constant 3 : i32
    %177 = arith.addi %26, %c3_i32_117 : i32
    %178 = arith.index_cast %177 : i32 to index
    %c1_118 = arith.constant 1 : index
    %179 = memref.load %arg1[%178, %c1_118] : memref<16x8xi32, #tpu.memory_space<smem>>
    %180 = arith.index_cast %179 : i32 to index
    %c0_119 = arith.constant 0 : index
    %181 = vector.load %arg8[%180, %c0_119] : memref<1000x128xf32, #tpu.memory_space<vmem>>, vector<1x128xf32>
    %c25 = arith.constant 25 : index
    %c0_120 = arith.constant 0 : index
    %182 = vector.load %arg18[%c25, %c0_120] : memref<64x128xf32, #tpu.memory_space<vmem>>, vector<1x128xf32>
    tpu.vector_store %arg18[%c25, %c0_120], %181 {strides = array<i32>} : memref<64x128xf32, #tpu.memory_space<vmem>>, vector<1x128xf32>,
    %c3_i32_121 = arith.constant 3 : i32
    %183 = arith.addi %26, %c3_i32_121 : i32
    %184 = arith.index_cast %183 : i32 to index
    %c2_122 = arith.constant 2 : index
    %185 = memref.load %arg1[%184, %c2_122] : memref<16x8xi32, #tpu.memory_space<smem>>
    %186 = arith.index_cast %185 : i32 to index
    %c0_123 = arith.constant 0 : index
    %187 = vector.load %arg8[%186, %c0_123] : memref<1000x128xf32, #tpu.memory_space<vmem>>, vector<1x128xf32>
    %c26 = arith.constant 26 : index
    %c0_124 = arith.constant 0 : index
    %188 = vector.load %arg18[%c26, %c0_124] : memref<64x128xf32, #tpu.memory_space<vmem>>, vector<1x128xf32>
    tpu.vector_store %arg18[%c26, %c0_124], %187 {strides = array<i32>} : memref<64x128xf32, #tpu.memory_space<vmem>>, vector<1x128xf32>,
    %c3_i32_125 = arith.constant 3 : i32
    %189 = arith.addi %26, %c3_i32_125 : i32
    %190 = arith.index_cast %189 : i32 to index
    %c3_126 = arith.constant 3 : index
    %191 = memref.load %arg1[%190, %c3_126] : memref<16x8xi32, #tpu.memory_space<smem>>
    %192 = arith.index_cast %191 : i32 to index
    %c0_127 = arith.constant 0 : index
    %193 = vector.load %arg8[%192, %c0_127] : memref<1000x128xf32, #tpu.memory_space<vmem>>, vector<1x128xf32>
    %c27 = arith.constant 27 : index
    %c0_128 = arith.constant 0 : index
    %194 = vector.load %arg18[%c27, %c0_128] : memref<64x128xf32, #tpu.memory_space<vmem>>, vector<1x128xf32>
    tpu.vector_store %arg18[%c27, %c0_128], %193 {strides = array<i32>} : memref<64x128xf32, #tpu.memory_space<vmem>>, vector<1x128xf32>,
    %c3_i32_129 = arith.constant 3 : i32
    %195 = arith.addi %26, %c3_i32_129 : i32
    %196 = arith.index_cast %195 : i32 to index
    %c4_130 = arith.constant 4 : index
    %197 = memref.load %arg1[%196, %c4_130] : memref<16x8xi32, #tpu.memory_space<smem>>
    %198 = arith.index_cast %197 : i32 to index
    %c0_131 = arith.constant 0 : index
    %199 = vector.load %arg8[%198, %c0_131] : memref<1000x128xf32, #tpu.memory_space<vmem>>, vector<1x128xf32>
    %c28 = arith.constant 28 : index
    %c0_132 = arith.constant 0 : index
    %200 = vector.load %arg18[%c28, %c0_132] : memref<64x128xf32, #tpu.memory_space<vmem>>, vector<1x128xf32>
    tpu.vector_store %arg18[%c28, %c0_132], %199 {strides = array<i32>} : memref<64x128xf32, #tpu.memory_space<vmem>>, vector<1x128xf32>,
    %c3_i32_133 = arith.constant 3 : i32
    %201 = arith.addi %26, %c3_i32_133 : i32
    %202 = arith.index_cast %201 : i32 to index
    %c5_134 = arith.constant 5 : index
    %203 = memref.load %arg1[%202, %c5_134] : memref<16x8xi32, #tpu.memory_space<smem>>
    %204 = arith.index_cast %203 : i32 to index
    %c0_135 = arith.constant 0 : index
    %205 = vector.load %arg8[%204, %c0_135] : memref<1000x128xf32, #tpu.memory_space<vmem>>, vector<1x128xf32>
    %c29 = arith.constant 29 : index
    %c0_136 = arith.constant 0 : index
    %206 = vector.load %arg18[%c29, %c0_136] : memref<64x128xf32, #tpu.memory_space<vmem>>, vector<1x128xf32>
    tpu.vector_store %arg18[%c29, %c0_136], %205 {strides = array<i32>} : memref<64x128xf32, #tpu.memory_space<vmem>>, vector<1x128xf32>,
    %c3_i32_137 = arith.constant 3 : i32
    %207 = arith.addi %26, %c3_i32_137 : i32
    %208 = arith.index_cast %207 : i32 to index
    %c6_138 = arith.constant 6 : index
    %209 = memref.load %arg1[%208, %c6_138] : memref<16x8xi32, #tpu.memory_space<smem>>
    %210 = arith.index_cast %209 : i32 to index
    %c0_139 = arith.constant 0 : index
    %211 = vector.load %arg8[%210, %c0_139] : memref<1000x128xf32, #tpu.memory_space<vmem>>, vector<1x128xf32>
    %c30 = arith.constant 30 : index
    %c0_140 = arith.constant 0 : index
    %212 = vector.load %arg18[%c30, %c0_140] : memref<64x128xf32, #tpu.memory_space<vmem>>, vector<1x128xf32>
    tpu.vector_store %arg18[%c30, %c0_140], %211 {strides = array<i32>} : memref<64x128xf32, #tpu.memory_space<vmem>>, vector<1x128xf32>,
    %c3_i32_141 = arith.constant 3 : i32
    %213 = arith.addi %26, %c3_i32_141 : i32
    %214 = arith.index_cast %213 : i32 to index
    %c7_142 = arith.constant 7 : index
    %215 = memref.load %arg1[%214, %c7_142] : memref<16x8xi32, #tpu.memory_space<smem>>
    %216 = arith.index_cast %215 : i32 to index
    %c0_143 = arith.constant 0 : index
    %217 = vector.load %arg8[%216, %c0_143] : memref<1000x128xf32, #tpu.memory_space<vmem>>, vector<1x128xf32>
    %c31 = arith.constant 31 : index
    %c0_144 = arith.constant 0 : index
    %218 = vector.load %arg18[%c31, %c0_144] : memref<64x128xf32, #tpu.memory_space<vmem>>, vector<1x128xf32>
    tpu.vector_store %arg18[%c31, %c0_144], %217 {strides = array<i32>} : memref<64x128xf32, #tpu.memory_space<vmem>>, vector<1x128xf32>,
    %c4_i32 = arith.constant 4 : i32
    %219 = arith.addi %26, %c4_i32 : i32
    %220 = arith.index_cast %219 : i32 to index
    %c0_145 = arith.constant 0 : index
    %221 = memref.load %arg1[%220, %c0_145] : memref<16x8xi32, #tpu.memory_space<smem>>
    %222 = arith.index_cast %221 : i32 to index
    %c0_146 = arith.constant 0 : index
    %223 = vector.load %arg8[%222, %c0_146] : memref<1000x128xf32, #tpu.memory_space<vmem>>, vector<1x128xf32>
    %c32 = arith.constant 32 : index
    %c0_147 = arith.constant 0 : index
    %224 = vector.load %arg18[%c32, %c0_147] : memref<64x128xf32, #tpu.memory_space<vmem>>, vector<1x128xf32>
    tpu.vector_store %arg18[%c32, %c0_147], %223 {strides = array<i32>} : memref<64x128xf32, #tpu.memory_space<vmem>>, vector<1x128xf32>,
    %c4_i32_148 = arith.constant 4 : i32
    %225 = arith.addi %26, %c4_i32_148 : i32
    %226 = arith.index_cast %225 : i32 to index
    %c1_149 = arith.constant 1 : index
    %227 = memref.load %arg1[%226, %c1_149] : memref<16x8xi32, #tpu.memory_space<smem>>
    %228 = arith.index_cast %227 : i32 to index
    %c0_150 = arith.constant 0 : index
    %229 = vector.load %arg8[%228, %c0_150] : memref<1000x128xf32, #tpu.memory_space<vmem>>, vector<1x128xf32>
    %c33 = arith.constant 33 : index
    %c0_151 = arith.constant 0 : index
    %230 = vector.load %arg18[%c33, %c0_151] : memref<64x128xf32, #tpu.memory_space<vmem>>, vector<1x128xf32>
    tpu.vector_store %arg18[%c33, %c0_151], %229 {strides = array<i32>} : memref<64x128xf32, #tpu.memory_space<vmem>>, vector<1x128xf32>,
    %c4_i32_152 = arith.constant 4 : i32
    %231 = arith.addi %26, %c4_i32_152 : i32
    %232 = arith.index_cast %231 : i32 to index
    %c2_153 = arith.constant 2 : index
    %233 = memref.load %arg1[%232, %c2_153] : memref<16x8xi32, #tpu.memory_space<smem>>
    %234 = arith.index_cast %233 : i32 to index
    %c0_154 = arith.constant 0 : index
    %235 = vector.load %arg8[%234, %c0_154] : memref<1000x128xf32, #tpu.memory_space<vmem>>, vector<1x128xf32>
    %c34 = arith.constant 34 : index
    %c0_155 = arith.constant 0 : index
    %236 = vector.load %arg18[%c34, %c0_155] : memref<64x128xf32, #tpu.memory_space<vmem>>, vector<1x128xf32>
    tpu.vector_store %arg18[%c34, %c0_155], %235 {strides = array<i32>} : memref<64x128xf32, #tpu.memory_space<vmem>>, vector<1x128xf32>,
    %c4_i32_156 = arith.constant 4 : i32
    %237 = arith.addi %26, %c4_i32_156 : i32
    %238 = arith.index_cast %237 : i32 to index
    %c3_157 = arith.constant 3 : index
    %239 = memref.load %arg1[%238, %c3_157] : memref<16x8xi32, #tpu.memory_space<smem>>
    %240 = arith.index_cast %239 : i32 to index
    %c0_158 = arith.constant 0 : index
    %241 = vector.load %arg8[%240, %c0_158] : memref<1000x128xf32, #tpu.memory_space<vmem>>, vector<1x128xf32>
    %c35 = arith.constant 35 : index
    %c0_159 = arith.constant 0 : index
    %242 = vector.load %arg18[%c35, %c0_159] : memref<64x128xf32, #tpu.memory_space<vmem>>, vector<1x128xf32>
    tpu.vector_store %arg18[%c35, %c0_159], %241 {strides = array<i32>} : memref<64x128xf32, #tpu.memory_space<vmem>>, vector<1x128xf32>,
    %c4_i32_160 = arith.constant 4 : i32
    %243 = arith.addi %26, %c4_i32_160 : i32
    %244 = arith.index_cast %243 : i32 to index
    %c4_161 = arith.constant 4 : index
    %245 = memref.load %arg1[%244, %c4_161] : memref<16x8xi32, #tpu.memory_space<smem>>
    %246 = arith.index_cast %245 : i32 to index
    %c0_162 = arith.constant 0 : index
    %247 = vector.load %arg8[%246, %c0_162] : memref<1000x128xf32, #tpu.memory_space<vmem>>, vector<1x128xf32>
    %c36 = arith.constant 36 : index
    %c0_163 = arith.constant 0 : index
    %248 = vector.load %arg18[%c36, %c0_163] : memref<64x128xf32, #tpu.memory_space<vmem>>, vector<1x128xf32>
    tpu.vector_store %arg18[%c36, %c0_163], %247 {strides = array<i32>} : memref<64x128xf32, #tpu.memory_space<vmem>>, vector<1x128xf32>,
    %c4_i32_164 = arith.constant 4 : i32
    %249 = arith.addi %26, %c4_i32_164 : i32
    %250 = arith.index_cast %249 : i32 to index
    %c5_165 = arith.constant 5 : index
    %251 = memref.load %arg1[%250, %c5_165] : memref<16x8xi32, #tpu.memory_space<smem>>
    %252 = arith.index_cast %251 : i32 to index
    %c0_166 = arith.constant 0 : index
    %253 = vector.load %arg8[%252, %c0_166] : memref<1000x128xf32, #tpu.memory_space<vmem>>, vector<1x128xf32>
    %c37 = arith.constant 37 : index
    %c0_167 = arith.constant 0 : index
    %254 = vector.load %arg18[%c37, %c0_167] : memref<64x128xf32, #tpu.memory_space<vmem>>, vector<1x128xf32>
    tpu.vector_store %arg18[%c37, %c0_167], %253 {strides = array<i32>} : memref<64x128xf32, #tpu.memory_space<vmem>>, vector<1x128xf32>,
    %c4_i32_168 = arith.constant 4 : i32
    %255 = arith.addi %26, %c4_i32_168 : i32
    %256 = arith.index_cast %255 : i32 to index
    %c6_169 = arith.constant 6 : index
    %257 = memref.load %arg1[%256, %c6_169] : memref<16x8xi32, #tpu.memory_space<smem>>
    %258 = arith.index_cast %257 : i32 to index
    %c0_170 = arith.constant 0 : index
    %259 = vector.load %arg8[%258, %c0_170] : memref<1000x128xf32, #tpu.memory_space<vmem>>, vector<1x128xf32>
    %c38 = arith.constant 38 : index
    %c0_171 = arith.constant 0 : index
    %260 = vector.load %arg18[%c38, %c0_171] : memref<64x128xf32, #tpu.memory_space<vmem>>, vector<1x128xf32>
    tpu.vector_store %arg18[%c38, %c0_171], %259 {strides = array<i32>} : memref<64x128xf32, #tpu.memory_space<vmem>>, vector<1x128xf32>,
    %c4_i32_172 = arith.constant 4 : i32
    %261 = arith.addi %26, %c4_i32_172 : i32
    %262 = arith.index_cast %261 : i32 to index
    %c7_173 = arith.constant 7 : index
    %263 = memref.load %arg1[%262, %c7_173] : memref<16x8xi32, #tpu.memory_space<smem>>
    %264 = arith.index_cast %263 : i32 to index
    %c0_174 = arith.constant 0 : index
    %265 = vector.load %arg8[%264, %c0_174] : memref<1000x128xf32, #tpu.memory_space<vmem>>, vector<1x128xf32>
    %c39 = arith.constant 39 : index
    %c0_175 = arith.constant 0 : index
    %266 = vector.load %arg18[%c39, %c0_175] : memref<64x128xf32, #tpu.memory_space<vmem>>, vector<1x128xf32>
    tpu.vector_store %arg18[%c39, %c0_175], %265 {strides = array<i32>} : memref<64x128xf32, #tpu.memory_space<vmem>>, vector<1x128xf32>,
    %c5_i32 = arith.constant 5 : i32
    %267 = arith.addi %26, %c5_i32 : i32
    %268 = arith.index_cast %267 : i32 to index
    %c0_176 = arith.constant 0 : index
    %269 = memref.load %arg1[%268, %c0_176] : memref<16x8xi32, #tpu.memory_space<smem>>
    %270 = arith.index_cast %269 : i32 to index
    %c0_177 = arith.constant 0 : index
    %271 = vector.load %arg8[%270, %c0_177] : memref<1000x128xf32, #tpu.memory_space<vmem>>, vector<1x128xf32>
    %c40 = arith.constant 40 : index
    %c0_178 = arith.constant 0 : index
    %272 = vector.load %arg18[%c40, %c0_178] : memref<64x128xf32, #tpu.memory_space<vmem>>, vector<1x128xf32>
    tpu.vector_store %arg18[%c40, %c0_178], %271 {strides = array<i32>} : memref<64x128xf32, #tpu.memory_space<vmem>>, vector<1x128xf32>,
    %c5_i32_179 = arith.constant 5 : i32
    %273 = arith.addi %26, %c5_i32_179 : i32
    %274 = arith.index_cast %273 : i32 to index
    %c1_180 = arith.constant 1 : index
    %275 = memref.load %arg1[%274, %c1_180] : memref<16x8xi32, #tpu.memory_space<smem>>
    %276 = arith.index_cast %275 : i32 to index
    %c0_181 = arith.constant 0 : index
    %277 = vector.load %arg8[%276, %c0_181] : memref<1000x128xf32, #tpu.memory_space<vmem>>, vector<1x128xf32>
    %c41 = arith.constant 41 : index
    %c0_182 = arith.constant 0 : index
    %278 = vector.load %arg18[%c41, %c0_182] : memref<64x128xf32, #tpu.memory_space<vmem>>, vector<1x128xf32>
    tpu.vector_store %arg18[%c41, %c0_182], %277 {strides = array<i32>} : memref<64x128xf32, #tpu.memory_space<vmem>>, vector<1x128xf32>,
    %c5_i32_183 = arith.constant 5 : i32
    %279 = arith.addi %26, %c5_i32_183 : i32
    %280 = arith.index_cast %279 : i32 to index
    %c2_184 = arith.constant 2 : index
    %281 = memref.load %arg1[%280, %c2_184] : memref<16x8xi32, #tpu.memory_space<smem>>
    %282 = arith.index_cast %281 : i32 to index
    %c0_185 = arith.constant 0 : index
    %283 = vector.load %arg8[%282, %c0_185] : memref<1000x128xf32, #tpu.memory_space<vmem>>, vector<1x128xf32>
    %c42 = arith.constant 42 : index
    %c0_186 = arith.constant 0 : index
    %284 = vector.load %arg18[%c42, %c0_186] : memref<64x128xf32, #tpu.memory_space<vmem>>, vector<1x128xf32>
    tpu.vector_store %arg18[%c42, %c0_186], %283 {strides = array<i32>} : memref<64x128xf32, #tpu.memory_space<vmem>>, vector<1x128xf32>,
    %c5_i32_187 = arith.constant 5 : i32
    %285 = arith.addi %26, %c5_i32_187 : i32
    %286 = arith.index_cast %285 : i32 to index
    %c3_188 = arith.constant 3 : index
    %287 = memref.load %arg1[%286, %c3_188] : memref<16x8xi32, #tpu.memory_space<smem>>
    %288 = arith.index_cast %287 : i32 to index
    %c0_189 = arith.constant 0 : index
    %289 = vector.load %arg8[%288, %c0_189] : memref<1000x128xf32, #tpu.memory_space<vmem>>, vector<1x128xf32>
    %c43 = arith.constant 43 : index
    %c0_190 = arith.constant 0 : index
    %290 = vector.load %arg18[%c43, %c0_190] : memref<64x128xf32, #tpu.memory_space<vmem>>, vector<1x128xf32>
    tpu.vector_store %arg18[%c43, %c0_190], %289 {strides = array<i32>} : memref<64x128xf32, #tpu.memory_space<vmem>>, vector<1x128xf32>,
    %c5_i32_191 = arith.constant 5 : i32
    %291 = arith.addi %26, %c5_i32_191 : i32
    %292 = arith.index_cast %291 : i32 to index
    %c4_192 = arith.constant 4 : index
    %293 = memref.load %arg1[%292, %c4_192] : memref<16x8xi32, #tpu.memory_space<smem>>
    %294 = arith.index_cast %293 : i32 to index
    %c0_193 = arith.constant 0 : index
    %295 = vector.load %arg8[%294, %c0_193] : memref<1000x128xf32, #tpu.memory_space<vmem>>, vector<1x128xf32>
    %c44 = arith.constant 44 : index
    %c0_194 = arith.constant 0 : index
    %296 = vector.load %arg18[%c44, %c0_194] : memref<64x128xf32, #tpu.memory_space<vmem>>, vector<1x128xf32>
    tpu.vector_store %arg18[%c44, %c0_194], %295 {strides = array<i32>} : memref<64x128xf32, #tpu.memory_space<vmem>>, vector<1x128xf32>,
    %c5_i32_195 = arith.constant 5 : i32
    %297 = arith.addi %26, %c5_i32_195 : i32
    %298 = arith.index_cast %297 : i32 to index
    %c5_196 = arith.constant 5 : index
    %299 = memref.load %arg1[%298, %c5_196] : memref<16x8xi32, #tpu.memory_space<smem>>
    %300 = arith.index_cast %299 : i32 to index
    %c0_197 = arith.constant 0 : index
    %301 = vector.load %arg8[%300, %c0_197] : memref<1000x128xf32, #tpu.memory_space<vmem>>, vector<1x128xf32>
    %c45 = arith.constant 45 : index
    %c0_198 = arith.constant 0 : index
    %302 = vector.load %arg18[%c45, %c0_198] : memref<64x128xf32, #tpu.memory_space<vmem>>, vector<1x128xf32>
    tpu.vector_store %arg18[%c45, %c0_198], %301 {strides = array<i32>} : memref<64x128xf32, #tpu.memory_space<vmem>>, vector<1x128xf32>,
    %c5_i32_199 = arith.constant 5 : i32
    %303 = arith.addi %26, %c5_i32_199 : i32
    %304 = arith.index_cast %303 : i32 to index
    %c6_200 = arith.constant 6 : index
    %305 = memref.load %arg1[%304, %c6_200] : memref<16x8xi32, #tpu.memory_space<smem>>
    %306 = arith.index_cast %305 : i32 to index
    %c0_201 = arith.constant 0 : index
    %307 = vector.load %arg8[%306, %c0_201] : memref<1000x128xf32, #tpu.memory_space<vmem>>, vector<1x128xf32>
    %c46 = arith.constant 46 : index
    %c0_202 = arith.constant 0 : index
    %308 = vector.load %arg18[%c46, %c0_202] : memref<64x128xf32, #tpu.memory_space<vmem>>, vector<1x128xf32>
    tpu.vector_store %arg18[%c46, %c0_202], %307 {strides = array<i32>} : memref<64x128xf32, #tpu.memory_space<vmem>>, vector<1x128xf32>,
    %c5_i32_203 = arith.constant 5 : i32
    %309 = arith.addi %26, %c5_i32_203 : i32
    %310 = arith.index_cast %309 : i32 to index
    %c7_204 = arith.constant 7 : index
    %311 = memref.load %arg1[%310, %c7_204] : memref<16x8xi32, #tpu.memory_space<smem>>
    %312 = arith.index_cast %311 : i32 to index
    %c0_205 = arith.constant 0 : index
    %313 = vector.load %arg8[%312, %c0_205] : memref<1000x128xf32, #tpu.memory_space<vmem>>, vector<1x128xf32>
    %c47 = arith.constant 47 : index
    %c0_206 = arith.constant 0 : index
    %314 = vector.load %arg18[%c47, %c0_206] : memref<64x128xf32, #tpu.memory_space<vmem>>, vector<1x128xf32>
    tpu.vector_store %arg18[%c47, %c0_206], %313 {strides = array<i32>} : memref<64x128xf32, #tpu.memory_space<vmem>>, vector<1x128xf32>,
    %c6_i32 = arith.constant 6 : i32
    %315 = arith.addi %26, %c6_i32 : i32
    %316 = arith.index_cast %315 : i32 to index
    %c0_207 = arith.constant 0 : index
    %317 = memref.load %arg1[%316, %c0_207] : memref<16x8xi32, #tpu.memory_space<smem>>
    %318 = arith.index_cast %317 : i32 to index
    %c0_208 = arith.constant 0 : index
    %319 = vector.load %arg8[%318, %c0_208] : memref<1000x128xf32, #tpu.memory_space<vmem>>, vector<1x128xf32>
    %c48 = arith.constant 48 : index
    %c0_209 = arith.constant 0 : index
    %320 = vector.load %arg18[%c48, %c0_209] : memref<64x128xf32, #tpu.memory_space<vmem>>, vector<1x128xf32>
    tpu.vector_store %arg18[%c48, %c0_209], %319 {strides = array<i32>} : memref<64x128xf32, #tpu.memory_space<vmem>>, vector<1x128xf32>,
    %c6_i32_210 = arith.constant 6 : i32
    %321 = arith.addi %26, %c6_i32_210 : i32
    %322 = arith.index_cast %321 : i32 to index
    %c1_211 = arith.constant 1 : index
    %323 = memref.load %arg1[%322, %c1_211] : memref<16x8xi32, #tpu.memory_space<smem>>
    %324 = arith.index_cast %323 : i32 to index
    %c0_212 = arith.constant 0 : index
    %325 = vector.load %arg8[%324, %c0_212] : memref<1000x128xf32, #tpu.memory_space<vmem>>, vector<1x128xf32>
    %c49 = arith.constant 49 : index
    %c0_213 = arith.constant 0 : index
    %326 = vector.load %arg18[%c49, %c0_213] : memref<64x128xf32, #tpu.memory_space<vmem>>, vector<1x128xf32>
    tpu.vector_store %arg18[%c49, %c0_213], %325 {strides = array<i32>} : memref<64x128xf32, #tpu.memory_space<vmem>>, vector<1x128xf32>,
    %c6_i32_214 = arith.constant 6 : i32
    %327 = arith.addi %26, %c6_i32_214 : i32
    %328 = arith.index_cast %327 : i32 to index
    %c2_215 = arith.constant 2 : index
    %329 = memref.load %arg1[%328, %c2_215] : memref<16x8xi32, #tpu.memory_space<smem>>
    %330 = arith.index_cast %329 : i32 to index
    %c0_216 = arith.constant 0 : index
    %331 = vector.load %arg8[%330, %c0_216] : memref<1000x128xf32, #tpu.memory_space<vmem>>, vector<1x128xf32>
    %c50 = arith.constant 50 : index
    %c0_217 = arith.constant 0 : index
    %332 = vector.load %arg18[%c50, %c0_217] : memref<64x128xf32, #tpu.memory_space<vmem>>, vector<1x128xf32>
    tpu.vector_store %arg18[%c50, %c0_217], %331 {strides = array<i32>} : memref<64x128xf32, #tpu.memory_space<vmem>>, vector<1x128xf32>,
    %c6_i32_218 = arith.constant 6 : i32
    %333 = arith.addi %26, %c6_i32_218 : i32
    %334 = arith.index_cast %333 : i32 to index
    %c3_219 = arith.constant 3 : index
    %335 = memref.load %arg1[%334, %c3_219] : memref<16x8xi32, #tpu.memory_space<smem>>
    %336 = arith.index_cast %335 : i32 to index
    %c0_220 = arith.constant 0 : index
    %337 = vector.load %arg8[%336, %c0_220] : memref<1000x128xf32, #tpu.memory_space<vmem>>, vector<1x128xf32>
    %c51 = arith.constant 51 : index
    %c0_221 = arith.constant 0 : index
    %338 = vector.load %arg18[%c51, %c0_221] : memref<64x128xf32, #tpu.memory_space<vmem>>, vector<1x128xf32>
    tpu.vector_store %arg18[%c51, %c0_221], %337 {strides = array<i32>} : memref<64x128xf32, #tpu.memory_space<vmem>>, vector<1x128xf32>,
    %c6_i32_222 = arith.constant 6 : i32
    %339 = arith.addi %26, %c6_i32_222 : i32
    %340 = arith.index_cast %339 : i32 to index
    %c4_223 = arith.constant 4 : index
    %341 = memref.load %arg1[%340, %c4_223] : memref<16x8xi32, #tpu.memory_space<smem>>
    %342 = arith.index_cast %341 : i32 to index
    %c0_224 = arith.constant 0 : index
    %343 = vector.load %arg8[%342, %c0_224] : memref<1000x128xf32, #tpu.memory_space<vmem>>, vector<1x128xf32>
    %c52 = arith.constant 52 : index
    %c0_225 = arith.constant 0 : index
    %344 = vector.load %arg18[%c52, %c0_225] : memref<64x128xf32, #tpu.memory_space<vmem>>, vector<1x128xf32>
    tpu.vector_store %arg18[%c52, %c0_225], %343 {strides = array<i32>} : memref<64x128xf32, #tpu.memory_space<vmem>>, vector<1x128xf32>,
    %c6_i32_226 = arith.constant 6 : i32
    %345 = arith.addi %26, %c6_i32_226 : i32
    %346 = arith.index_cast %345 : i32 to index
    %c5_227 = arith.constant 5 : index
    %347 = memref.load %arg1[%346, %c5_227] : memref<16x8xi32, #tpu.memory_space<smem>>
    %348 = arith.index_cast %347 : i32 to index
    %c0_228 = arith.constant 0 : index
    %349 = vector.load %arg8[%348, %c0_228] : memref<1000x128xf32, #tpu.memory_space<vmem>>, vector<1x128xf32>
    %c53 = arith.constant 53 : index
    %c0_229 = arith.constant 0 : index
    %350 = vector.load %arg18[%c53, %c0_229] : memref<64x128xf32, #tpu.memory_space<vmem>>, vector<1x128xf32>
    tpu.vector_store %arg18[%c53, %c0_229], %349 {strides = array<i32>} : memref<64x128xf32, #tpu.memory_space<vmem>>, vector<1x128xf32>,
    %c6_i32_230 = arith.constant 6 : i32
    %351 = arith.addi %26, %c6_i32_230 : i32
    %352 = arith.index_cast %351 : i32 to index
    %c6_231 = arith.constant 6 : index
    %353 = memref.load %arg1[%352, %c6_231] : memref<16x8xi32, #tpu.memory_space<smem>>
    %354 = arith.index_cast %353 : i32 to index
    %c0_232 = arith.constant 0 : index
    %355 = vector.load %arg8[%354, %c0_232] : memref<1000x128xf32, #tpu.memory_space<vmem>>, vector<1x128xf32>
    %c54 = arith.constant 54 : index
    %c0_233 = arith.constant 0 : index
    %356 = vector.load %arg18[%c54, %c0_233] : memref<64x128xf32, #tpu.memory_space<vmem>>, vector<1x128xf32>
    tpu.vector_store %arg18[%c54, %c0_233], %355 {strides = array<i32>} : memref<64x128xf32, #tpu.memory_space<vmem>>, vector<1x128xf32>,
    %c6_i32_234 = arith.constant 6 : i32
    %357 = arith.addi %26, %c6_i32_234 : i32
    %358 = arith.index_cast %357 : i32 to index
    %c7_235 = arith.constant 7 : index
    %359 = memref.load %arg1[%358, %c7_235] : memref<16x8xi32, #tpu.memory_space<smem>>
    %360 = arith.index_cast %359 : i32 to index
    %c0_236 = arith.constant 0 : index
    %361 = vector.load %arg8[%360, %c0_236] : memref<1000x128xf32, #tpu.memory_space<vmem>>, vector<1x128xf32>
    %c55 = arith.constant 55 : index
    %c0_237 = arith.constant 0 : index
    %362 = vector.load %arg18[%c55, %c0_237] : memref<64x128xf32, #tpu.memory_space<vmem>>, vector<1x128xf32>
    tpu.vector_store %arg18[%c55, %c0_237], %361 {strides = array<i32>} : memref<64x128xf32, #tpu.memory_space<vmem>>, vector<1x128xf32>,
    %c7_i32 = arith.constant 7 : i32
    %363 = arith.addi %26, %c7_i32 : i32
    %364 = arith.index_cast %363 : i32 to index
    %c0_238 = arith.constant 0 : index
    %365 = memref.load %arg1[%364, %c0_238] : memref<16x8xi32, #tpu.memory_space<smem>>
    %366 = arith.index_cast %365 : i32 to index
    %c0_239 = arith.constant 0 : index
    %367 = vector.load %arg8[%366, %c0_239] : memref<1000x128xf32, #tpu.memory_space<vmem>>, vector<1x128xf32>
    %c56 = arith.constant 56 : index
    %c0_240 = arith.constant 0 : index
    %368 = vector.load %arg18[%c56, %c0_240] : memref<64x128xf32, #tpu.memory_space<vmem>>, vector<1x128xf32>
    tpu.vector_store %arg18[%c56, %c0_240], %367 {strides = array<i32>} : memref<64x128xf32, #tpu.memory_space<vmem>>, vector<1x128xf32>,
    %c7_i32_241 = arith.constant 7 : i32
    %369 = arith.addi %26, %c7_i32_241 : i32
    %370 = arith.index_cast %369 : i32 to index
    %c1_242 = arith.constant 1 : index
    %371 = memref.load %arg1[%370, %c1_242] : memref<16x8xi32, #tpu.memory_space<smem>>
    %372 = arith.index_cast %371 : i32 to index
    %c0_243 = arith.constant 0 : index
    %373 = vector.load %arg8[%372, %c0_243] : memref<1000x128xf32, #tpu.memory_space<vmem>>, vector<1x128xf32>
    %c57 = arith.constant 57 : index
    %c0_244 = arith.constant 0 : index
    %374 = vector.load %arg18[%c57, %c0_244] : memref<64x128xf32, #tpu.memory_space<vmem>>, vector<1x128xf32>
    tpu.vector_store %arg18[%c57, %c0_244], %373 {strides = array<i32>} : memref<64x128xf32, #tpu.memory_space<vmem>>, vector<1x128xf32>,
    %c7_i32_245 = arith.constant 7 : i32
    %375 = arith.addi %26, %c7_i32_245 : i32
    %376 = arith.index_cast %375 : i32 to index
    %c2_246 = arith.constant 2 : index
    %377 = memref.load %arg1[%376, %c2_246] : memref<16x8xi32, #tpu.memory_space<smem>>
    %378 = arith.index_cast %377 : i32 to index
    %c0_247 = arith.constant 0 : index
    %379 = vector.load %arg8[%378, %c0_247] : memref<1000x128xf32, #tpu.memory_space<vmem>>, vector<1x128xf32>
    %c58 = arith.constant 58 : index
    %c0_248 = arith.constant 0 : index
    %380 = vector.load %arg18[%c58, %c0_248] : memref<64x128xf32, #tpu.memory_space<vmem>>, vector<1x128xf32>
    tpu.vector_store %arg18[%c58, %c0_248], %379 {strides = array<i32>} : memref<64x128xf32, #tpu.memory_space<vmem>>, vector<1x128xf32>,
    %c7_i32_249 = arith.constant 7 : i32
    %381 = arith.addi %26, %c7_i32_249 : i32
    %382 = arith.index_cast %381 : i32 to index
    %c3_250 = arith.constant 3 : index
    %383 = memref.load %arg1[%382, %c3_250] : memref<16x8xi32, #tpu.memory_space<smem>>
    %384 = arith.index_cast %383 : i32 to index
    %c0_251 = arith.constant 0 : index
    %385 = vector.load %arg8[%384, %c0_251] : memref<1000x128xf32, #tpu.memory_space<vmem>>, vector<1x128xf32>
    %c59 = arith.constant 59 : index
    %c0_252 = arith.constant 0 : index
    %386 = vector.load %arg18[%c59, %c0_252] : memref<64x128xf32, #tpu.memory_space<vmem>>, vector<1x128xf32>
    tpu.vector_store %arg18[%c59, %c0_252], %385 {strides = array<i32>} : memref<64x128xf32, #tpu.memory_space<vmem>>, vector<1x128xf32>,
    %c7_i32_253 = arith.constant 7 : i32
    %387 = arith.addi %26, %c7_i32_253 : i32
    %388 = arith.index_cast %387 : i32 to index
    %c4_254 = arith.constant 4 : index
    %389 = memref.load %arg1[%388, %c4_254] : memref<16x8xi32, #tpu.memory_space<smem>>
    %390 = arith.index_cast %389 : i32 to index
    %c0_255 = arith.constant 0 : index
    %391 = vector.load %arg8[%390, %c0_255] : memref<1000x128xf32, #tpu.memory_space<vmem>>, vector<1x128xf32>
    %c60 = arith.constant 60 : index
    %c0_256 = arith.constant 0 : index
    %392 = vector.load %arg18[%c60, %c0_256] : memref<64x128xf32, #tpu.memory_space<vmem>>, vector<1x128xf32>
    tpu.vector_store %arg18[%c60, %c0_256], %391 {strides = array<i32>} : memref<64x128xf32, #tpu.memory_space<vmem>>, vector<1x128xf32>,
    %c7_i32_257 = arith.constant 7 : i32
    %393 = arith.addi %26, %c7_i32_257 : i32
    %394 = arith.index_cast %393 : i32 to index
    %c5_258 = arith.constant 5 : index
    %395 = memref.load %arg1[%394, %c5_258] : memref<16x8xi32, #tpu.memory_space<smem>>
    %396 = arith.index_cast %395 : i32 to index
    %c0_259 = arith.constant 0 : index
    %397 = vector.load %arg8[%396, %c0_259] : memref<1000x128xf32, #tpu.memory_space<vmem>>, vector<1x128xf32>
    %c61 = arith.constant 61 : index
    %c0_260 = arith.constant 0 : index
    %398 = vector.load %arg18[%c61, %c0_260] : memref<64x128xf32, #tpu.memory_space<vmem>>, vector<1x128xf32>
    tpu.vector_store %arg18[%c61, %c0_260], %397 {strides = array<i32>} : memref<64x128xf32, #tpu.memory_space<vmem>>, vector<1x128xf32>,
    %c7_i32_261 = arith.constant 7 : i32
    %399 = arith.addi %26, %c7_i32_261 : i32
    %400 = arith.index_cast %399 : i32 to index
    %c6_262 = arith.constant 6 : index
    %401 = memref.load %arg1[%400, %c6_262] : memref<16x8xi32, #tpu.memory_space<smem>>
    %402 = arith.index_cast %401 : i32 to index
    %c0_263 = arith.constant 0 : index
    %403 = vector.load %arg8[%402, %c0_263] : memref<1000x128xf32, #tpu.memory_space<vmem>>, vector<1x128xf32>
    %c62 = arith.constant 62 : index
    %c0_264 = arith.constant 0 : index
    %404 = vector.load %arg18[%c62, %c0_264] : memref<64x128xf32, #tpu.memory_space<vmem>>, vector<1x128xf32>
    tpu.vector_store %arg18[%c62, %c0_264], %403 {strides = array<i32>} : memref<64x128xf32, #tpu.memory_space<vmem>>, vector<1x128xf32>,
    %c7_i32_265 = arith.constant 7 : i32
    %405 = arith.addi %26, %c7_i32_265 : i32
    %406 = arith.index_cast %405 : i32 to index
    %c7_266 = arith.constant 7 : index
    %407 = memref.load %arg1[%406, %c7_266] : memref<16x8xi32, #tpu.memory_space<smem>>
    %408 = arith.index_cast %407 : i32 to index
    %c0_267 = arith.constant 0 : index
    %409 = vector.load %arg8[%408, %c0_267] : memref<1000x128xf32, #tpu.memory_space<vmem>>, vector<1x128xf32>
    %c63 = arith.constant 63 : index
    %c0_268 = arith.constant 0 : index
    %410 = vector.load %arg18[%c63, %c0_268] : memref<64x128xf32, #tpu.memory_space<vmem>>, vector<1x128xf32>
    tpu.vector_store %arg18[%c63, %c0_268], %409 {strides = array<i32>} : memref<64x128xf32, #tpu.memory_space<vmem>>, vector<1x128xf32>,
    %c0_269 = arith.constant 0 : index
    %c0_270 = arith.constant 0 : index
    %411 = vector.load %arg18[%c0_269, %c0_270] : memref<64x128xf32, #tpu.memory_space<vmem>>, vector<64x128xf32>
    %412 = arith.truncf %411 : vector<64x128xf32> to vector<64x128xbf16>
    %c0_271 = arith.constant 0 : index
    %c0_272 = arith.constant 0 : index
    %413 = vector.load %arg9[%c0_271, %c0_272] : memref<128x128xbf16, #tpu.memory_space<vmem>>, vector<128x128xbf16>
    %cst_273 = arith.constant dense<0.000000e+00> : vector<64x128xf32>
    %414 = tpu.matmul %412, %413, %cst_273 {dimension_numbers = #tpu.dot_dimension_numbers<[1], [0], [0], [1], [0, 0, 1, 1], [], []>} : vector<64x128xbf16>, vector<128x128xbf16>, vector<64x128xf32> -> vector<64x128xf32>
    %c0_274 = arith.constant 0 : index
    %c0_275 = arith.constant 0 : index
    %415 = vector.load %arg10[%c0_274, %c0_275] : memref<1x128xf32, #tpu.memory_space<vmem>>, vector<1x128xf32>
    %416 = vector.broadcast %415 : vector<1x128xf32> to vector<64x128xf32>
    %417 = arith.addf %414, %416 : vector<64x128xf32>
    %cst_276 = arith.constant 0.000000e+00 : f32
    %418 = vector.broadcast %cst_276 : f32 to vector<64x128xf32>
    %419 = arith.maximumf %417, %418 : vector<64x128xf32>
    %420 = vector.shape_cast %419 : vector<64x128xf32> to vector<8x8x128xf32>
    %cst_277 = arith.constant dense<0.000000e+00> : vector<8x128xf32>
    %421 = vector.multi_reduction <add>, %420, %cst_277 [1] : vector<8x8x128xf32> to vector<8x128xf32>
    %cst_278 = arith.constant 1.250000e-01 : f32
    %422 = vector.broadcast %cst_278 : f32 to vector<8x128xf32>
    %423 = arith.mulf %421, %422 : vector<8x128xf32>
    %424 = tpu.concatenate %12, %25, %423 in 1 : vector<8x128xf32>, vector<8x128xf32>, vector<8x128xf32> -> vector<8x384xf32>
    %425 = arith.truncf %424 : vector<8x384xf32> to vector<8x384xbf16>
    %c0_279 = arith.constant 0 : index
    %c0_280 = arith.constant 0 : index
    %426 = vector.load %arg11[%c0_279, %c0_280] : memref<384x128xbf16, #tpu.memory_space<vmem>>, vector<384x128xbf16>
    %cst_281 = arith.constant dense<0.000000e+00> : vector<8x128xf32>
    %427 = tpu.matmul %425, %426, %cst_281 {dimension_numbers = #tpu.dot_dimension_numbers<[1], [0], [0], [1], [0, 0, 1, 1], [], []>} : vector<8x384xbf16>, vector<384x128xbf16>, vector<8x128xf32> -> vector<8x128xf32>
    %c0_282 = arith.constant 0 : index
    %c0_283 = arith.constant 0 : index
    %428 = vector.load %arg12[%c0_282, %c0_283] : memref<1x128xf32, #tpu.memory_space<vmem>>, vector<1x128xf32>
    %429 = vector.broadcast %428 : vector<1x128xf32> to vector<8x128xf32>
    %430 = arith.addf %427, %429 : vector<8x128xf32>
    %431 = math.tanh %430 : vector<8x128xf32>
    %432 = arith.truncf %431 : vector<8x128xf32> to vector<8x128xbf16>
    %c0_284 = arith.constant 0 : index
    %c0_285 = arith.constant 0 : index
    %433 = vector.load %arg13[%c0_284, %c0_285] : memref<128x256xbf16, #tpu.memory_space<vmem>>, vector<128x256xbf16>
    %cst_286 = arith.constant dense<0.000000e+00> : vector<8x256xf32>
    %434 = tpu.matmul %432, %433, %cst_286 {dimension_numbers = #tpu.dot_dimension_numbers<[1], [0], [0], [1], [0, 0, 1, 1], [], []>} : vector<8x128xbf16>, vector<128x256xbf16>, vector<8x256xf32> -> vector<8x256xf32>
    %c0_287 = arith.constant 0 : index
    %c0_288 = arith.constant 0 : index
    %435 = vector.load %arg14[%c0_287, %c0_288] : memref<1x256xf32, #tpu.memory_space<vmem>>, vector<1x256xf32>
    %436 = vector.broadcast %435 : vector<1x256xf32> to vector<8x256xf32>
    %437 = arith.addf %434, %436 : vector<8x256xf32>
    %cst_289 = arith.constant 0.000000e+00 : f32
    %438 = vector.broadcast %cst_289 : f32 to vector<8x256xf32>
    %439 = arith.maximumf %437, %438 : vector<8x256xf32>
    %440 = arith.truncf %439 : vector<8x256xf32> to vector<8x256xbf16>
    %c0_290 = arith.constant 0 : index
    %c0_291 = arith.constant 0 : index
    %441 = vector.load %arg15[%c0_290, %c0_291] : memref<256x128xbf16, #tpu.memory_space<vmem>>, vector<256x128xbf16>
    %cst_292 = arith.constant dense<0.000000e+00> : vector<8x128xf32>
    %442 = tpu.matmul %440, %441, %cst_292 {dimension_numbers = #tpu.dot_dimension_numbers<[1], [0], [0], [1], [0, 0, 1, 1], [], []>} : vector<8x256xbf16>, vector<256x128xbf16>, vector<8x128xf32> -> vector<8x128xf32>
    %c0_293 = arith.constant 0 : index
    %c0_294 = arith.constant 0 : index
    %443 = vector.load %arg16[%c0_293, %c0_294] : memref<1x128xf32, #tpu.memory_space<vmem>>, vector<1x128xf32>
    %444 = vector.broadcast %443 : vector<1x128xf32> to vector<8x128xf32>
    %445 = arith.addf %442, %444 : vector<8x128xf32>
    %c0_295 = arith.constant 0 : index
    %c0_296 = arith.constant 0 : index
    %446 = vector.load %arg17[%c0_295, %c0_296] : memref<8x128xf32, #tpu.memory_space<vmem>>, vector<8x128xf32>
    tpu.vector_store %arg17[%c0_295, %c0_296], %445 {strides = array<i32>} : memref<8x128xf32, #tpu.memory_space<vmem>>, vector<8x128xf32>,
    return
  }
  func.func @transform_0(%arg0: i32, %arg1: memref<16x8xi32, #tpu.memory_space<smem>>) -> (i32, i32, i32) {
    %c0_i32 = arith.constant 0 : i32
    %c0_i32_0 = arith.constant 0 : i32
    %c0_i32_1 = arith.constant 0 : i32
    return %arg0, %c0_i32, %c0_i32_0 : i32, i32, i32
  }
  func.func @transform_1(%arg0: i32, %arg1: memref<16x8xi32, #tpu.memory_space<smem>>) -> (i32, i32) {
    %c0_i32 = arith.constant 0 : i32
    %c0_i32_0 = arith.constant 0 : i32
    %c0_i32_1 = arith.constant 0 : i32
    return %c0_i32, %c0_i32_0 : i32, i32
  }
  func.func @transform_2(%arg0: i32, %arg1: memref<16x8xi32, #tpu.memory_space<smem>>) -> (i32, i32) {
    %c0_i32 = arith.constant 0 : i32
    %c0_i32_0 = arith.constant 0 : i32
    %c0_i32_1 = arith.constant 0 : i32
    return %c0_i32, %c0_i32_0 : i32, i32
  }
  func.func @transform_3(%arg0: i32, %arg1: memref<16x8xi32, #tpu.memory_space<smem>>) -> (i32, i32, i32) {
    %c0_i32 = arith.constant 0 : i32
    %c0_i32_0 = arith.constant 0 : i32
    %c0_i32_1 = arith.constant 0 : i32
    return %arg0, %c0_i32, %c0_i32_0 : i32, i32, i32
  }
  func.func @transform_4(%arg0: i32, %arg1: memref<16x8xi32, #tpu.memory_space<smem>>) -> (i32, i32) {
    %c0_i32 = arith.constant 0 : i32
    %c0_i32_0 = arith.constant 0 : i32
    %c0_i32_1 = arith.constant 0 : i32
    return %c0_i32, %c0_i32_0 : i32, i32
  }
  func.func @transform_5(%arg0: i32, %arg1: memref<16x8xi32, #tpu.memory_space<smem>>) -> (i32, i32) {
    %c0_i32 = arith.constant 0 : i32
    %c0_i32_0 = arith.constant 0 : i32
    %c0_i32_1 = arith.constant 0 : i32
    return %c0_i32, %c0_i32_0 : i32, i32
  }
  func.func @transform_6(%arg0: i32, %arg1: memref<16x8xi32, #tpu.memory_space<smem>>) -> (i32, i32) {
    %c0_i32 = arith.constant 0 : i32
    %c0_i32_0 = arith.constant 0 : i32
    %c0_i32_1 = arith.constant 0 : i32
    return %c0_i32, %c0_i32_0 : i32, i32
  }
  func.func @transform_7(%arg0: i32, %arg1: memref<16x8xi32, #tpu.memory_space<smem>>) -> (i32, i32) {
    %c0_i32 = arith.constant 0 : i32
    %c0_i32_0 = arith.constant 0 : i32
    %c0_i32_1 = arith.constant 0 : i32
    return %c0_i32, %c0_i32_0 : i32, i32
  }
  func.func @transform_8(%arg0: i32, %arg1: memref<16x8xi32, #tpu.memory_space<smem>>) -> (i32, i32) {
    %c0_i32 = arith.constant 0 : i32
    %c0_i32_0 = arith.constant 0 : i32
    %c0_i32_1 = arith.constant 0 : i32
    return %c0_i32, %c0_i32_0 : i32, i32
  }
  func.func @transform_9(%arg0: i32, %arg1: memref<16x8xi32, #tpu.memory_space<smem>>) -> (i32, i32) {
    %c0_i32 = arith.constant 0 : i32
    %c0_i32_0 = arith.constant 0 : i32
    %c0_i32_1 = arith.constant 0 : i32
    return %c0_i32, %c0_i32_0 : i32, i32
  }
  func.func @transform_10(%arg0: i32, %arg1: memref<16x8xi32, #tpu.memory_space<smem>>) -> (i32, i32) {
    %c0_i32 = arith.constant 0 : i32
    %c0_i32_0 = arith.constant 0 : i32
    %c0_i32_1 = arith.constant 0 : i32
    return %c0_i32, %c0_i32_0 : i32, i32
  }
  func.func @transform_11(%arg0: i32, %arg1: memref<16x8xi32, #tpu.memory_space<smem>>) -> (i32, i32) {
    %c0_i32 = arith.constant 0 : i32
    %c0_i32_0 = arith.constant 0 : i32
    %c0_i32_1 = arith.constant 0 : i32
    return %c0_i32, %c0_i32_0 : i32, i32
  }
  func.func @transform_12(%arg0: i32, %arg1: memref<16x8xi32, #tpu.memory_space<smem>>) -> (i32, i32) {
    %c0_i32 = arith.constant 0 : i32
    %c0_i32_0 = arith.constant 0 : i32
    %c0_i32_1 = arith.constant 0 : i32
    return %c0_i32, %c0_i32_0 : i32, i32
  }
  func.func @transform_13(%arg0: i32, %arg1: memref<16x8xi32, #tpu.memory_space<smem>>) -> (i32, i32) {
    %c0_i32 = arith.constant 0 : i32
    %c0_i32_0 = arith.constant 0 : i32
    %c0_i32_1 = arith.constant 0 : i32
    return %c0_i32, %c0_i32_0 : i32, i32
  }
  func.func @transform_14(%arg0: i32, %arg1: memref<16x8xi32, #tpu.memory_space<smem>>) -> (i32, i32) {
    %c0_i32 = arith.constant 0 : i32
    %c0_i32_0 = arith.constant 0 : i32
    %c0_i32_1 = arith.constant 0 : i32
    return %c0_i32, %c0_i32_0 : i32, i32
  }
  func.func @transform_15(%arg0: i32, %arg1: memref<16x8xi32, #tpu.memory_space<smem>>) -> (i32, i32) {
    %c0_i32 = arith.constant 0 : i32
    %c0_i32_0 = arith.constant 0 : i32
    return %arg0, %c0_i32 : i32, i32
  }
}

</mosaic_0001>

<bundles_post_ra>
// kernel: tpu_custom_call.1
= control target key start
LH: loop header
LB: loop body
LE: loop exit
PB: predicated region body
PF: predicated region fallthrough
CT: control target
= control target key end

     0   :  { %s4546_s0 = inlined_call_operand.vmem [shape: s32[16,8], index: 0, kind: input, shape index: {}]   ;;  %s4547_s1 = inlined_call_operand.hbm [shape: bf16[16,8,128], index: 1, kind: input, shape index: {}]   ;;  %s4548_s2 = inlined_call_operand.hbm [shape: bf16[128,128], index: 2, kind: input, shape index: {}]   ;;  %s4549_s3 = inlined_call_operand.vmem [shape: f32[1,128], index: 3, kind: input, shape index: {}]   ;;  %s4550_s4 = inlined_call_operand.hbm [shape: bf16[16,16,256], index: 4, kind: input, shape index: {}]   ;;  %s4551_s5 = inlined_call_operand.hbm [shape: bf16[256,128], index: 5, kind: input, shape index: {}]   ;;  %s4552_s6 = inlined_call_operand.vmem [shape: f32[1,128], index: 6, kind: input, shape index: {}]   ;;  %s4553_s7 = inlined_call_operand.hbm [shape: f32[1000,128], index: 7, kind: input, shape index: {}]   ;;  %s4554_s8 = inlined_call_operand.hbm [shape: bf16[128,128], index: 8, kind: input, shape index: {}]   ;;  %s4555_s9 = inlined_call_operand.vmem [shape: f32[1,128], index: 9, kind: input, shape index: {}]   ;;  %s4556_s10 = inlined_call_operand.hbm [shape: bf16[384,128], index: 10, kind: input, shape index: {}]   ;;  %s4557_s11 = inlined_call_operand.vmem [shape: f32[1,128], index: 11, kind: input, shape index: {}]   ;;  %s4558_s12 = inlined_call_operand.hbm [shape: bf16[128,256], index: 12, kind: input, shape index: {}]   ;;  %s4559_s13 = inlined_call_operand.vmem [shape: f32[1,256], index: 13, kind: input, shape index: {}]   ;;  %s4560_s14 = inlined_call_operand.hbm [shape: bf16[256,128], index: 14, kind: input, shape index: {}]   ;;  %s4561_s15 = inlined_call_operand.vmem [shape: f32[1,128], index: 15, kind: input, shape index: {}]   ;;  %s4562_s16 = inlined_call_operand.hbm [shape: f32[16,128], index: 16, kind: output, shape index: {}]  }
   0x1   :  { %4589 = sst [smem:[#allocation37_spill]] %s4546_s0 }
   0x2   :  { %4590 = sst [smem:[#allocation38_spill]] %s4547_s1  ;;  %s4606_s23 = sld [smem:[#allocation37_spill]] }
   0x3   :  { %4591 = sst [smem:[#allocation39_spill]] %s4548_s2 }
   0x4   :  { %4592 = sst [smem:[#allocation40_spill]] %s4549_s3 }
   0x5   :  { %4593 = sst [smem:[#allocation41_spill]] %s4550_s4 }
   0x6   :  { %4594 = sst [smem:[#allocation42_spill]] %s4551_s5 }
   0x7   :  { %4595 = sst [smem:[#allocation43_spill]] %s4552_s6 }
   0x8   :  { %4596 = sst [smem:[#allocation44_spill]] %s4553_s7 }
   0x9   :  { %4597 = sst [smem:[#allocation45_spill]] %s4554_s8 }
   0xa   :  { %4598 = sst [smem:[#allocation46_spill]] %s4555_s9  ;;  %s21_s9 = sshll.u32 %s4606_s23, 4  ;;  %s22_s9 = int_to_ptr.vmem [resolvable:$true] %s21_s9 }
   0xb   :  { %4599 = sst [smem:[#allocation47_spill]] %s4556_s10  ;;  %s3390_s24 = scalar_lea.vmem %s22_s9, 256 }
   0xc   :  { %4600 = sst [smem:[#allocation48_spill]] %s4557_s11  ;;  %p3391_p0 = scmp.ne.s32.totalorder %s22_s9, %s3390_s24 }
   0xd   :  { %4601 = sst [smem:[#allocation49_spill]] %s4558_s12  ;;  %p3395_p1 = scmp.lt.s32.totalorder %s22_s9, %s22_s9 }
   0xe   :  { %4602 = sst [smem:[#allocation50_spill]] %s4559_s13  ;;  %p3396_p2 = scmp.lt.s32.totalorder %s3390_s24, %s3390_s24 }
   0xf   :  { %4603 = sst [smem:[#allocation51_spill]] %s4560_s14 }
  0x10   :  { %4604 = sst [smem:[#allocation52_spill]] %s4561_s15  ;;  %p3397_p3 = por %p3396_p2, %p3395_p1 }
  0x11   :  { %4605 = sst [smem:[#allocation53_spill]] %s4562_s16 }
  0x12   :  { %p3398_p4 = pnand %p3397_p3, %p3391_p0 }
  0x14   :  { %3401 = shalt.err (!%p3398_p4)  }
  0x15   :  { %s3752_s25 = smov [#allocation4]  }
  0x16   :  { %24 = dma.vmem_to_smem %s22_s9, 256, %s3752_s25, [#allocation3] }
  0x17   :  { %3702 = dma.done.wait [#allocation3], 256 }
  0x18   :  { %3703 = vsyncadd [#allocation3], 4294967040 }
  0x19   :  { %26 = sfence }
  0x1a   :  { %27 = vsyncpa [#allocation6], 0 }
  0x1b   :  { %29 = vsyncpa [#allocation6 + $0x1], 0 }
  0x1c   :  { %30 = vsyncpa [#allocation9], 0 }
  0x1d   :  { %31 = vsyncpa [#allocation13], 0 }
  0x1e   :  { %32 = vsyncpa [#allocation16], 0 }
  0x1f   :  { %33 = vsyncpa [#allocation19], 0 }
  0x20   :  { %34 = vsyncpa [#allocation7], 0 }
  0x21   :  { %36 = vsyncpa [#allocation7 + $0x1], 0  ;;  %s3858_s26 = smov 0   ;;  %s3860_s27 = smov 0  }
  0x22   :  { %s3862_s28 = smov 0   ;;  %s3864_s29 = smov 0  }
  0x23 LB: > { %4607 = sst [smem:[#allocation30_spill]] %s3738_s26  ;;  %s3753_s9 = smov [#allocation8]   ;;  %s3750_s29 = sphi %s3864_s29, %s4664_s29   ;;  %s3746_s28 = sphi %s3862_s28, %s4667_s28   ;;  %s3742_s27 = sphi %s3860_s27, %s4666_s27   ;;  %s3738_s26 = sphi %s3858_s26, %s4665_s26  }
  0x24   : > { %4608 = sst [smem:[#allocation31_spill]] %s3742_s27  ;;  %s410_s30 = sshll.u32 %s3753_s9, 4  ;;  %s3884_s30 = int_to_ptr.vmem [resolvable:$true] %s410_s30 }
  0x25   : > { %4609 = sst [smem:[#allocation32_spill]] %s3746_s28  ;;  %s3879_s0 = sadd.s32 4294967295, %s3750_s29  }
  0x26   : > { %p2747_p5 = scmp.ge.s32.totalorder %s3750_s29, 1  ;;  %p4566_p6 = scmp.eq.s32.totalorder %s3879_s0, 0 }
  0x27   : > { %p398_p7 = scmp.lt.s32.totalorder %s3750_s29, 3  ;;  %s3754_s18 = smov [#allocation12]  }
  0x28   : > { %s442_s19 = sshll.u32 %s3754_s18, 4  ;;  %s3755_s21 = smov [#allocation15]   ;;  %s3899_s19 = int_to_ptr.vmem [resolvable:$true] %s442_s19 }
  0x29   : > { %p3886_p8 = pnand %p2747_p5, %p398_p7  ;;  %s3901_s22 = sshll.u32 %s3755_s21, 4  ;;  %s472_s22 = int_to_ptr.vmem [resolvable:$true] %s3901_s22 }
  0x2a   : > { %s4612_s2 = sld [smem:[#allocation39_spill]] }
  0x2b   : > { %s4610_s17 = scalar_select %p3886_p8, 1, 0 }
  0x2c   : > { %p3168_p10 = pneg %p3886_p8 }
  0x2e   : > { %p3895_p11 = pnand %p3168_p10, %p4566_p6 }
  0x30   : > { %s4611_s20 = scalar_select %p3895_p11, 1, 0 }
  0x31   : > { %s3402_s25 = scalar_lea.hbm %s4612_s2, 1024  ;;  %p3911_p13 = pneg %p3895_p11 }
  0x32   : > { %p3403_p12 = scmp.ne.s32.totalorder %s4612_s2, %s3402_s25  ;;  %p3409_p2 = scmp.lt.u32.totalorder %s3402_s25, %s4612_s2 }
  0x34   : > { %p3405_p0 = pnand %p3911_p13, %p3403_p12 }
  0x36   : > { %p3406_p1 = pneg %p3405_p0 }
  0x38   : > { %p3411_p3 = pnand %p3409_p2, %p3406_p1 }
  0x3a   : > { %3414 = shalt.err (!%p3411_p3)
}
  0x3b   : > { %s3415_s16 = scalar_lea.vmem %s3884_s30, 1024  ;;  %p3423_p10 = scmp.lt.s32.totalorder %s3884_s30, %s3884_s30 }
  0x3c   : > { %p3416_p4 = scmp.ne.s32.totalorder %s3884_s30, %s3415_s16  ;;  %p3424_p9 = scmp.lt.s32.totalorder %s3415_s16, %s3415_s16 }
  0x3e   : > { %p3418_p5 = pnand %p3416_p4, %p3911_p13  ;;  %p3425_p12 = por %p3424_p9, %p3423_p10 }
  0x40   : > { %p3419_p7 = pneg %p3418_p5 }
  0x42   : > { %p3426_p0 = pnand %p3425_p12, %p3419_p7 }
  0x44   : > { %3429 = shalt.err (!%p3426_p0)
}
  0x45   : > { %s4564_s23 = smov 64   ;;  %s4572_s15 = smov 4  }
  0x46   : > { %3171 = dma.hbm_to_vmem [thread:$0]  (!%p3895_p11), %s4612_s2, 1024, %s3884_s30, [#allocation9], %s4564_s23, %s4564_s23, %s4572_s15  }
  0x47   : > { %s4614_s7 = sld [smem:[#allocation44_spill]] }
  0x4d   : > { %s3430_s16 = scalar_lea.hbm %s4614_s7, 16000 }
  0x4e   : > { %p3431_p9 = scmp.ne.s32.totalorder %s4614_s7, %s3430_s16  ;;  %p3437_p3 = scmp.lt.u32.totalorder %s3430_s16, %s4614_s7 }
  0x50   : > { %p3433_p1 = pnand %p3431_p9, %p3911_p13 }
  0x52   : > { %p3434_p2 = pneg %p3433_p1 }
  0x54   : > { %p3439_p4 = pnand %p3437_p3, %p3434_p2 }
  0x56   : > { %3442 = shalt.err (!%p3439_p4)
}
  0x57   : > { %s3443_s30 = scalar_lea.vmem %s3899_s19, 16000  ;;  %p3451_p12 = scmp.lt.s32.totalorder %s3899_s19, %s3899_s19 }
  0x58   : > { %p3444_p5 = scmp.ne.s32.totalorder %s3899_s19, %s3443_s30  ;;  %p3452_p0 = scmp.lt.s32.totalorder %s3443_s30, %s3443_s30 }
  0x5a   : > { %p3446_p7 = pnand %p3444_p5, %p3911_p13  ;;  %p3453_p9 = por %p3452_p0, %p3451_p12 }
  0x5c   : > { %p3447_p10 = pneg %p3446_p7 }
  0x5e   : > { %p3454_p1 = pnand %p3453_p9, %p3447_p10 }
  0x60   : > { %3457 = shalt.err (!%p3454_p1)
}
  0x61   : > { %s4568_s11 = smov 128   ;;  %s4570_s3 = smov 8  }
  0x62   : > { %3177 = dma.hbm_to_vmem [thread:$0]  (!%p3895_p11), %s4614_s7, 16000, %s3899_s19, [#allocation13], %s4568_s11, %s4568_s11, %s4570_s3  }
  0x63   : > { %s4615_s10 = sld [smem:[#allocation47_spill]] }
  0x69   : > { %s3458_s9 = scalar_lea.hbm %s4615_s10, 3072 }
  0x6a   : > { %p3459_p2 = scmp.ne.s32.totalorder %s4615_s10, %s3458_s9  ;;  %p3465_p5 = scmp.lt.u32.totalorder %s3458_s9, %s4615_s10 }
  0x6c   : > { %p3461_p3 = pnand %p3459_p2, %p3911_p13 }
  0x6e   : > { %p3462_p4 = pneg %p3461_p3 }
  0x70   : > { %p3467_p7 = pnand %p3465_p5, %p3462_p4 }
  0x72   : > { %3470 = shalt.err (!%p3467_p7)
}
  0x73   : > { %s3471_s6 = scalar_lea.vmem %s472_s22, 3072  ;;  %p3479_p9 = scmp.lt.s32.totalorder %s472_s22, %s472_s22 }
  0x74   : > { %p3472_p10 = scmp.ne.s32.totalorder %s472_s22, %s3471_s6  ;;  %p3480_p1 = scmp.lt.s32.totalorder %s3471_s6, %s3471_s6 }
  0x76   : > { %p3474_p12 = pnand %p3472_p10, %p3911_p13  ;;  %p3481_p6 = por %p3480_p1, %p3479_p9 }
  0x78   : > { %p3475_p0 = pneg %p3474_p12 }
  0x7a   : > { %p3482_p8 = pnand %p3481_p6, %p3475_p0 }
  0x7c   : > { %3485 = shalt.err (!%p3482_p8)
}
  0x7d   : > { %s4616_s19 = smov 64   ;;  %s2746_s24 = sadd.s32 4294967294, %s3750_s29  }
  0x7e   : > { %3183 = dma.hbm_to_vmem [thread:$0]  (!%p3895_p11), %s4615_s10, 3072, %s472_s22, [#allocation16], %s4616_s19, %s4616_s19, %s4572_s15  }
  0x7f   : > { %s3985_s25 = sadd.s32 1, %s3750_s29   ;;  %s49_s9 = sadd.s32 1, %s3746_s28 }
  0x80   : > { %4617 = sst [smem:[#allocation33_spill]] %s3985_s25  ;;  %s46_s21 = ssub.s32 %s3750_s29, %s3985_s25 }
  0x81   : > { %p56_p6 = scmp.ne.s32.totalorder %s3746_s28, %s3742_s27  ;;  %p47_p8 = scmp.eq.s32.totalorder %s46_s21, 0 }
  0x82   : > { %p57_p2 = scmp.eq.s32.totalorder %s3750_s29, 0  ;;  %p62_p3 = scmp.ne.s32.totalorder %s3742_s27, %s3738_s26 }
  0x83   : > { %p385_p4 = scmp.eq.s32.totalorder %s3879_s0, 1  ;;  %p4619_p7 = scmp.eq.s32.totalorder %s3879_s0, 0 }
  0x84   : > { %s3997_s16 = scalar_select %p47_p8, %s3746_s28, %s49_s9  }
  0x85   : > { %p58_p5 = por %p57_p2, %p56_p6  ;;  %p4001_p10 = por %p4619_p7, %p62_p3 }
  0x86   : > { %4618 = sst [smem:[#allocation34_spill]] %s3997_s16  ;;  %p4005_p12 = por %p385_p4, %p56_p6 }
  0x87   : > { %s4620_s22 = scalar_select %p4001_p10, 1, 0 }
  0x88   : > { %s4621_s30 = scalar_select %p4005_p12, 1, 0 }
  0x89   : > { %p391_p0 = scmp.eq.s32.totalorder %s2746_s24, 1  ;;  %p3208_p9 = scmp.lt.s32.totalorder %s3750_s29, 2 }
  0x8a   : > { %4622 = sst [smem:[#allocation35_spill]] %s4621_s30  ;;  %s520_s6 = sand.u32 1, %s3750_s29  }
  0x8b   : > { %p4011_p1 = por %p391_p0, %p62_p3  ;;  %s522_s13 = sand.u32 1, %s3746_s28  }
  0x8c   : > { %s2900_s9 = sshll.u32 %s3750_s29, 9  ;;  %s2756_s21 = sshll.u32 %s522_s13, 5 }
  0x8d   : > { %s4623_s23 = scalar_select %p4011_p1, 1, 0 }
  0x8e   : > { %s4625_s1 = sld [smem:[#allocation38_spill]]  ;;  %p4022_p6 = pnand %p3208_p9, %p58_p5 }
  0x8f   : > { %4624 = sst [smem:[#allocation36_spill]] %s4623_s23  ;;  %s524_s2 = scalar_lea.vmem [#allocation5], %s2756_s21 }
  0x90   : > { %s4626_s24 = scalar_select %p4022_p6, 1, 0 }
  0x91   : > { %s531_s7 = sshll.u32 %s524_s2, 4  ;;  %s4026_s10 = sshll.u32 %s522_s13, 7  ;;  %s4028_s7 = int_to_ptr.vmem [resolvable:$true] %s531_s7 }
  0x92   : > { %s4030_s16 = scalar_lea.sflag [#allocation6], %s520_s6  ;;  %p4583_p2 = pneg %p4022_p6 }
  0x94   : > { %s4020_s15 = scalar_lea.hbm %s4625_s1, %s2900_s9  ;;  %s3491_s28 = scalar_lea.hbm %s4625_s1, 1024 }
  0x95   : > { %s3486_s11 = scalar_lea.hbm %s4020_s15, 512  ;;  %p3492_p5 = scmp.lt.u32.totalorder %s4020_s15, %s4625_s1 }
  0x96   : > { %p3487_p8 = scmp.ne.s32.totalorder %s4020_s15, %s3486_s11  ;;  %p3493_p7 = scmp.lt.u32.totalorder %s3491_s28, %s3486_s11 }
  0x97   : > { %p3495_p9 = scmp.lt.u32.totalorder %s3486_s11, %s4020_s15 }
  0x98   : > { %p3489_p3 = pnand %p4583_p2, %p3487_p8  ;;  %p3494_p0 = por %p3493_p7, %p3492_p5 }
  0x9a   : > { %p3490_p4 = pneg %p3489_p3  ;;  %p3496_p1 = por %p3495_p9, %p3494_p0 }
  0x9c   : > { %p3497_p12 = pnand %p3496_p1, %p3490_p4 }
  0x9e   : > { %3500 = shalt.err (!%p3497_p12)
}
  0x9f   : > { %s3501_s6 = scalar_lea.vmem %s4028_s7, 512  ;;  %s3760_s13 = smov [#allocation5]  }
  0xa0   : > { %p3502_p8 = scmp.ne.s32.totalorder %s4028_s7, %s3501_s6  ;;  %s3506_s3 = sshll.u32 %s3760_s13, 4  ;;  %s3507_s3 = int_to_ptr.vmem [resolvable:$false] %s3506_s3 }
  0xa1   : > { %s3508_s9 = scalar_lea.vmem %s3507_s3, 1024  ;;  %p3509_p11 = scmp.lt.s32.totalorder %s4028_s7, %s3507_s3 }
  0xa2   : > { %p3504_p3 = pnand %p3502_p8, %p4583_p2  ;;  %p3510_p5 = scmp.lt.s32.totalorder %s3508_s9, %s3501_s6 }
  0xa4   : > { %p3505_p10 = pneg %p3504_p3  ;;  %p3511_p7 = por %p3510_p5, %p3509_p11 }
  0xa6   : > { %p3512_p0 = pnand %p3511_p7, %p3505_p10 }
  0xa8   : > { %3515 = shalt.err (!%p3512_p0)
}
  0xa9   : > { %s4627_s28 = smov 4   ;;  %s545_s11 = scalar_lea.vmem [#allocation10], %s4026_s10 }
  0xaa   : > { %3193 = dma.hbm_to_vmem [thread:$0]  (!%p4022_p6), %s4020_s15, 512, %s4028_s7, %s4030_s16, %s4616_s19, %s4616_s19, %s4627_s28  }
  0xab   : > { %s4062_s21 = sshll.u32 %s545_s11, 4  ;;  %s3761_s2 = smov [#allocation11]   ;;  %s4155_s21 = int_to_ptr.vmem [resolvable:$true] %s4062_s21 }
  0xac   : > { %s426_s13 = sshll.u32 %s3761_s2, 4  ;;  %s4628_s5 = sld [smem:[#allocation42_spill]]  ;;  %s427_s13 = int_to_ptr.vmem [resolvable:$true] %s426_s13 }
  0xb2   : > { %s3516_s9 = scalar_lea.hbm %s4628_s5, 2048 }
  0xb3   : > { %p3517_p11 = scmp.ne.s32.totalorder %s4628_s5, %s3516_s9  ;;  %p3523_p1 = scmp.lt.u32.totalorder %s3516_s9, %s4628_s5 }
  0xb5   : > { %p3519_p10 = pnand %p3517_p11, %p3911_p13 }
  0xb7   : > { %p3520_p12 = pneg %p3519_p10 }
  0xb9   : > { %p3525_p4 = pnand %p3523_p1, %p3520_p12 }
  0xbb   : > { %3528 = shalt.err (!%p3525_p4)
}
  0xbc   : > { %s3529_s7 = scalar_lea.vmem %s427_s13, 2048  ;;  %p3537_p5 = scmp.lt.s32.totalorder %s427_s13, %s427_s13 }
  0xbd   : > { %p3530_p9 = scmp.ne.s32.totalorder %s427_s13, %s3529_s7  ;;  %p3538_p7 = scmp.lt.s32.totalorder %s3529_s7, %s3529_s7 }
  0xbf   : > { %p3532_p8 = pnand %p3530_p9, %p3911_p13  ;;  %p3539_p0 = por %p3538_p7, %p3537_p5 }
  0xc1   : > { %p3533_p3 = pneg %p3532_p8 }
  0xc3   : > { %p3540_p2 = pnand %p3539_p0, %p3533_p3 }
  0xc5   : > { %3543 = shalt.err (!%p3540_p2)
}
  0xc6   : > { %p4629_p11 = scmp.ne.s32.totalorder %s4611_s20, 0  ;;  %s3762_s26 = smov [#allocation14]  }
  0xc7   : > { %s455_s15 = sshll.u32 %s3762_s26, 4  ;;  %s3763_s25 = smov [#allocation17]   ;;  %s456_s15 = int_to_ptr.vmem [resolvable:$true] %s455_s15 }
  0xc8   : > { %3174 = dma.hbm_to_vmem [thread:$0]  (!%p4629_p11), %s4628_s5, 2048, %s427_s13, [#allocation9], %s4616_s19, %s4616_s19, %s4627_s28  }
  0xc9   : > { %s487_s23 = sshll.u32 %s3763_s25, 4  ;;  %s4630_s8 = sld [smem:[#allocation45_spill]]  ;;  %s488_s23 = int_to_ptr.vmem [resolvable:$true] %s487_s23 }
  0xcf   : > { %s3544_s6 = scalar_lea.hbm %s4630_s8, 1024 }
  0xd0   : > { %p3545_p2 = scmp.ne.s32.totalorder %s4630_s8, %s3544_s6  ;;  %p3551_p1 = scmp.lt.u32.totalorder %s3544_s6, %s4630_s8 }
  0xd2   : > { %p3547_p10 = pnand %p3545_p2, %p3911_p13 }
  0xd4   : > { %p3548_p12 = pneg %p3547_p10 }
  0xd6   : > { %p3553_p4 = pnand %p3551_p1, %p3548_p12 }
  0xd8   : > { %3556 = shalt.err (!%p3553_p4)
}
  0xd9   : > { %s3557_s13 = scalar_lea.vmem %s456_s15, 1024  ;;  %p3565_p5 = scmp.lt.s32.totalorder %s456_s15, %s456_s15 }
  0xda   : > { %p3558_p9 = scmp.ne.s32.totalorder %s456_s15, %s3557_s13  ;;  %p3566_p7 = scmp.lt.s32.totalorder %s3557_s13, %s3557_s13 }
  0xdc   : > { %p3560_p8 = pnand %p3558_p9, %p3911_p13  ;;  %p3567_p0 = por %p3566_p7, %p3565_p5 }
  0xde   : > { %p3561_p3 = pneg %p3560_p8 }
  0xe0   : > { %p3568_p6 = pnand %p3567_p0, %p3561_p3 }
  0xe2   : > { %3571 = shalt.err (!%p3568_p6)
}
  0xe3   : > { %3180 = dma.hbm_to_vmem [thread:$0]  (!%p4629_p11), %s4630_s8, 1024, %s456_s15, [#allocation13], %s4616_s19, %s4616_s19, %s4627_s28  }
  0xe4   : > { %s4631_s12 = sld [smem:[#allocation49_spill]] }
  0xea   : > { %s3572_s2 = scalar_lea.hbm %s4631_s12, 2048 }
  0xeb   : > { %p3573_p2 = scmp.ne.s32.totalorder %s4631_s12, %s3572_s2  ;;  %p3579_p12 = scmp.lt.u32.totalorder %s3572_s2, %s4631_s12 }
  0xed   : > { %p3575_p6 = pnand %p3573_p2, %p3911_p13 }
  0xef   : > { %p3576_p10 = pneg %p3575_p6 }
  0xf1   : > { %p3581_p1 = pnand %p3579_p12, %p3576_p10 }
  0xf3   : > { %3584 = shalt.err (!%p3581_p1)
}
  0xf4   : > { %s3585_s1 = scalar_lea.vmem %s488_s23, 2048  ;;  %p3593_p3 = scmp.lt.s32.totalorder %s488_s23, %s488_s23 }
  0xf5   : > { %p3586_p4 = scmp.ne.s32.totalorder %s488_s23, %s3585_s1  ;;  %p3594_p5 = scmp.lt.s32.totalorder %s3585_s1, %s3585_s1 }
  0xf7   : > { %p3588_p9 = pnand %p3586_p4, %p3911_p13  ;;  %p3595_p7 = por %p3594_p5, %p3593_p3 }
  0xf9   : > { %p3589_p8 = pneg %p3588_p9 }
  0xfb   : > { %p3596_p0 = pnand %p3595_p7, %p3589_p8 }
  0xfd   : > { %3599 = shalt.err (!%p3596_p0)
}
  0xfe   : > { %s4632_s15 = smov 8   ;;  %s4633_s13 = smov 128  }
  0xff   : > { %3186 = dma.hbm_to_vmem [thread:$0]  (!%p4629_p11), %s4631_s12, 2048, %s488_s23, [#allocation16], %s4633_s13, %s4633_s13, %s4632_s15  }
 0x100   : > { %s3764_s25 = smov [#allocation18]   ;;  %s2902_s2 = sshll.u32 %s3750_s29, 11 }
 0x101   : > { %s503_s11 = sshll.u32 %s3764_s25, 4  ;;  %s4634_s4 = sld [smem:[#allocation41_spill]]  ;;  %s504_s11 = int_to_ptr.vmem [resolvable:$true] %s503_s11 }
 0x102   : > { %s4635_s14 = sld [smem:[#allocation51_spill]] }
 0x107   : > { %s4131_s9 = scalar_lea.hbm %s4634_s4, %s2902_s2 }
 0x108   : > { %s3600_s5 = scalar_lea.hbm %s4635_s14, 2048 }
 0x109   : > { %p3601_p2 = scmp.ne.s32.totalorder %s4635_s14, %s3600_s5  ;;  %p3607_p12 = scmp.lt.u32.totalorder %s3600_s5, %s4635_s14 }
 0x10b   : > { %p3603_p6 = pnand %p3601_p2, %p3911_p13 }
 0x10d   : > { %p3604_p10 = pneg %p3603_p6 }
 0x10f   : > { %p3609_p1 = pnand %p3607_p12, %p3604_p10 }
 0x111   : > { %3612 = shalt.err (!%p3609_p1)
}
 0x112   : > { %s3613_s26 = scalar_lea.vmem %s504_s11, 2048  ;;  %p3621_p3 = scmp.lt.s32.totalorder %s504_s11, %s504_s11 }
 0x113   : > { %p3614_p4 = scmp.ne.s32.totalorder %s504_s11, %s3613_s26  ;;  %p3622_p5 = scmp.lt.s32.totalorder %s3613_s26, %s3613_s26 }
 0x115   : > { %p3616_p9 = pnand %p3614_p4, %p3911_p13  ;;  %p3623_p7 = por %p3622_p5, %p3621_p3 }
 0x117   : > { %p3617_p8 = pneg %p3616_p9 }
 0x119   : > { %p3624_p0 = pnand %p3623_p7, %p3617_p8 }
 0x11b   : > { %3627 = shalt.err (!%p3624_p0)
}
 0x11c   : > { %3189 = dma.hbm_to_vmem [thread:$0]  (!%p4629_p11), %s4635_s14, 2048, %s504_s11, [#allocation19], %s4616_s19, %s4616_s19, %s4627_s28  }
 0x11d   : > { %s3628_s18 = scalar_lea.hbm %s4131_s9, 2048  ;;  %p4636_p2 = scmp.ne.s32.totalorder %s4626_s24, 0 }
 0x11e   : > { %p3629_p13 = scmp.ne.s32.totalorder %s4131_s9, %s3628_s18  ;;  %s3633_s25 = scalar_lea.hbm %s4634_s4, 4096 }
 0x11f   : > { %p4637_p6 = pneg %p4636_p2  ;;  %p3634_p1 = scmp.lt.u32.totalorder %s4131_s9, %s4634_s4 }
 0x120   : > { %p3635_p4 = scmp.lt.u32.totalorder %s3633_s25, %s3628_s18  ;;  %p3637_p8 = scmp.lt.u32.totalorder %s3628_s18, %s4131_s9 }
 0x121   : > { %p3631_p10 = pnand %p3629_p13, %p4637_p6 }
 0x122   : > { %p3636_p9 = por %p3635_p4, %p3634_p1 }
 0x123   : > { %p3632_p12 = pneg %p3631_p10 }
 0x124   : > { %p3638_p11 = por %p3637_p8, %p3636_p9 }
 0x126   : > { %p3639_p3 = pnand %p3638_p11, %p3632_p12 }
 0x128   : > { %3642 = shalt.err (!%p3639_p3)
}
 0x129   : > { %s3643_s19 = scalar_lea.vmem %s4155_s21, 2048  ;;  %p4638_p7 = pmov %p4637_p6 }
 0x12a   : > { %p3644_p5 = scmp.ne.s32.totalorder %s4155_s21, %s3643_s19  ;;  %s3765_s28 = smov [#allocation10]  }
 0x12b   : > { %s3648_s11 = sshll.u32 %s3765_s28, 4  ;;  %s3649_s11 = int_to_ptr.vmem [resolvable:$false] %s3648_s11 }
 0x12c   : > { %p3646_p0 = pnand %p3644_p5, %p4638_p7  ;;  %s3650_s3 = scalar_lea.vmem %s3649_s11, 4096 }
 0x12d   : > { %p3651_p6 = scmp.lt.s32.totalorder %s4155_s21, %s3649_s11  ;;  %p3652_p10 = scmp.lt.s32.totalorder %s3650_s3, %s3643_s19 }
 0x12e   : > { %p3647_p13 = pneg %p3646_p0 }
 0x12f   : > { %p3653_p1 = por %p3652_p10, %p3651_p6 }
 0x131   : > { %p3654_p4 = pnand %p3653_p1, %p3647_p13 }
 0x133   : > { %3657 = shalt.err (!%p3654_p4)
}
 0x134   : > { %3196 = dma.hbm_to_vmem [thread:$0]  (!%p4636_p2), %s4131_s9, 2048, %s4155_s21, %s4030_s16, %s4633_s13, %s4633_s13, %s4632_s15  }
 0x135   : > { %p4639_p12 = scmp.ne.s32.totalorder %s4610_s17, 0 }
 0x136   : > { %s567_s7 = sand.u32 (!%p4639_p12), 1, %s3879_s0   ;;  %s4188_s1 = sand.u32 (!%p4639_p12), 1, %s3742_s27  }
 0x137   : > { %565 = sbr.rel (%p4639_p12) target bundleno = 1365 (0x555), region = 80  ;;  %s2764_s23 = sshll.u32 (!%p4639_p12), %s4188_s1, 5 }
 0x138   : > { %s568_s10 = scalar_lea.sflag (!%p4639_p12), [#allocation6], %s567_s7  ;;  %s4191_s24 = scalar_lea.vmem (!%p4639_p12), [#allocation5], %s2764_s23 }
 0x139   : > { %p4640_p9 = scmp.ne.s32.totalorder (!%p4639_p12), %s4620_s22, 0 }
 0x13e   : > { %3705 = dma.done.wait (%p4640_p9), %s568_s10, 512  }
 0x13f   : > { %3707 = vsyncadd (%p4640_p9), %s568_s10, 4294966784  ;;  %p4641_p2 = scmp.eq.s32.totalorder %s3879_s0, 0 }
 0x141   : > { %3709 = dma.done.wait (%p4641_p2), [#allocation9], 1024   ;;  %p4642_p8 = pmov %p4641_p2 }
 0x142   : > { %s2766_s17 = sshll.u32 %s4188_s1, 7 }
 0x143   : > { %3711 = vsyncadd (%p4642_p8), [#allocation9], 4294966272  ;;  %s4202_s16 = scalar_lea.vmem [#allocation10], %s2766_s17 }
 0x144   : > { %3713 = dma.done.wait (%p4640_p9), %s568_s10, 2048  }
 0x145   : > { %3715 = vsyncadd (%p4640_p9), %s568_s10, 4294965248  ;;  %p4643_p11 = pmov %p4641_p2 }
 0x146   : > { %p4644_p3 = pmov %p4641_p2 }
 0x147   : > { %3717 = dma.done.wait (%p4643_p11), [#allocation9], 2048  }
 0x148   : > { %3719 = vsyncadd (%p4644_p3), [#allocation9], 4294965248  ;;  %p4645_p5 = pmov %p4641_p2 }
 0x149   : > { %p4646_p7 = pmov %p4641_p2 }
 0x14a   : > { %3721 = dma.done.wait (%p4645_p5), [#allocation13], 17024  }
 0x14b   : > { %3723 = vsyncadd (%p4646_p7), [#allocation13], 4294950272  ;;  %p4647_p0 = pmov %p4641_p2 }
 0x14d   : > { %3725 = dma.done.wait (%p4647_p0), [#allocation16], 5120   ;;  %p4648_p13 = pmov %p4647_p0 }
 0x14e   : > { %p4649_p6 = pmov %p4647_p0 }
 0x14f   : > { %3727 = vsyncadd (%p4648_p13), [#allocation16], 4294962176 }
 0x150   : > { %3729 = dma.done.wait (%p4649_p6), [#allocation19], 2048   ;;  %p4650_p10 = pmov %p4647_p0 }
 0x151   : > { %s4225_s22 = sshll.u32 %s3879_s0, 10  ;;  %v3264_v0 = vld [vmem:[#allocation11 + $0x40] sm:$0xff]   ;;  %v3266_v2 = vld [vmem:[#allocation11 + $0x48] sm:$0xff]   ;;  %v3269_v5 = vld [vmem:[#allocation11 + $0x50] sm:$0xff]   ;;  %vm3767_vm0 = vmmov 0   ;;  %vm1851_vm1 = vcmask 1041409  }
 0x152   : > { %3731 = vsyncadd (%p4650_p10), [#allocation19], 4294965248  ;;  %s1309_s21 = sadd.s32 1, %s4225_s22  ;;  %s1314_s15 = sadd.s32 2, %s4225_s22  ;;  %v3265_v1 = vld [vmem:[#allocation11] sm:$0xff]   ;;  %2937 = vmatprep.subr.bf16.mxu1 %v3264_v0  ;;  %v3267_v3 = vld [vmem:[#allocation11 + $0x8] sm:$0xff]  }
 0x153   : > { %s4230_s13 = sld [smem:[#allocation4 + %s4225_s22]]  ;;  %2938 = vmatpush3.bf16.msra.mxu1 %v3265_v1  ;;  %v3268_v4 = vld [vmem:[#allocation8] sm:$0xff]   ;;  %s1319_s8 = sadd.s32 3, %s4225_s22  ;;  %v3270_v6 = vld [vmem:[#allocation11 + $0x10] sm:$0xff]   ;;  %v3271_v7 = vld [vmem:[#allocation8 + $0x8] sm:$0xff]   ;;  %vm1853_vm2 = vcmask 1042434  }
 0x154   : > { %s4232_s9 = sld [smem:[#allocation4 + %s1309_s21]]  ;;  %2939 = vmatprep.subr.bf16.mxu1 %v3266_v2  ;;  %s1324_s5 = sadd.s32 4, %s4225_s22  ;;  %3066 = vmatprep.subr.bf16.mxu0 %v3268_v4  ;;  %v3272_v8 = vld [vmem:[#allocation11 + $0x58] sm:$0xff]   ;;  %v3274_v9 = vld [vmem:[#allocation8 + $0x10] sm:$0xff]   ;;  %v3275_v11 = vld [vmem:[#allocation11 + $0x60] sm:$0xff]   ;;  %vm1855_vm3 = vcmask 1043459  }
 0x155   : > { %s4234_s26 = sld [smem:[#allocation4 + %s1314_s15]]  ;;  %s1329_s18 = sadd.s32 5, %s4225_s22  ;;  %3067 = vmatpush3.bf16.msra.mxu0 %v3268_v4  ;;  %v3273_v10 = vld [vmem:[#allocation11 + $0x18] sm:$0xff]   ;;  %v3276_v13 = vld [vmem:[#allocation11 + $0x20] sm:$0xff]   ;;  %v3278_v14 = vld [vmem:[#allocation11 + $0x68] sm:$0xff]   ;;  %vm1857_vm4 = vcmask 1044484  }
 0x156   : > { %s4239_s20 = sld [smem:[#allocation4 + %s1319_s8]]  ;;  %3068 = vmatprep.subr.bf16.mxu0 %v3271_v7  ;;  %s1334_s2 = sadd.s32 6, %s4225_s22  ;;  %v3277_v12 = vld [vmem:[#allocation8 + $0x18] sm:$0xff]   ;;  %v3280_v15 = vld [vmem:[#allocation8 + $0x20] sm:$0xff]   ;;  %v3279_v16 = vld [vmem:[#allocation11 + $0x28] sm:$0xff]   ;;  %vm1859_vm5 = vcmask 1045509  }
 0x157   : > { %2940 = vmatpush3.bf16.msra.mxu1 %v3267_v3  ;;  %s4241_s30 = sld [smem:[#allocation4 + %s1324_s5]]  ;;  %s1339_s6 = sadd.s32 7, %s4225_s22  ;;  %v3281_v17 = vld [vmem:[#allocation11 + $0x70] sm:$0xff]   ;;  %v3283_v18 = vld [vmem:[#allocation8 + $0x28] sm:$0xff]   ;;  %v3284_v20 = vld [vmem:[#allocation11 + $0x78] sm:$0xff]   ;;  %vm1861_vm6 = vcmask 1046534  }
 0x158   : > { %2941 = vmatprep.subr.bf16.mxu1 %v3269_v5  ;;  %s4243_s25 = sld [smem:[#allocation4 + %s1329_s18]]  ;;  %s4252_s11 = sadd.s32 128, %s4225_s22  ;;  %v3282_v19 = vld [vmem:[#allocation11 + $0x30] sm:$0xff]   ;;  %v3289_v22 = vld [vmem:[%s4202_s16 + $0x4] ss:$8 sps:$4 sm:$0xff]   ;;  %v3285_v24 = vld [vmem:[#allocation11 + $0x38] sm:$0xff]  }
 0x159   : > { %3069 = vmatpush3.bf16.msra.mxu0 %v3271_v7  ;;  %s4247_s19 = sld [smem:[#allocation4 + %s1334_s2]]  ;;  %s1350_s7 = sadd.s32 1, %s4252_s11  ;;  %v3286_v21 = vld [vmem:[#allocation8 + $0x30] sm:$0xff]   ;;  %1158 = vmatprep.mubr.bf16.mxu1 %v3289_v22  ;;  %v3291_v23 = vld [vmem:[%s4191_s24] sm:$0xff]   ;;  %v3290_v25 = vld [vmem:[#allocation8 + $0x38] sm:$0xff]   ;;  %vm1863_vm7 = vcmask 1047559  }
 0x15a   : > { %3070 = vmatprep.subr.bf16.mxu0 %v3274_v9  ;;  %s4249_s28 = sld [smem:[#allocation4 + %s1339_s6]]  ;;  %s1355_s23 = sadd.s32 2, %s4252_s11  ;;  %v3287_v26 = vld [vmem:[%s4202_s16] ss:$8 sps:$4 sm:$0xff]   ;;  %3082 = vmatprep.mubr.bf16.mxu0 %v3291_v23  ;;  %v3294_v27 = vld [vmem:[%s4202_s16 + $0x14] ss:$8 sps:$4 sm:$0xff]  }
 0x15b   : > { %2942 = vmatpush3.bf16.msra.mxu1 %v3270_v6  ;;  %s4255_s3 = sld [smem:[#allocation4 + %s4252_s11]]  ;;  %s1360_s21 = sadd.s32 3, %s4252_s11  ;;  %v3292_v28 = vld [vmem:[#allocation14] sm:$0xff]   ;;  %v3302_v30 = vld [vmem:[%s4191_s24 + $0x10] sm:$0xff]   ;;  %v3298_v34 = vld [vmem:[#allocation14 + $0x10] sm:$0xff]  }
 0x15c   : > { %2943 = vmatprep.subr.bf16.mxu1 %v3272_v8  ;;  %s4259_s10 = sld [smem:[#allocation4 + %s1350_s7]]  ;;  %s1365_s15 = sadd.s32 4, %s4252_s11  ;;  %v3293_v29 = vld [vmem:[%s4191_s24 + $0x8] sm:$0xff]   ;;  %v3297_v31 = vld [vmem:[#allocation14 + $0x8] sm:$0xff]   ;;  %v3303_v35 = vld [vmem:[%s4191_s24 + $0x18] sm:$0xff]  }
 0x15d   : > { %3071 = vmatpush3.bf16.msra.mxu0 %v3274_v9  ;;  %s4262_s17 = sld [smem:[#allocation4 + %s1355_s23]]  ;;  %s1370_s8 = sadd.s32 5, %s4252_s11  ;;  %v3296_v32 = vld [vmem:[%s4202_s16 + $0x10] ss:$8 sps:$4 sm:$0xff]   ;;  %v3299_v33 = vld [vmem:[%s4202_s16 + $0x24] ss:$8 sps:$4 sm:$0xff]  }
 0x15e   : > { %3072 = vmatprep.subr.bf16.mxu0 %v3277_v12  ;;  %s4268_s5 = sld [smem:[#allocation4 + %s1360_s21]]  ;;  %s1375_s2 = sadd.s32 6, %s4252_s11  ;;  %v4299_v36 = vld [vmem:[#allocation14 + $0x18] sm:$0xff]   ;;  %v3306_v45 = vld [vmem:[%s4202_s16 + $0x34] ss:$8 sps:$4 sm:$0xff]   ;;  %v3305_v49 = vld [vmem:[#allocation14 + $0x20] sm:$0xff]  }
 0x15f   : > { %2944 = vmatpush3.bf16.msra.mxu1 %v3273_v10  ;;  %s4271_s18 = sld [smem:[#allocation4 + %s1365_s15]]  ;;  %s1380_s7 = sadd.s32 7, %s4252_s11  ;;  %v3301_v41 = vld [vmem:[%s4202_s16 + $0x20] ss:$8 sps:$4 sm:$0xff]   ;;  %v3309_v59 = vld [vmem:[#allocation14 + $0x28] sm:$0xff]   ;;  %v3310_v62 = vld [vmem:[#allocation14 + $0x30] sm:$0xff]  }
 0x160   : > { %2945 = vmatprep.subr.bf16.mxu1 %v3275_v11  ;;  %s4274_s6 = sld [smem:[#allocation4 + %s1370_s8]]  ;;  %s4281_s21 = sadd.s32 256, %s4225_s22  ;;  %v3308_v60 = vld [vmem:[%s4202_s16 + $0x30] ss:$8 sps:$4 sm:$0xff]   ;;  %v3311_v63 = vld [vmem:[%s4202_s16 + $0x44] ss:$8 sps:$4 sm:$0xff]  }
 0x161   : > { %3073 = vmatpush3.bf16.msra.mxu0 %v3277_v12  ;;  %s4278_s23 = sld [smem:[#allocation4 + %s1375_s2]]  ;;  %s1391_s11 = sadd.s32 1, %s4281_s21  ;;  %v3314_v5 = vld [vmem:[#allocation14 + $0x38] sm:$0xff]   ;;  %v3315_v10 = vld [vmem:[%s4202_s16 + $0x54] ss:$8 sps:$4 sm:$0xff]  }
 0x162   : > { %3074 = vmatprep.subr.bf16.mxu0 %v3280_v15  ;;  %s4283_s15 = sld [smem:[#allocation4 + %s1380_s7]]  ;;  %s1396_s2 = sadd.s32 2, %s4281_s21  ;;  %v3313_v8 = vld [vmem:[%s4202_s16 + $0x40] ss:$8 sps:$4 sm:$0xff]  }
 0x163   : > { %2946 = vmatpush3.bf16.msra.mxu1 %v3276_v13  ;;  %s4286_s4 = sld [smem:[#allocation4 + %s4281_s21]]  ;;  %s1401_s12 = sadd.s32 3, %s4281_s21 }
 0x164   : > { %2947 = vmatprep.subr.bf16.mxu1 %v3278_v14  ;;  %s4291_s8 = sld [smem:[#allocation4 + %s1391_s11]]  ;;  %s1306_s11 = scalar_lea.vmem [#allocation12], %s4230_s13 }
 0x165   : > { %3075 = vmatpush3.bf16.msra.mxu0 %v3280_v15  ;;  %s4296_s7 = sld [smem:[#allocation4 + %s1396_s2]]  ;;  %v1307_v37 = vld [vmem:[%s1306_s11] sm:$0x1]  ;;  %s1311_s14 = scalar_lea.vmem [#allocation12], %s4232_s9  ;;  %v3317_v15 = vld [vmem:[%s4202_s16 + $0x50] ss:$8 sps:$4 sm:$0xff]  }
 0x166   : > { %3076 = vmatprep.subr.bf16.mxu0 %v3283_v18  ;;  %1308 = vst [vmem:[#allocation2] sm:$0x1] %v1307_v37  ;;  %v1312_v38 = vld [vmem:[%s1311_s14] sm:$0x1]  ;;  %s1316_s27 = scalar_lea.vmem [#allocation12], %s4234_s26  ;;  %s1321_s2 = scalar_lea.vmem [#allocation12], %s4239_s20 }
 0x167   : > { %2948 = vmatpush3.bf16.msra.mxu1 %v3279_v16  ;;  %v1317_v39 = vld [vmem:[%s1316_s27] sm:$0x1]  ;;  %1313 = vst [vmem:[#allocation2 + $0x1] sm:$0x1] %v1312_v38  ;;  %s1326_s24 = scalar_lea.vmem [#allocation12], %s4241_s30  ;;  %s1331_s13 = scalar_lea.vmem [#allocation12], %s4243_s25 }
 0x168   : > { %2949 = vmatprep.subr.bf16.mxu1 %v3281_v17  ;;  %v1322_v40 = vld [vmem:[%s1321_s2] sm:$0x1]  ;;  %1318 = vst [vmem:[#allocation2 + $0x2] sm:$0x1] %v1317_v39  ;;  %s1336_s11 = scalar_lea.vmem [#allocation12], %s4247_s19  ;;  %s1341_s14 = scalar_lea.vmem [#allocation12], %s4249_s28 }
 0x169   : > { %3077 = vmatpush3.bf16.msra.mxu0 %v3283_v18  ;;  %1323 = vst [vmem:[#allocation2 + $0x3] sm:$0x1] %v1322_v40  ;;  %v1327_v42 = vld [vmem:[%s1326_s24] sm:$0x1]  ;;  %s1347_s27 = scalar_lea.vmem [#allocation12], %s4255_s3  ;;  %s1352_s9 = scalar_lea.vmem [#allocation12], %s4259_s10 }
 0x16a   : > { %3078 = vmatprep.subr.bf16.mxu0 %v3286_v21  ;;  %v1332_v43 = vld [vmem:[%s1331_s13] sm:$0x1]  ;;  %1328 = vst [vmem:[#allocation2 + $0x4] sm:$0x1] %v1327_v42  ;;  %s1357_s26 = scalar_lea.vmem [#allocation12], %s4262_s17  ;;  %s1362_s20 = scalar_lea.vmem [#allocation12], %s4268_s5 }
 0x16b   : > { %2950 = vmatpush3.bf16.msra.mxu1 %v3282_v19  ;;  %v1337_v44 = vld [vmem:[%s1336_s11] sm:$0x1]  ;;  %1333 = vst [vmem:[#allocation2 + $0x5] sm:$0x1] %v1332_v43  ;;  %s1367_s30 = scalar_lea.vmem [#allocation12], %s4271_s18  ;;  %s1372_s25 = scalar_lea.vmem [#allocation12], %s4274_s6 }
 0x16c   : > { %2951 = vmatprep.subr.bf16.mxu1 %v3284_v20  ;;  %1338 = vst [vmem:[#allocation2 + $0x6] sm:$0x1] %v1337_v44  ;;  %v1342_v46 = vld [vmem:[%s1341_s14] sm:$0x1]  ;;  %s1377_s19 = scalar_lea.vmem [#allocation12], %s4278_s23  ;;  %s1382_s28 = scalar_lea.vmem [#allocation12], %s4283_s15 }
 0x16d   : > { %3079 = vmatpush3.bf16.msra.mxu0 %v3286_v21  ;;  %v1348_v47 = vld [vmem:[%s1347_s27] sm:$0x1]  ;;  %1343 = vst [vmem:[#allocation2 + $0x7] sm:$0x1] %v1342_v46  ;;  %s1388_s3 = scalar_lea.vmem [#allocation12], %s4286_s4  ;;  %s1393_s10 = scalar_lea.vmem [#allocation12], %s4291_s8 }
 0x16e   : > { %3080 = vmatprep.subr.bf16.mxu0 %v3290_v25  ;;  %v1353_v48 = vld [vmem:[%s1352_s9] sm:$0x1]  ;;  %1349 = vst [vmem:[#allocation2 + $0x8] sm:$0x1] %v1348_v47  ;;  %s4325_s17 = sld [smem:[#allocation4 + %s1401_s12]]  ;;  %s1398_s5 = scalar_lea.vmem [#allocation12], %s4296_s7 }
 0x16f   : > { %2952 = vmatpush3.bf16.msra.mxu1 %v3285_v24  ;;  %1354 = vst [vmem:[#allocation2 + $0x9] sm:$0x1] %v1353_v48  ;;  %v1358_v50 = vld [vmem:[%s1357_s26] sm:$0x1]  ;;  %s1406_s18 = sadd.s32 4, %s4281_s21  ;;  %s1411_s6 = sadd.s32 5, %s4281_s21 }
 0x170   : > { %v1363_v51 = vld [vmem:[%s1362_s20] sm:$0x1]  ;;  %1359 = vst [vmem:[#allocation2 + $0xa] sm:$0x1] %v1358_v50  ;;  %s1407_s4 = sld [smem:[#allocation4 + %s1406_s18]]  ;;  %s1416_s12 = sadd.s32 6, %s4281_s21 }
 0x171   : > { %3081 = vmatpush3.bf16.msra.mxu0 %v3290_v25  ;;  %v1368_v52 = vld [vmem:[%s1367_s30] sm:$0x1]  ;;  %1364 = vst [vmem:[#allocation2 + $0xb] sm:$0x1] %v1363_v51  ;;  %s1412_s23 = sld [smem:[#allocation4 + %s1411_s6]]  ;;  %s1421_s15 = sadd.s32 7, %s4281_s21 }
 0x172   : > { %1159 = vmatmul.mubr.bf16.vlgmr.msra.gmra.mrb[0].mxu1 %v3287_v26  ;;  %3090 = vmatprep.subr.bf16.mxu0 %v3292_v28  ;;  %1369 = vst [vmem:[#allocation2 + $0xc] sm:$0x1] %v1368_v52  ;;  %v1373_v53 = vld [vmem:[%s1372_s25] sm:$0x1]  ;;  %s4333_s8 = sld [smem:[#allocation4 + %s1416_s12]]  ;;  %s4339_s2 = sadd.s32 384, %s4225_s22 }
 0x173   : > { %1166 = vmatprep.mubr.bf16.mxu1 %v3294_v27  ;;  %v1378_v54 = vld [vmem:[%s1377_s19] sm:$0x1]  ;;  %1374 = vst [vmem:[#allocation2 + $0xd] sm:$0x1] %v1373_v53  ;;  %s4335_s7 = sld [smem:[#allocation4 + %s1421_s15]]  ;;  %s4342_s24 = sadd.s32 512, %s4225_s22 }
 0x174   : > { %3083 = vmatmul.mubr.bf16.vlgmr.msra.gmra.mrb[0].mxu0 %v3293_v29  ;;  %v1383_v55 = vld [vmem:[%s1382_s28] sm:$0x1]  ;;  %1379 = vst [vmem:[#allocation2 + $0xe] sm:$0x1] %v1378_v54  ;;  %s4346_s13 = sld [smem:[#allocation4 + %s4339_s2]]  ;;  %s1403_s21 = scalar_lea.vmem [#allocation12], %s4325_s17 }
 0x175   : > { %3091 = vmatpush3.bf16.msra.mxu0 %v3292_v28  ;;  %3086 = vmatprep.mubr.bf16.mxu0 %v3302_v30  ;;  %1384 = vst [vmem:[#allocation2 + $0xf] sm:$0x1] %v1383_v55  ;;  %v1389_v56 = vld [vmem:[%s1388_s3] sm:$0x1]  ;;  %s1432_s11 = sadd.s32 1, %s4339_s2  ;;  %s1437_s14 = sadd.s32 2, %s4339_s2 }
 0x176   : > { %3092 = vmatprep.subr.bf16.mxu0 %v3297_v31  ;;  %v1394_v57 = vld [vmem:[%s1393_s10] sm:$0x1]  ;;  %1390 = vst [vmem:[#allocation2 + $0x10] sm:$0x1] %v1389_v56  ;;  %s1408_s27 = scalar_lea.vmem [#allocation12], %s1407_s4  ;;  %s4351_s26 = sld [smem:[#allocation4 + %s1432_s11]] }
 0x177   : > { %1395 = vst [vmem:[#allocation2 + $0x11] sm:$0x1] %v1394_v57  ;;  %v1399_v58 = vld [vmem:[%s1398_s5] sm:$0x1]  ;;  %s1413_s9 = scalar_lea.vmem [#allocation12], %s1412_s23  ;;  %s4353_s20 = sld [smem:[#allocation4 + %s1437_s14]] }
 0x178   : > { %1400 = vst [vmem:[#allocation2 + $0x12] sm:$0x1] %v1399_v58  ;;  %v1631_v61 = vld [vmem:[#allocation2] sm:$0xff]  ;;  %s1418_s30 = scalar_lea.vmem [#allocation12], %s4333_s8  ;;  %s1442_s19 = sadd.s32 3, %s4339_s2 }
 0x179   : > { %3093 = vmatpush3.bf16.msra.mxu0 %v3297_v31  ;;  %v1404_v1 = vld [vmem:[%s1403_s21] sm:$0x1]  ;;  %s1423_s25 = scalar_lea.vmem [#allocation12], %s4335_s7  ;;  %s1447_s28 = sadd.s32 4, %s4339_s2  ;;  %v3318_v17 = vld [vmem:[%s4202_s16 + $0x64] ss:$8 sps:$4 sm:$0xff]  }
 0x17a   : > { %1167 = vmatmul.mubr.bf16.gmra.mrb[4].mxu1 %v3296_v32  ;;  %3094 = vmatprep.subr.bf16.mxu0 %v3298_v34  ;;  %1405 = vst [vmem:[#allocation2 + $0x13] sm:$0x1] %v1404_v1  ;;  %v1409_v3 = vld [vmem:[%s1408_s27] sm:$0x1]  ;;  %s1443_s3 = sld [smem:[#allocation4 + %s1442_s19]]  ;;  %s1429_s10 = scalar_lea.vmem [#allocation12], %s4346_s13 }
 0x17b   : > { %1174 = vmatprep.mubr.bf16.mxu1 %v3299_v33  ;;  %v1414_v4 = vld [vmem:[%s1413_s9] sm:$0x1]  ;;  %1410 = vst [vmem:[#allocation2 + $0x14] sm:$0x1] %v1409_v3  ;;  %s1448_s17 = sld [smem:[#allocation4 + %s1447_s28]]  ;;  %s1452_s5 = sadd.s32 5, %s4339_s2 }
 0x17c   : > { %3087 = vmatmul.mubr.bf16.gmra.mrb[4].mxu0 %v3303_v35  ;;  %v1632_v0 = vld [vmem:[#allocation2 + $0x8] sm:$0xff]  ;;  %1415 = vst [vmem:[#allocation2 + $0x15] sm:$0x1] %v1414_v4  ;;  %v1419_v6 = vld [vmem:[%s1418_s30] sm:$0x1]  ;;  %s1453_s18 = sld [smem:[#allocation4 + %s1452_s5]] }
 0x17d   : > { %3095 = vmatpush3.bf16.msra.mxu0 %v3298_v34  ;;  %v1639_v2 = vpack.c.bf16 %v1632_v0, %v1631_v61  ;;  %v1424_v7 = vld [vmem:[%s1423_s25] sm:$0x1]  ;;  %1420 = vst [vmem:[#allocation2 + $0x16] sm:$0x1] %v1419_v6  ;;  %s1457_s6 = sadd.s32 6, %s4339_s2  ;;  %s1434_s4 = scalar_lea.vmem [#allocation12], %s4351_s26 }
 0x17e   : > { %3096 = vmatprep.subr.bf16.mxu0 %v4299_v36  ;;  %1425 = vst [vmem:[#allocation2 + $0x17] sm:$0x1] %v1424_v7  ;;  %v1430_v9 = vld [vmem:[%s1429_s10] sm:$0x1]  ;;  %s1439_s23 = scalar_lea.vmem [#allocation12], %s4353_s20  ;;  %s1458_s12 = sld [smem:[#allocation4 + %s1457_s6]] }
 0x17f   : > { %3106 = vmatprep.mubr.bf16.mxu0 %v1639_v2  ;;  %1431 = vst [vmem:[#allocation2 + $0x18] sm:$0x1] %v1430_v9  ;;  %v1435_v11 = vld [vmem:[%s1434_s4] sm:$0x1]  ;;  %s1462_s15 = sadd.s32 7, %s4339_s2  ;;  %s1469_s7 = sld [smem:[#allocation4 + %s4342_s24]] }
 0x180   : > { %v1440_v12 = vld [vmem:[%s1439_s23] sm:$0x1]  ;;  %1436 = vst [vmem:[#allocation2 + $0x19] sm:$0x1] %v1435_v11  ;;  %s1463_s8 = sld [smem:[#allocation4 + %s1462_s15]]  ;;  %s1473_s13 = sadd.s32 1, %s4342_s24 }
 0x181   : > { %3097 = vmatpush3.bf16.msra.mxu0 %v4299_v36  ;;  %1441 = vst [vmem:[#allocation2 + $0x1a] sm:$0x1] %v1440_v12  ;;  %s1444_s21 = scalar_lea.vmem [#allocation12], %s1443_s3  ;;  %s1474_s11 = sld [smem:[#allocation4 + %s1473_s13]]  ;;  %v3320_v24 = vld [vmem:[%s4202_s16 + $0x60] ss:$8 sps:$4 sm:$0xff]  }
 0x182   : > { %1175 = vmatmul.mubr.bf16.gmra.mrb[8].mxu1 %v3301_v41  ;;  %3098 = vmatprep.subr.bf16.mxu0 %v3305_v49  ;;  %v1445_v13 = vld [vmem:[%s1444_s21] sm:$0x1]  ;;  %s1449_s14 = scalar_lea.vmem [#allocation12], %s1448_s17  ;;  %s1478_s27 = sadd.s32 2, %s4342_s24  ;;  %v3321_v26 = vld [vmem:[%s4202_s16 + $0x74] ss:$8 sps:$4 sm:$0xff]  }
 0x183   : > { %1182 = vmatprep.mubr.bf16.mxu1 %v3306_v45  ;;  %1446 = vst [vmem:[#allocation2 + $0x1b] sm:$0x1] %v1445_v13  ;;  %v1450_v14 = vld [vmem:[%s1449_s14] sm:$0x1]  ;;  %s1454_s2 = scalar_lea.vmem [#allocation12], %s1453_s18  ;;  %s1479_s9 = sld [smem:[#allocation4 + %s1478_s27]] }
 0x184   : > { %1451 = vst [vmem:[#allocation2 + $0x1c] sm:$0x1] %v1450_v14  ;;  %v1455_v16 = vld [vmem:[%s1454_s2] sm:$0x1]  ;;  %s1483_s26 = sadd.s32 3, %s4342_s24  ;;  %s1459_s30 = scalar_lea.vmem [#allocation12], %s1458_s12 }
 0x185   : > { %3099 = vmatpush3.bf16.msra.mxu0 %v3305_v49  ;;  %1456 = vst [vmem:[#allocation2 + $0x1d] sm:$0x1] %v1455_v16  ;;  %s1484_s20 = sld [smem:[#allocation4 + %s1483_s26]]  ;;  %v1460_v18 = vld [vmem:[%s1459_s30] sm:$0x1]  ;;  %s1470_s19 = scalar_lea.vmem [#allocation12], %s1469_s7 }
 0x186   : > { %3100 = vmatprep.subr.bf16.mxu0 %v3309_v59  ;;  %1461 = vst [vmem:[#allocation2 + $0x1e] sm:$0x1] %v1460_v18  ;;  %s1464_s25 = scalar_lea.vmem [#allocation12], %s1463_s8  ;;  %v1471_v20 = vld [vmem:[%s1470_s19] sm:$0x1]  ;;  %s1488_s28 = sadd.s32 4, %s4342_s24 }
 0x187   : > { %v1465_v19 = vld [vmem:[%s1464_s25] sm:$0x1]  ;;  %s1493_s3 = sadd.s32 5, %s4342_s24  ;;  %1472 = vst [vmem:[#allocation2 + $0x20] sm:$0x1] %v1471_v20  ;;  %s1489_s10 = sld [smem:[#allocation4 + %s1488_s28]] }
 0x188   : > { %1466 = vst [vmem:[#allocation2 + $0x1f] sm:$0x1] %v1465_v19  ;;  %s1475_s17 = scalar_lea.vmem [#allocation12], %s1474_s11  ;;  %s1494_s5 = sld [smem:[#allocation4 + %s1493_s3]]  ;;  %v1633_v22 = vld [vmem:[#allocation2 + $0x10] sm:$0xff]  ;;  %v3766_v0 = vmov 0.0  }
 0x189   : > { %3101 = vmatpush3.bf16.msra.mxu0 %v3309_v59  ;;  %v1476_v21 = vld [vmem:[%s1475_s17] sm:$0x1]  ;;  %s1498_s18 = sadd.s32 6, %s4342_s24  ;;  %s1480_s4 = scalar_lea.vmem [#allocation12], %s1479_s9  ;;  %v3323_v33 = vld [vmem:[%s4202_s16 + $0x70] ss:$8 sps:$4 sm:$0xff]   ;;  %3114 = vmatprep.subr.bf16.mxu1 %v3766_v0 }
 0x18a   : > { %1183 = vmatmul.mubr.bf16.gmra.mrb[12].mxu1 %v3308_v60  ;;  %3102 = vmatprep.subr.bf16.mxu0 %v3310_v62  ;;  %1477 = vst [vmem:[#allocation2 + $0x21] sm:$0x1] %v1476_v21  ;;  %s1499_s6 = sld [smem:[#allocation4 + %s1498_s18]]  ;;  %v1481_v23 = vld [vmem:[%s1480_s4] sm:$0x1]  ;;  %s1503_s23 = sadd.s32 7, %s4342_s24 }
 0x18b   : > { %1190 = vmatprep.mubr.bf16.mxu1 %v3311_v63  ;;  %1482 = vst [vmem:[#allocation2 + $0x22] sm:$0x1] %v1481_v23  ;;  %s1485_s12 = scalar_lea.vmem [#allocation12], %s1484_s20  ;;  %s1504_s15 = sld [smem:[#allocation4 + %s1503_s23]]  ;;  %v3324_v1 = vld [vmem:[#allocation15 + $0x80] sm:$0xff]   ;;  %v3325_v2 = vld [vmem:[#allocation15 + $0x88] sm:$0xff]  }
 0x18c   : > { %v1486_v25 = vld [vmem:[%s1485_s12] sm:$0x1]  ;;  %s4379_s8 = sadd.s32 640, %s4225_s22  ;;  %s4395_s4 = sadd.s32 768, %s4225_s22  ;;  %3115 = vmatpush3.bf16.msra.mxu1 %v3324_v1  ;;  %v3326_v3 = vld [vmem:[#allocation15 + $0x90] sm:$0xff]   ;;  %v3329_v6 = vld [vmem:[#allocation15] sm:$0xff]  }
 0x18d   : > { %3103 = vmatpush3.bf16.msra.mxu0 %v3310_v62  ;;  %1487 = vst [vmem:[#allocation2 + $0x23] sm:$0x1] %v1486_v25  ;;  %s1510_s7 = sld [smem:[#allocation4 + %s4379_s8]]  ;;  %s1514_s13 = sadd.s32 1, %s4379_s8  ;;  %3116 = vmatprep.subr.bf16.mxu1 %v3766_v0  ;;  %v3327_v4 = vld [vmem:[#allocation15 + $0x98] sm:$0xff]   ;;  %v3330_v7 = vld [vmem:[#allocation15 + $0x48] sm:$0xff]  }
 0x18e   : > { %3104 = vmatprep.subr.bf16.mxu0 %v3314_v5  ;;  %s4384_s21 = sld [smem:[#allocation4 + %s1514_s13]]  ;;  %s1490_s24 = scalar_lea.vmem [#allocation12], %s1489_s10  ;;  %v3332_v9 = vld [vmem:[#allocation15 + $0x8] sm:$0xff]   ;;  %v3335_v12 = vld [vmem:[#allocation15 + $0x10] sm:$0xff]   ;;  %v3336_v13 = vld [vmem:[#allocation15 + $0x58] sm:$0xff]  }
 0x18f   : > { %v1634_v27 = vld [vmem:[#allocation2 + $0x18] sm:$0xff]  ;;  %v1491_v28 = vld [vmem:[%s1490_s24] sm:$0x1]  ;;  %s1519_s11 = sadd.s32 2, %s4379_s8  ;;  %s1495_s14 = scalar_lea.vmem [#allocation12], %s1494_s5  ;;  %v3334_v11 = vld [vmem:[#allocation15 + $0xa8] sm:$0xff]  }
 0x190   : > { %v1640_v29 = vpack.c.bf16 %v1634_v27, %v1633_v22  ;;  %1492 = vst [vmem:[#allocation2 + $0x24] sm:$0x1] %v1491_v28  ;;  %v1496_v30 = vld [vmem:[%s1495_s14] sm:$0x1]  ;;  %s1520_s27 = sld [smem:[#allocation4 + %s1519_s11]]  ;;  %s1500_s2 = scalar_lea.vmem [#allocation12], %s1499_s6  ;;  %3117 = vmatpush3.bf16.msra.mxu1 %v3325_v2 }
 0x191   : > { %3105 = vmatpush3.bf16.msra.mxu0 %v3314_v5  ;;  %1497 = vst [vmem:[#allocation2 + $0x25] sm:$0x1] %v1496_v30  ;;  %v1501_v31 = vld [vmem:[%s1500_s2] sm:$0x1]  ;;  %s1524_s9 = sadd.s32 3, %s4379_s8  ;;  %s1529_s26 = sadd.s32 4, %s4379_s8  ;;  %3118 = vmatprep.subr.bf16.mxu1 %v3766_v0 }
 0x192   : > { %1191 = vmatmul.mubr.bf16.gmra.mrb[16].mxu1 %v3313_v8  ;;  %1502 = vst [vmem:[#allocation2 + $0x26] sm:$0x1] %v1501_v31  ;;  %s1525_s20 = sld [smem:[#allocation4 + %s1524_s9]]  ;;  %s1505_s30 = scalar_lea.vmem [#allocation12], %s1504_s15  ;;  %v3328_v5 = vld [vmem:[#allocation15 + $0x40] sm:$0xff]   ;;  %v3337_v14 = vld [vmem:[#allocation15 + $0xb0] sm:$0xff]  }
 0x193   : > { %1198 = vmatprep.mubr.bf16.mxu1 %v3315_v10  ;;  %v1506_v32 = vld [vmem:[%s1505_s30] sm:$0x1]  ;;  %s1530_s25 = sld [smem:[#allocation4 + %s1529_s26]]  ;;  %s1511_s19 = scalar_lea.vmem [#allocation12], %s1510_s7  ;;  %3013 = vmatprep.subr.bf16.mxu0 %v3328_v5  ;;  %v3331_v8 = vld [vmem:[#allocation15 + $0xa0] sm:$0xff]   ;;  %v3333_v10 = vld [vmem:[#allocation15 + $0x50] sm:$0xff]  }
 0x194   : > { %3107 = vmatmul.mubr.bf16.vlgmr.msra.gmra.mrb[8].mxu0 %v1640_v29  ;;  %1507 = vst [vmem:[#allocation2 + $0x27] sm:$0x1] %v1506_v32  ;;  %v1512_v34 = vld [vmem:[%s1511_s19] sm:$0x1]  ;;  %s1534_s28 = sadd.s32 5, %s4379_s8  ;;  %s1516_s3 = scalar_lea.vmem [#allocation12], %s4384_s21  ;;  %3119 = vmatpush3.bf16.msra.mxu1 %v3326_v3 }
 0x195   : > { %1513 = vst [vmem:[#allocation2 + $0x28] sm:$0x1] %v1512_v34  ;;  %v1517_v35 = vld [vmem:[%s1516_s3] sm:$0x1]  ;;  %s1535_s10 = sld [smem:[#allocation4 + %s1534_s28]]  ;;  %s1539_s17 = sadd.s32 6, %s4379_s8  ;;  %3120 = vmatprep.subr.bf16.mxu1 %v3766_v0  ;;  %3014 = vmatpush3.bf16.msra.mxu0 %v3329_v6 }
 0x196   : > { %1518 = vst [vmem:[#allocation2 + $0x29] sm:$0x1] %v1517_v35  ;;  %s1540_s5 = sld [smem:[#allocation4 + %s1539_s17]]  ;;  %s1521_s18 = scalar_lea.vmem [#allocation12], %s1520_s27  ;;  %3015 = vmatprep.subr.bf16.mxu0 %v3330_v7  ;;  %v3339_v16 = vld [vmem:[#allocation15 + $0x60] sm:$0xff]   ;;  %v3342_v19 = vld [vmem:[#allocation15 + $0x68] sm:$0xff]  }
 0x197   : > { %v1522_v36 = vld [vmem:[%s1521_s18] sm:$0x1]  ;;  %s1544_s6 = sadd.s32 7, %s4379_s8  ;;  %s1551_s12 = sld [smem:[#allocation4 + %s4395_s4]]  ;;  %v3341_v18 = vld [vmem:[#allocation15 + $0x20] sm:$0xff]   ;;  %v3343_v20 = vld [vmem:[#allocation15 + $0x28] sm:$0xff]  }
 0x198   : > { %1523 = vst [vmem:[#allocation2 + $0x2a] sm:$0x1] %v1522_v36  ;;  %s1545_s16 = sld [smem:[#allocation4 + %s1544_s6]]  ;;  %s1526_s23 = scalar_lea.vmem [#allocation12], %s1525_s20  ;;  %3121 = vmatpush3.bf16.msra.mxu1 %v3327_v4  ;;  %v3344_v21 = vld [vmem:[#allocation15 + $0x70] sm:$0xff]   ;;  %v3346_v23 = vld [vmem:[#allocation15 + $0x78] sm:$0xff]  }
 0x199   : > { %v1527_v37 = vld [vmem:[%s1526_s23] sm:$0x1]  ;;  %s1531_s15 = scalar_lea.vmem [#allocation12], %s1530_s25  ;;  %s1555_s7 = sadd.s32 1, %s4395_s4  ;;  %3122 = vmatprep.subr.bf16.mxu1 %v3766_v0  ;;  %3016 = vmatpush3.bf16.msra.mxu0 %v3332_v9  ;;  %v3345_v22 = vld [vmem:[#allocation15 + $0x30] sm:$0xff]  }
 0x19a   : > { %1199 = vmatmul.mubr.bf16.gmra.mrb[20].mxu1 %v3317_v15  ;;  %1528 = vst [vmem:[#allocation2 + $0x2b] sm:$0x1] %v1527_v37  ;;  %v1532_v38 = vld [vmem:[%s1531_s15] sm:$0x1]  ;;  %s1560_s13 = sadd.s32 2, %s4395_s4  ;;  %s1556_s8 = sld [smem:[#allocation4 + %s1555_s7]]  ;;  %3017 = vmatprep.subr.bf16.mxu0 %v3333_v10 }
 0x19b   : > { %1206 = vmatprep.mubr.bf16.mxu1 %v3318_v17  ;;  %1533 = vst [vmem:[#allocation2 + $0x2c] sm:$0x1] %v1532_v38  ;;  %s1536_s21 = scalar_lea.vmem [#allocation12], %s1535_s10  ;;  %s1561_s24 = sld [smem:[#allocation4 + %s1560_s13]]  ;;  %v1635_v44 = vld [vmem:[#allocation2 + $0x20] sm:$0xff] }
 0x19c   : > { %v1537_v39 = vld [vmem:[%s1536_s21] sm:$0x1]  ;;  %s1541_s11 = scalar_lea.vmem [#allocation12], %s1540_s5  ;;  %s1565_s14 = sadd.s32 3, %s4395_s4  ;;  %3123 = vmatpush3.bf16.msra.mxu1 %v3331_v8 }
 0x19d   : > { %1538 = vst [vmem:[#allocation2 + $0x2d] sm:$0x1] %v1537_v39  ;;  %v1542_v40 = vld [vmem:[%s1541_s11] sm:$0x1]  ;;  %s1570_s27 = sadd.s32 4, %s4395_s4  ;;  %s1566_s2 = sld [smem:[#allocation4 + %s1565_s14]]  ;;  %3124 = vmatprep.subr.bf16.mxu1 %v3766_v0  ;;  %3018 = vmatpush3.bf16.msra.mxu0 %v3335_v12 }
 0x19e   : > { %1543 = vst [vmem:[#allocation2 + $0x2e] sm:$0x1] %v1542_v40  ;;  %s1546_s9 = scalar_lea.vmem [#allocation12], %s1545_s16  ;;  %s1571_s26 = sld [smem:[#allocation4 + %s1570_s27]]  ;;  %v3338_v15 = vld [vmem:[#allocation15 + $0x18] sm:$0xff]   ;;  %3019 = vmatprep.subr.bf16.mxu0 %v3336_v13 }
 0x19f   : > { %v1547_v41 = vld [vmem:[%s1546_s9] sm:$0x1]  ;;  %s1552_s20 = scalar_lea.vmem [#allocation12], %s1551_s12  ;;  %s1575_s30 = sadd.s32 5, %s4395_s4 }
 0x1a0   : > { %1548 = vst [vmem:[#allocation2 + $0x2f] sm:$0x1] %v1547_v41  ;;  %v1553_v42 = vld [vmem:[%s1552_s20] sm:$0x1]  ;;  %s1580_s25 = sadd.s32 6, %s4395_s4  ;;  %s1576_s19 = sld [smem:[#allocation4 + %s1575_s30]]  ;;  %3125 = vmatpush3.bf16.msra.mxu1 %v3334_v11 }
 0x1a1   : > { %1554 = vst [vmem:[#allocation2 + $0x30] sm:$0x1] %v1553_v42  ;;  %s1557_s28 = scalar_lea.vmem [#allocation12], %s1556_s8  ;;  %s1581_s3 = sld [smem:[#allocation4 + %s1580_s25]]  ;;  %3126 = vmatprep.subr.bf16.mxu1 %v3766_v0  ;;  %3020 = vmatpush3.bf16.msra.mxu0 %v3338_v15  ;;  %v3340_v17 = vld [vmem:[#allocation15 + $0xb8] sm:$0xff]  }
 0x1a2   : > { %1207 = vmatmul.mubr.bf16.gmra.mrb[24].mxu1 %v3320_v24  ;;  %v1558_v43 = vld [vmem:[%s1557_s28] sm:$0x1]  ;;  %s1562_s10 = scalar_lea.vmem [#allocation12], %s1561_s24  ;;  %s1585_s17 = sadd.s32 7, %s4395_s4  ;;  %3021 = vmatprep.subr.bf16.mxu0 %v3339_v16 }
 0x1a3   : > { %1214 = vmatprep.mubr.bf16.mxu1 %v3321_v26  ;;  %1559 = vst [vmem:[#allocation2 + $0x31] sm:$0x1] %v1558_v43  ;;  %v1563_v45 = vld [vmem:[%s1562_s10] sm:$0x1]  ;;  %s4406_s5 = sadd.s32 896, %s4225_s22  ;;  %s1586_s18 = sld [smem:[#allocation4 + %s1585_s17]] }
 0x1a4   : > { %1564 = vst [vmem:[#allocation2 + $0x32] sm:$0x1] %v1563_v45  ;;  %s1567_s6 = scalar_lea.vmem [#allocation12], %s1566_s2  ;;  %s1592_s16 = sld [smem:[#allocation4 + %s4406_s5]]  ;;  %3127 = vmatpush3.bf16.msra.mxu1 %v3337_v14  ;;  %v3347_v30 = vld [vmem:[#allocation15 + $0x38] sm:$0xff]  }
 0x1a5   : > { %v1568_v46 = vld [vmem:[%s1567_s6] sm:$0x1]  ;;  %s1572_s23 = scalar_lea.vmem [#allocation12], %s1571_s26  ;;  %s1596_s12 = sadd.s32 1, %s4406_s5  ;;  %3128 = vmatprep.subr.bf16.mxu1 %v3766_v0  ;;  %3022 = vmatpush3.bf16.msra.mxu0 %v3341_v18 }
 0x1a6   : > { %1569 = vst [vmem:[#allocation2 + $0x33] sm:$0x1] %v1568_v46  ;;  %v1573_v47 = vld [vmem:[%s1572_s23] sm:$0x1]  ;;  %s1601_s15 = sadd.s32 2, %s4406_s5  ;;  %s1597_s4 = sld [smem:[#allocation4 + %s1596_s12]]  ;;  %3023 = vmatprep.subr.bf16.mxu0 %v3342_v19 }
 0x1a7   : > { %v1636_v48 = vld [vmem:[#allocation2 + $0x28] sm:$0xff]  ;;  %1574 = vst [vmem:[#allocation2 + $0x34] sm:$0x1] %v1573_v47  ;;  %s1577_s22 = scalar_lea.vmem [#allocation12], %s1576_s19  ;;  %s1602_s7 = sld [smem:[#allocation4 + %s1601_s15]] }
 0x1a8   : > { %v1641_v49 = vpack.c.bf16 %v1636_v48, %v1635_v44  ;;  %v1578_v50 = vld [vmem:[%s1577_s22] sm:$0x1]  ;;  %s1582_s13 = scalar_lea.vmem [#allocation12], %s1581_s3  ;;  %s1606_s8 = sadd.s32 3, %s4406_s5  ;;  %3129 = vmatpush3.bf16.msra.mxu1 %v3340_v17 }
 0x1a9   : > { %1579 = vst [vmem:[#allocation2 + $0x35] sm:$0x1] %v1578_v50  ;;  %v1583_v51 = vld [vmem:[%s1582_s13] sm:$0x1]  ;;  %s1611_s21 = sadd.s32 4, %s4406_s5  ;;  %s1607_s24 = sld [smem:[#allocation4 + %s1606_s8]]  ;;  %3024 = vmatpush3.bf16.msra.mxu0 %v3343_v20 }
 0x1aa   : > { %1215 = vmatmul.mubr.bf16.gmra.mrb[28].mxu1 %v3323_v33  ;;  %3110 = vmatprep.mubr.bf16.mxu0 %v1641_v49  ;;  %1584 = vst [vmem:[#allocation2 + $0x36] sm:$0x1] %v1583_v51  ;;  %s1587_s11 = scalar_lea.vmem [#allocation12], %s1586_s18  ;;  %s1612_s14 = sld [smem:[#allocation4 + %s1611_s21]] }
 0x1ab   : > { %v1588_v52 = vld [vmem:[%s1587_s11] sm:$0x1]  ;;  %s1593_s27 = scalar_lea.vmem [#allocation12], %s1592_s16  ;;  %s1616_s2 = sadd.s32 5, %s4406_s5  ;;  %3130 = vmatprep.mubr.msk.bf16.mxu1 %vm3767_vm0, %v3766_v0  ;;  %3025 = vmatprep.subr.bf16.mxu0 %v3344_v21 }
 0x1ac   : > { %1589 = vst [vmem:[#allocation2 + $0x37] sm:$0x1] %v1588_v52  ;;  %v1594_v53 = vld [vmem:[%s1593_s27] sm:$0x1]  ;;  %s1621_s9 = sadd.s32 6, %s4406_s5  ;;  %s1617_s26 = sld [smem:[#allocation4 + %s1616_s2]] }
 0x1ad   : > { %1595 = vst [vmem:[#allocation2 + $0x38] sm:$0x1] %v1594_v53  ;;  %s1598_s20 = scalar_lea.vmem [#allocation12], %s1597_s4  ;;  %s1622_s30 = sld [smem:[#allocation4 + %s1621_s9]]  ;;  %3026 = vmatpush3.bf16.msra.mxu0 %v3345_v22 }
 0x1ae   : > { %v1599_v54 = vld [vmem:[%s1598_s20] sm:$0x1]  ;;  %s1603_s25 = scalar_lea.vmem [#allocation12], %s1602_s7  ;;  %s1626_s19 = sadd.s32 7, %s4406_s5  ;;  %3027 = vmatprep.subr.bf16.mxu0 %v3346_v23 }
 0x1af   : > { %1600 = vst [vmem:[#allocation2 + $0x39] sm:$0x1] %v1599_v54  ;;  %v1604_v55 = vld [vmem:[%s1603_s25] sm:$0x1]  ;;  %s1627_s28 = sld [smem:[#allocation4 + %s1626_s19]]  ;;  %s1608_s3 = scalar_lea.vmem [#allocation12], %s1607_s24 }
 0x1b0   : > { %1605 = vst [vmem:[#allocation2 + $0x3a] sm:$0x1] %v1604_v55  ;;  %v1609_v56 = vld [vmem:[%s1608_s3] sm:$0x1]  ;;  %s1613_s10 = scalar_lea.vmem [#allocation12], %s1612_s14  ;;  %s4651_s23 = sld [smem:[#allocation43_spill]] }
 0x1b1   : > { %1610 = vst [vmem:[#allocation2 + $0x3b] sm:$0x1] %v1609_v56  ;;  %v1614_v57 = vld [vmem:[%s1613_s10] sm:$0x1]  ;;  %s4652_s4 = sld [smem:[#allocation40_spill]]  ;;  %3028 = vmatpush3.bf16.msra.mxu0 %v3347_v30  ;;  %s4653_s13 = sld [smem:[#allocation46_spill]] }
 0x1b2   : > { %1615 = vst [vmem:[#allocation2 + $0x3c] sm:$0x1] %v1614_v57  ;;  %s1618_s17 = scalar_lea.vmem [#allocation12], %s1617_s26  ;;  %s4654_s24 = sld [smem:[#allocation48_spill]] }
 0x1b3   : > { %v1619_v58 = vld [vmem:[%s1618_s17] sm:$0x1]  ;;  %s1623_s18 = scalar_lea.vmem [#allocation12], %s1622_s30  ;;  %v1637_v61 = vld [vmem:[#allocation2 + $0x30] sm:$0xff]  ;;  %s4655_s27 = sld [smem:[#allocation50_spill]] }
 0x1b4   : > { %1620 = vst [vmem:[#allocation2 + $0x3d] sm:$0x1] %v1619_v58  ;;  %v1624_v59 = vld [vmem:[%s1623_s18] sm:$0x1]  ;;  %s2773_s2 = sshll.u32 %s4188_s1, 3  ;;  %s4656_s20 = sld [smem:[#allocation52_spill]] }
 0x1b5   : > { %1625 = vst [vmem:[#allocation2 + $0x3e] sm:$0x1] %v1624_v59  ;;  %s1628_s6 = scalar_lea.vmem [#allocation12], %s1627_s28  ;;  %s4657_s30 = sld [smem:[#allocation35_spill]] }
 0x1b6   : > { %v1629_v60 = vld [vmem:[%s1628_s6] sm:$0x1]  ;;  %s2897_s25 = sshll.u32 %s3879_s0, 7  ;;  %s659_s19 = scalar_lea.vmem [#allocation20], %s2773_s2 }
 0x1b7   : > { %1630 = vst [vmem:[#allocation2 + $0x3f] sm:$0x1] %v1629_v60  ;;  %v4419_v25 = vld [vmem:[%s4651_s23] ss:$0 sm:$0xff]  ;;  %s2525_s28 = sshll.u32 %s659_s19, 4  ;;  %s4658_s17 = sld [smem:[#allocation53_spill]]  ;;  %s4504_s28 = int_to_ptr.vmem [resolvable:$true] %s2525_s28 }
 0x1b8   : > { %v4424_v29 = vld [vmem:[%s4652_s4] ss:$0 sm:$0xff]  ;;  %s2512_s6 = scalar_lea.sflag [#allocation7], %s4188_s1  ;;  %s3658_s5 = scalar_lea.vmem %s4504_s28, 128 }
 0x1b9   : > { %p3659_p1 = scmp.ne.s32.totalorder %s4504_s28, %s3658_s5  ;;  %s3769_s0 = smov [#allocation20]  }
 0x1ba   : > { %s3662_s16 = sshll.u32 %s3769_s0, 4  ;;  %s3663_s16 = int_to_ptr.vmem [resolvable:$false] %s3662_s16 }
 0x1bb   : > { %p4659_p4 = scmp.ne.s32.totalorder %s4657_s30, 0  ;;  %s3664_s23 = scalar_lea.vmem %s3663_s16, 256 }
 0x1bc   : > { %p3665_p2 = scmp.lt.s32.totalorder %s4504_s28, %s3663_s16  ;;  %p3666_p8 = scmp.lt.s32.totalorder %s3664_s23, %s3658_s5 }
 0x1bd   : > { %s4502_s18 = scalar_lea.hbm %s4658_s17, %s2897_s25  ;;  %p3660_p12 = pnand %p3659_p1, %p4659_p4 }
 0x1be   : > { %v1638_v62 = vld [vmem:[#allocation2 + $0x38] sm:$0xff]  ;;  %p3667_p11 = por %p3666_p8, %p3665_p2 }
 0x1bf   : > { %v1642_v63 = vpack.c.bf16 %v1638_v62, %v1637_v61  ;;  %p3661_p9 = pneg %p3660_p12 }
 0x1c1   : > { %3111 = vmatmul.mubr.bf16.gmra.mrb[12].mxu0 %v1642_v63  ;;  %p3668_p3 = pnand %p3667_p11, %p3661_p9 }
 0x245   : > { %v2953_v24 = vpop.f32.mrb[0].mxu1 }
 0x246   : > { %v2954_v26 = vpop.f32.mrb[1].mxu1 }
 0x247   : > { %v2955_v27 = vadd.f32 %v2954_v26, %v2953_v24  ;;  %v2956_v28 = vpop.f32.mrb[2].mxu1  ;;  %v3084_v34 = vpop.f32.mrb[0].mxu0 }
 0x248   : > { %v2957_v31 = vpop.f32.mrb[3].mxu1  ;;  %v809_v35 = vadd.f32 %v3084_v34, %v4424_v29  ;;  %v800_v36 = vpop.f32.mrb[1].mxu0 }
 0x249   : > { %v1161_v32 = vadd.f32 %v2955_v27, %v4419_v25  ;;  %v2958_v33 = vadd.f32 %v2957_v31, %v2956_v28  ;;  %v801_v38 = vadd.f32 %v4424_v29, %v800_v36  ;;  %v3085_v39 = vpop.f32.mrb[2].mxu0 }
 0x24a   : > { %v833_v40 = vmax.f32 %v809_v35, 0.0  ;;  %v812_v41 = vadd.f32 %v3085_v39, %v4424_v29  ;;  %v803_v42 = vpop.f32.mrb[3].mxu0 }
 0x24b   : > { %v1164_v37 = vadd.f32 %v2958_v33, %v4419_v25  ;;  %v1223_v43 = vmax.f32 %v1161_v32, 0.0  ;;  %v831_v46 = vmax.f32 %v801_v38, 0.0  ;;  %v804_v47 = vadd.f32 %v4424_v29, %v803_v42 }
 0x24c   : > { %v851_v49 = vrot.slane %v833_v40, 4  ;;  %v834_v50 = vmax.f32 %v812_v41, 0.0 }
 0x24d   : > { %v1224_v44 = vmax.f32 %v1164_v37, 0.0  ;;  %v2959_v45 = vpop.f32.mrb[4].mxu1  ;;  %v839_v54 = vrot.slane %v831_v46, 4  ;;  %v832_v55 = vmax.f32 %v804_v47, 0.0 }
 0x24e   : > { %v2960_v48 = vpop.f32.mrb[5].mxu1  ;;  %v852_v57 = vadd.f32 %v851_v49, %v833_v40  ;;  %v857_v58 = vrot.slane %v834_v50, 4 }
 0x24f   : > { %v1239_v51 = vadd.f32 %v1224_v44, %v1223_v43  ;;  %v2961_v52 = vadd.f32 %v2960_v48, %v2959_v45  ;;  %v2962_v53 = vpop.f32.mrb[6].mxu1  ;;  %v840_v62 = vadd.f32 %v839_v54, %v831_v46  ;;  %v3088_v63 = vpop.f32.mrb[4].mxu0  ;;  %v845_v2 = vrot.slane %v832_v55, 4 }
 0x250   : > { %v2963_v56 = vpop.f32.mrb[7].mxu1  ;;  %v853_v0 = vrot.slane %v852_v57, 2  ;;  %v858_v1 = vadd.f32 %v857_v58, %v834_v50  ;;  %v825_v3 = vadd.f32 %v3088_v63, %v4424_v29  ;;  %v816_v4 = vpop.f32.mrb[5].mxu0 }
 0x251   : > { %v1240_v59 = vrot.slane %v1239_v51, 4  ;;  %v1169_v60 = vadd.f32 %v2961_v52, %v4419_v25  ;;  %v2964_v61 = vadd.f32 %v2963_v56, %v2962_v53  ;;  %v841_v8 = vrot.slane %v840_v62, 2  ;;  %v3089_v9 = vpop.f32.mrb[6].mxu0 }
 0x252   : > { %v854_v10 = vadd.f32 %v853_v0, %v852_v57  ;;  %v859_v11 = vrot.slane %v858_v1, 2  ;;  %v846_v12 = vadd.f32 %v845_v2, %v832_v55  ;;  %v837_v13 = vmax.f32 %v825_v3, 0.0  ;;  %v819_v14 = vpop.f32.mrb[7].mxu0 }
 0x253   : > { %v1241_v5 = vadd.f32 %v1240_v59, %v1239_v51  ;;  %v1225_v6 = vmax.f32 %v1169_v60, 0.0  ;;  %v1172_v7 = vadd.f32 %v2964_v61, %v4419_v25  ;;  %v842_v17 = vadd.f32 %v841_v8, %v840_v62 }
 0x254   : > { %v817_v19 = vadd.f32 %v4424_v29, %v816_v4  ;;  %v855_v20 = vrot.slane %v854_v10, 1  ;;  %v860_v21 = vadd.f32 %v859_v11, %v858_v1  ;;  %v847_v22 = vrot.slane %v846_v12, 2 }
 0x255   : > { %v1242_v15 = vrot.slane %v1241_v5, 2  ;;  %v1226_v16 = vmax.f32 %v1172_v7, 0.0  ;;  %v2965_v18 = vpop.f32.mrb[8].mxu1  ;;  %v875_v24 = vrot.slane %v837_v13, 4  ;;  %v843_v28 = vrot.slane %v842_v17, 1 }
 0x256   : > { %v2966_v23 = vpop.f32.mrb[9].mxu1  ;;  %v856_v32 = vadd.f32 %v855_v20, %v854_v10  ;;  %v861_v33 = vrot.slane %v860_v21, 1  ;;  %v848_v34 = vadd.f32 %v847_v22, %v846_v12  ;;  %v835_v49 = vmax.f32 %v817_v19, 0.0 }
 0x257   : > { %v1243_v26 = vadd.f32 %v1242_v15, %v1241_v5  ;;  %v1246_v27 = vadd.f32 %v1226_v16, %v1225_v6  ;;  %v2967_v30 = vadd.f32 %v2966_v23, %v2965_v18  ;;  %v2968_v31 = vpop.f32.mrb[10].mxu1  ;;  %v876_v35 = vadd.f32 %v875_v24, %v837_v13 }
 0x258   : > { %v2969_v36 = vpop.f32.mrb[11].mxu1  ;;  %v844_v39 = vadd.f32 %v843_v28, %v842_v17  ;;  %v862_v40 = vadd.f32 %v861_v33, %v860_v21  ;;  %v849_v41 = vrot.slane %v848_v34, 1  ;;  %v889_v44 = vmul.f32 0.125, %v856_v32 }
 0x259   : > { %v1244_v37 = vrot.slane %v1243_v26, 1  ;;  %v1247_v38 = vrot.slane %v1246_v27, 4  ;;  %v877_v42 = vrot.slane %v876_v35, 2  ;;  %v1177_v45 = vadd.f32 %v2967_v30, %v4419_v25 }
 0x25a   : > { %v887_v47 = vmul.f32 0.125, %v844_v39  ;;  %v850_v48 = vadd.f32 %v849_v41, %v848_v34  ;;  %v890_v51 = vmul.f32 0.125, %v862_v40  ;;  %v2970_v52 = vadd.f32 %v2969_v36, %v2968_v31 }
 0x25b   : > { %v1248_v43 = vadd.f32 %v1247_v38, %v1246_v27  ;;  %v1245_v46 = vadd.f32 %v1244_v37, %v1243_v26  ;;  %v828_v53 = vadd.f32 %v3089_v9, %v4424_v29  ;;  %v878_v56 = vadd.f32 %v877_v42, %v876_v35 }
 0x25c   : > { %v888_v55 = vmul.f32 0.125, %v850_v48  ;;  %v863_v57 = vrot.slane %v835_v49, 4  ;;  %v820_v58 = vadd.f32 %v4424_v29, %v819_v14  ;;  %v1180_v61 = vadd.f32 %v2970_v52, %v4419_v25 }
 0x25d   : > { %v1249_v50 = vrot.slane %v1248_v43, 2  ;;  %v2971_v54 = vpop.f32.mrb[12].mxu1  ;;  %v838_v62 = vmax.f32 %v828_v53, 0.0  ;;  %v1227_v2 = vmax.f32 %v1177_v45, 0.0  ;;  %v879_v10 = vrot.slane %v878_v56, 1 }
 0x25e   : > { %v2972_v59 = vpop.f32.mrb[13].mxu1  ;;  %v1852_v1 = vsel %vm1851_vm1, %v888_v55, %v887_v47  ;;  %v864_v3 = vadd.f32 %v863_v57, %v835_v49  ;;  %v836_v4 = vmax.f32 %v820_v58, 0.0  ;;  %v1228_v8 = vmax.f32 %v1180_v61, 0.0 }
 0x25f   : > { %v1250_v60 = vadd.f32 %v1249_v50, %v1248_v43  ;;  %v2973_v63 = vadd.f32 %v2972_v59, %v2971_v54  ;;  %v2974_v0 = vpop.f32.mrb[14].mxu1  ;;  %v1854_v7 = vsel %vm1853_vm2, %v889_v44, %v1852_v1  ;;  %v881_v9 = vrot.slane %v838_v62, 4 }
 0x260   : > { %v2975_v5 = vpop.f32.mrb[15].mxu1  ;;  %v865_v29 = vrot.slane %v864_v3, 2  ;;  %v1856_v11 = vsel %vm1855_vm3, %v890_v51, %v1854_v7  ;;  %v869_v12 = vrot.slane %v836_v4, 4  ;;  %v1253_v14 = vadd.f32 %v1228_v8, %v1227_v2 }
 0x261   : > { %v1251_v6 = vrot.slane %v1250_v60, 1  ;;  %v882_v15 = vadd.f32 %v881_v9, %v838_v62  ;;  %v1185_v18 = vadd.f32 %v2973_v63, %v4419_v25  ;;  %v2976_v19 = vadd.f32 %v2975_v5, %v2974_v0 }
 0x262   : > { %v866_v16 = vadd.f32 %v865_v29, %v864_v3  ;;  %v870_v17 = vadd.f32 %v869_v12, %v836_v4  ;;  %v1295_v20 = vmul.f32 0.0625, %v1245_v46  ;;  %v1254_v22 = vrot.slane %v1253_v14, 4 }
 0x263   : > { %v1252_v13 = vadd.f32 %v1251_v6, %v1250_v60  ;;  %v883_v23 = vrot.slane %v882_v15, 2  ;;  %v880_v26 = vadd.f32 %v879_v10, %v878_v56  ;;  %v1188_v30 = vadd.f32 %v2976_v19, %v4419_v25 }
 0x264   : > { %v867_v27 = vrot.slane %v866_v16, 1  ;;  %v871_v28 = vrot.slane %v870_v17, 2  ;;  %v1255_v33 = vadd.f32 %v1254_v22, %v1253_v14  ;;  %v1229_v39 = vmax.f32 %v1185_v18, 0.0 }
 0x265   : > { %v1296_v21 = vmul.f32 0.0625, %v1252_v13  ;;  %v2977_v24 = vpop.f32.mrb[16].mxu1  ;;  %v884_v34 = vadd.f32 %v883_v23, %v882_v15  ;;  %v1230_v40 = vmax.f32 %v1188_v30, 0.0  ;;  %v893_v55 = vmul.f32 0.125, %v880_v26 }
 0x266   : > { %v2978_v31 = vpop.f32.mrb[17].mxu1  ;;  %v868_v37 = vadd.f32 %v867_v27, %v866_v16  ;;  %v872_v38 = vadd.f32 %v871_v28, %v870_v17  ;;  %v1256_v42 = vrot.slane %v1255_v33, 2  ;;  %v4459_v16 = vld [vmem:[%s4653_s13] ss:$0 sm:$0xff] }
 0x267   : > { %v1874_v32 = vsel %vm1851_vm1, %v1296_v21, %v1295_v20  ;;  %v2979_v35 = vadd.f32 %v2978_v31, %v2977_v24  ;;  %v2980_v36 = vpop.f32.mrb[18].mxu1  ;;  %v885_v43 = vrot.slane %v884_v34, 1  ;;  %v1260_v48 = vadd.f32 %v1230_v40, %v1229_v39  ;;  %v3108_v22 = vpop.f32.mrb[8].mxu0 }
 0x268   : > { %v2981_v41 = vpop.f32.mrb[19].mxu1  ;;  %v891_v46 = vmul.f32 0.125, %v868_v37  ;;  %v873_v47 = vrot.slane %v872_v38, 1  ;;  %v1257_v49 = vadd.f32 %v1256_v42, %v1255_v33  ;;  %v1757_v27 = vadd.f32 %v3108_v22, %v4459_v16  ;;  %v1748_v28 = vpop.f32.mrb[9].mxu0 }
 0x269   : > { %v1193_v44 = vadd.f32 %v2979_v35, %v4419_v25  ;;  %v2982_v45 = vadd.f32 %v2981_v41, %v2980_v36  ;;  %v886_v50 = vadd.f32 %v885_v43, %v884_v34  ;;  %v1261_v54 = vrot.slane %v1260_v48, 4  ;;  %v3109_v35 = vpop.f32.mrb[10].mxu0 }
 0x26a   : > { %v1858_v52 = vsel %vm1857_vm4, %v891_v46, %v1856_v11  ;;  %v874_v53 = vadd.f32 %v873_v47, %v872_v38  ;;  %v1258_v56 = vrot.slane %v1257_v49, 1  ;;  %v1749_v34 = vadd.f32 %v4459_v16, %v1748_v28  ;;  %v1751_v40 = vpop.f32.mrb[11].mxu0 }
 0x26b   : > { %v1196_v51 = vadd.f32 %v2982_v45, %v4419_v25  ;;  %v1231_v57 = vmax.f32 %v1193_v44, 0.0  ;;  %v894_v60 = vmul.f32 0.125, %v886_v50  ;;  %v1262_v62 = vadd.f32 %v1261_v54, %v1260_v48 }
 0x26c   : > { %v892_v61 = vmul.f32 0.125, %v874_v53  ;;  %v1259_v0 = vadd.f32 %v1258_v56, %v1257_v49  ;;  %v1781_v38 = vmax.f32 %v1757_v27, 0.0  ;;  %v1760_v39 = vadd.f32 %v3109_v35, %v4459_v16 }
 0x26d   : > { %v1232_v58 = vmax.f32 %v1196_v51, 0.0  ;;  %v2983_v59 = vpop.f32.mrb[20].mxu1  ;;  %v1263_v5 = vrot.slane %v1262_v62, 2  ;;  %v1779_v43 = vmax.f32 %v1749_v34, 0.0  ;;  %v1752_v44 = vadd.f32 %v4459_v16, %v1751_v40 }
 0x26e   : > { %v2984_v63 = vpop.f32.mrb[21].mxu1  ;;  %v1860_v4 = vsel %vm1859_vm5, %v892_v61, %v1858_v52  ;;  %v1297_v7 = vmul.f32 0.0625, %v1259_v0  ;;  %v1799_v47 = vrot.slane %v1781_v38, 4  ;;  %v1782_v48 = vmax.f32 %v1760_v39, 0.0 }
 0x26f   : > { %v1267_v1 = vadd.f32 %v1232_v58, %v1231_v57  ;;  %v2985_v2 = vadd.f32 %v2984_v63, %v2983_v59  ;;  %v2986_v3 = vpop.f32.mrb[22].mxu1  ;;  %v1862_v8 = vsel %vm1861_vm6, %v893_v55, %v1860_v4  ;;  %v1264_v10 = vadd.f32 %v1263_v5, %v1262_v62 }
 0x270   : > { %v2987_v6 = vpop.f32.mrb[23].mxu1  ;;  %v4453_v12 = vsel %vm1863_vm7, %v894_v60, %v1862_v8  ;;  %v1875_v14 = vsel %vm1853_vm2, %v1297_v7, %v1874_v32  ;;  %v1787_v51 = vrot.slane %v1779_v43, 4  ;;  %v1780_v52 = vmax.f32 %v1752_v44, 0.0 }
 0x271   : > { %v1268_v9 = vrot.slane %v1267_v1, 4  ;;  %v1201_v29 = vadd.f32 %v2985_v2, %v4419_v25  ;;  %v2988_v11 = vadd.f32 %v2987_v6, %v2986_v3  ;;  %v1265_v15 = vrot.slane %v1264_v10, 1 }
 0x272   : > { %v1800_v55 = vadd.f32 %v1799_v47, %v1781_v38  ;;  %v1805_v56 = vrot.slane %v1782_v48, 4  ;;  %v1788_v60 = vadd.f32 %v1787_v51, %v1779_v43  ;;  %v1793_v61 = vrot.slane %v1780_v52, 4 }
 0x273   : > { %v1269_v13 = vadd.f32 %v1268_v9, %v1267_v1  ;;  %v1204_v17 = vadd.f32 %v2988_v11, %v4419_v25  ;;  %v1266_v20 = vadd.f32 %v1265_v15, %v1264_v10  ;;  %v1233_v21 = vmax.f32 %v1201_v29, 0.0 }
 0x274   : > { %v1801_v0 = vrot.slane %v1800_v55, 2  ;;  %v1806_v1 = vadd.f32 %v1805_v56, %v1782_v48  ;;  %v1789_v6 = vrot.slane %v1788_v60, 2  ;;  %v1794_v7 = vadd.f32 %v1793_v61, %v1780_v52 }
 0x275   : > { %v1270_v18 = vrot.slane %v1269_v13, 2  ;;  %v2989_v19 = vpop.f32.mrb[24].mxu1  ;;  %v1234_v23 = vmax.f32 %v1204_v17, 0.0  ;;  %v1298_v32 = vmul.f32 0.0625, %v1266_v20 }
 0x276   : > { %v2990_v24 = vpop.f32.mrb[25].mxu1  ;;  %v1802_v10 = vadd.f32 %v1801_v0, %v1800_v55  ;;  %v1807_v29 = vrot.slane %v1806_v1, 2  ;;  %v1790_v15 = vadd.f32 %v1789_v6, %v1788_v60  ;;  %v1795_v17 = vrot.slane %v1794_v7, 2 }
 0x277   : > { %v1271_v26 = vadd.f32 %v1270_v18, %v1269_v13  ;;  %v2991_v30 = vadd.f32 %v2990_v24, %v2989_v19  ;;  %v2992_v31 = vpop.f32.mrb[26].mxu1  ;;  %v1274_v33 = vadd.f32 %v1234_v23, %v1233_v21  ;;  %v1876_v58 = vsel %vm1855_vm3, %v1298_v32, %v1875_v14 }
 0x278   : > { %v2993_v36 = vpop.f32.mrb[27].mxu1  ;;  %v1803_v19 = vrot.slane %v1802_v10, 1  ;;  %v1808_v20 = vadd.f32 %v1807_v29, %v1806_v1  ;;  %v1791_v23 = vrot.slane %v1790_v15, 1  ;;  %v1796_v24 = vadd.f32 %v1795_v17, %v1794_v7 }
 0x279   : > { %v1272_v37 = vrot.slane %v1271_v26, 1  ;;  %v1209_v41 = vadd.f32 %v2991_v30, %v4419_v25  ;;  %v1275_v42 = vrot.slane %v1274_v33, 4  ;;  %v2994_v45 = vadd.f32 %v2993_v36, %v2992_v31 }
 0x27a   : > { %v1804_v27 = vadd.f32 %v1803_v19, %v1802_v10  ;;  %v1809_v28 = vrot.slane %v1808_v20, 1  ;;  %v1797_v34 = vrot.slane %v1796_v24, 1  ;;  %v1898_v60 = vpack.c.bf16 %v4453_v12, %v4453_v12 }
 0x27b   : > { %v1273_v46 = vadd.f32 %v1272_v37, %v1271_v26  ;;  %v1235_v49 = vmax.f32 %v1209_v41, 0.0  ;;  %v1276_v50 = vadd.f32 %v1275_v42, %v1274_v33  ;;  %v1212_v53 = vadd.f32 %v2994_v45, %v4419_v25 }
 0x27c   : > { %v1792_v33 = vadd.f32 %v1791_v23, %v1790_v15  ;;  %v1810_v36 = vadd.f32 %v1809_v28, %v1808_v20  ;;  %v1798_v39 = vadd.f32 %v1797_v34, %v1796_v24 }
 0x27d   : > { %v1299_v54 = vmul.f32 0.0625, %v1273_v46  ;;  %v2995_v57 = vpop.f32.mrb[28].mxu1  ;;  %v1277_v59 = vrot.slane %v1276_v50, 2  ;;  %v1236_v62 = vmax.f32 %v1212_v53, 0.0 }
 0x27e   : > { %v2996_v63 = vpop.f32.mrb[29].mxu1  ;;  %v1835_v38 = vmul.f32 0.125, %v1792_v33  ;;  %v1838_v43 = vmul.f32 0.125, %v1810_v36  ;;  %v1836_v44 = vmul.f32 0.125, %v1798_v39 }
 0x27f   : > { %v2997_v2 = vadd.f32 %v2996_v63, %v2995_v57  ;;  %v2998_v3 = vpop.f32.mrb[30].mxu1  ;;  %v1877_v4 = vsel %vm1857_vm4, %v1299_v54, %v1876_v58  ;;  %v1278_v5 = vadd.f32 %v1277_v59, %v1276_v50  ;;  %v1281_v8 = vadd.f32 %v1236_v62, %v1235_v49 }
 0x280   : > { %v2999_v9 = vpop.f32.mrb[31].mxu1  ;;  %v1890_v47 = vsel %vm1851_vm1, %v1836_v44, %v1835_v38  ;;  %v3351_v44 = vld [vmem:[#allocation17 + $0x10] ss:$8 sps:$4 sm:$0xff]  }
 0x281   : > { %v1217_v11 = vadd.f32 %v2997_v2, %v4419_v25  ;;  %v3000_v13 = vadd.f32 %v2999_v9, %v2998_v3  ;;  %v1279_v14 = vrot.slane %v1278_v5, 1  ;;  %v1282_v18 = vrot.slane %v1281_v8, 4 }
 0x283   : > { %v1220_v21 = vadd.f32 %v3000_v13, %v4419_v25  ;;  %v1280_v22 = vadd.f32 %v1279_v14, %v1278_v5  ;;  %v1283_v26 = vadd.f32 %v1282_v18, %v1281_v8  ;;  %v1237_v30 = vmax.f32 %v1217_v11, 0.0 }
 0x284   : > { %v1837_v25 = vmul.f32 0.125, %v1804_v27 }
 0x285   : > { %v1238_v31 = vmax.f32 %v1220_v21, 0.0  ;;  %v1300_v32 = vmul.f32 0.0625, %v1280_v22  ;;  %v1284_v35 = vrot.slane %v1283_v26, 2 }
 0x286   : > { %v1891_v49 = vsel %vm1853_vm2, %v1837_v25, %v1890_v47  ;;  %v3354_v47 = vld [vmem:[#allocation17 + $0x20] ss:$8 sps:$4 sm:$0xff]  }
 0x287   : > { %v1288_v37 = vadd.f32 %v1238_v31, %v1237_v30  ;;  %v1285_v40 = vadd.f32 %v1284_v35, %v1283_v26  ;;  %v1878_v41 = vsel %vm1859_vm5, %v1300_v32, %v1877_v4  ;;  %v1892_v51 = vsel %vm1855_vm3, %v1838_v43, %v1891_v49  ;;  %v3348_v43 = vld [vmem:[#allocation17] ss:$8 sps:$4 sm:$0xff]  }
 0x288   : > { %v3768_v49 = vmov 0  }
 0x289   : > { %v1289_v42 = vrot.slane %v1288_v37, 4  ;;  %v1286_v45 = vrot.slane %v1285_v40, 1 }
 0x28b   : > { %v1290_v46 = vadd.f32 %v1289_v42, %v1288_v37  ;;  %v1287_v48 = vadd.f32 %v1286_v45, %v1285_v40  ;;  %v3350_v42 = vld [vmem:[#allocation17 + $0x4] ss:$8 sps:$4 sm:$0xff]   ;;  %v3353_v45 = vld [vmem:[#allocation17 + $0x14] ss:$8 sps:$4 sm:$0xff]  }
 0x28c   : > { %2290 = vmatprep.subr.bf16.mxu0 %v3350_v42 }
 0x28d   : > { %v1291_v50 = vrot.slane %v1290_v46, 2  ;;  %v1301_v52 = vmul.f32 0.0625, %v1287_v48  ;;  %v3359_v48 = vld [vmem:[#allocation17 + $0x34] ss:$8 sps:$4 sm:$0xff]  }
 0x28f   : > { %v1292_v53 = vadd.f32 %v1291_v50, %v1290_v46  ;;  %v1879_v54 = vsel %vm1861_vm6, %v1301_v52, %v1878_v41  ;;  %v3356_v46 = vld [vmem:[#allocation17 + $0x24] ss:$8 sps:$4 sm:$0xff]   ;;  %v3357_v50 = vld [vmem:[#allocation17 + $0x30] ss:$8 sps:$4 sm:$0xff]   ;;  %v3360_v52 = vld [vmem:[#allocation17 + $0x40] ss:$8 sps:$4 sm:$0xff]  }
 0x291   : > { %v1293_v55 = vrot.slane %v1292_v53, 1 }
 0x293   : > { %v1294_v56 = vadd.f32 %v1293_v55, %v1292_v53  ;;  %v3365_v53 = vld [vmem:[#allocation17 + $0x54] ss:$8 sps:$4 sm:$0xff]   ;;  %v3373_v55 = vld [vmem:[#allocation18] sm:$0xff]  }
 0x294   : > { %v3112_v61 = vpop.f32.mrb[12].mxu0 }
 0x295   : > { %v1302_v57 = vmul.f32 0.0625, %v1294_v56  ;;  %v1773_v62 = vadd.f32 %v3112_v61, %v4459_v16  ;;  %v1764_v63 = vpop.f32.mrb[13].mxu0  ;;  %v3374_v56 = vld [vmem:[#allocation18 + $0x48] sm:$0xff]  }
 0x296   : > { %v1765_v0 = vadd.f32 %v4459_v16, %v1764_v63  ;;  %v3113_v1 = vpop.f32.mrb[14].mxu0  ;;  %v3366_v61 = vld [vmem:[#allocation17 + $0x60] ss:$8 sps:$4 sm:$0xff]   ;;  %v3371_v63 = vld [vmem:[#allocation17 + $0x74] ss:$8 sps:$4 sm:$0xff]  }
 0x297   : > { %v1880_v58 = vsel %vm1863_vm7, %v1302_v57, %v1879_v54  ;;  %v1785_v2 = vmax.f32 %v1773_v62, 0.0  ;;  %v1776_v3 = vadd.f32 %v3113_v1, %v4459_v16  ;;  %v1767_v4 = vpop.f32.mrb[15].mxu0  ;;  %v3372_v54 = vld [vmem:[#allocation18 + $0x40] sm:$0xff]   ;;  %v3363_v57 = vld [vmem:[#allocation17 + $0x50] ss:$8 sps:$4 sm:$0xff]  }
 0x298   : > { %v1899_v59 = vpack.c.bf16 %v1880_v58, %v1880_v58  ;;  %v1783_v5 = vmax.f32 %v1765_v0, 0.0  ;;  %v1768_v6 = vadd.f32 %v4459_v16, %v1767_v4  ;;  %3044 = vmatprep.subr.bf16.mxu1 %v3372_v54  ;;  %v3375_v58 = vld [vmem:[#allocation18 + $0x8] sm:$0xff]   ;;  %v3377_v62 = vld [vmem:[#allocation18 + $0x10] sm:$0xff]   ;;  %v3378_v0 = vld [vmem:[#allocation18 + $0x58] sm:$0xff]  }
 0x299   : > { %v1823_v7 = vrot.slane %v1785_v2, 4  ;;  %v1786_v8 = vmax.f32 %v1776_v3, 0.0  ;;  %v3369_v1 = vld [vmem:[#allocation17 + $0x70] ss:$8 sps:$4 sm:$0xff]   ;;  %v3380_v3 = vld [vmem:[#allocation18 + $0x60] sm:$0xff]  }
 0x29a   : > { %2132 = vmatprep.mubr.bf16.mxu0 %v1899_v59  ;;  %v1811_v9 = vrot.slane %v1783_v5, 4  ;;  %v1784_v12 = vmax.f32 %v1768_v6, 0.0  ;;  %v3368_v59 = vld [vmem:[#allocation17 + $0x64] ss:$8 sps:$4 sm:$0xff]  }
 0x29b   : > { %2133 = vmatmul.mubr.bf16.vlgmr.msra.gmra.mrb[16].mxu0 %v1898_v60  ;;  %v1824_v10 = vadd.f32 %v1823_v7, %v1785_v2  ;;  %v1829_v29 = vrot.slane %v1786_v8, 4  ;;  %v3376_v60 = vld [vmem:[#allocation18 + $0x50] sm:$0xff]   ;;  %v3379_v2 = vld [vmem:[#allocation18 + $0x18] sm:$0xff]   ;;  %v3381_v4 = vld [vmem:[#allocation18 + $0x20] sm:$0xff]  }
 0x29c   : > { %v1812_v11 = vadd.f32 %v1811_v9, %v1783_v5  ;;  %v1817_v13 = vrot.slane %v1784_v12, 4  ;;  %2291 = vmatpush1.bf16.msra.mxu0 %v3348_v43  ;;  %2322 = vmatprep.mubr.bf16.mxu0 %v3768_v49  ;;  %v3382_v5 = vld [vmem:[#allocation18 + $0x68] sm:$0xff]   ;;  %v2879_v43 = vld [vmem:[%s4656_s20] ss:$0 sm:$0xff] }
 0x29d   : > { %v1825_v14 = vrot.slane %v1824_v10, 2  ;;  %v1830_v15 = vadd.f32 %v1829_v29, %v1786_v8  ;;  %2292 = vmatprep.subr.bf16.mxu0 %v3353_v45  ;;  %v3383_v6 = vld [vmem:[#allocation18 + $0x28] sm:$0xff]   ;;  %v2838_v29 = vld [vmem:[%s4654_s24] ss:$0 sm:$0xff] }
 0x29e   : > { %v1813_v17 = vrot.slane %v1812_v11, 2  ;;  %v1818_v18 = vadd.f32 %v1817_v13, %v1784_v12 }
 0x29f   : > { %v1826_v19 = vadd.f32 %v1825_v14, %v1824_v10  ;;  %v1831_v20 = vrot.slane %v1830_v15, 2 }
 0x2a0   : > { %v1814_v21 = vadd.f32 %v1813_v17, %v1812_v11  ;;  %v1819_v22 = vrot.slane %v1818_v18, 2  ;;  %2293 = vmatpush1.bf16.msra.mxu0 %v3351_v44 }
 0x2a1   : > { %v1827_v23 = vrot.slane %v1826_v19, 1  ;;  %v1832_v24 = vadd.f32 %v1831_v20, %v1830_v15  ;;  %2294 = vmatprep.subr.bf16.mxu0 %v3356_v46 }
 0x2a2   : > { %v1815_v26 = vrot.slane %v1814_v21, 1  ;;  %v1820_v16 = vadd.f32 %v1819_v22, %v1818_v18  ;;  %v3385_v22 = vld [vmem:[#allocation18 + $0x30] sm:$0xff]  }
 0x2a3   : > { %v1828_v27 = vadd.f32 %v1827_v23, %v1826_v19  ;;  %v1833_v28 = vrot.slane %v1832_v24, 1  ;;  %v3386_v23 = vld [vmem:[#allocation18 + $0x78] sm:$0xff]  }
 0x2a4   : > { %v1816_v30 = vadd.f32 %v1815_v26, %v1814_v21  ;;  %v1821_v31 = vrot.slane %v1820_v16, 1  ;;  %2295 = vmatpush1.bf16.msra.mxu0 %v3354_v47  ;;  %v3384_v21 = vld [vmem:[#allocation18 + $0x70] sm:$0xff]   ;;  %v2200_v26 = vlaneseq }
 0x2a5   : > { %v1834_v32 = vadd.f32 %v1833_v28, %v1832_v24  ;;  %v1841_v35 = vmul.f32 0.125, %v1828_v27  ;;  %2296 = vmatprep.subr.bf16.mxu0 %v3359_v48  ;;  %v3387_v24 = vld [vmem:[#allocation18 + $0x38] sm:$0xff]  }
 0x2a6   : > { %v1839_v33 = vmul.f32 0.125, %v1816_v30  ;;  %v1822_v34 = vadd.f32 %v1821_v31, %v1820_v16  ;;  %v2201_v16 = vshrl.u32 %v2200_v26, 7  ;;  %v2198_v28 = vld [vmem:[%s4655_s27] sm:$0x3] }
 0x2a7   : > { %v1842_v37 = vmul.f32 0.125, %v1834_v32 }
 0x2a8   : > { %v1893_v36 = vsel %vm1857_vm4, %v1839_v33, %v1892_v51  ;;  %v1840_v38 = vmul.f32 0.125, %v1822_v34  ;;  %v3362_v51 = vld [vmem:[#allocation17 + $0x44] ss:$8 sps:$4 sm:$0xff]   ;;  %2297 = vmatpush1.bf16.msra.mxu0 %v3357_v50  ;;  %v2202_v27 = vsub.s32 0, %v2201_v16  ;;  %v2206_v30 = vsub.s32 1, %v2201_v16 }
 0x2a9   : > { %2298 = vmatprep.subr.bf16.mxu0 %v3362_v51 }
 0x2aa   : > { %v1894_v39 = vsel %vm1859_vm5, %v1840_v38, %v1893_v36  ;;  %v2203_v31 = vrot.slane %v2198_v28, %v2202_v27  ;;  %v2207_v32 = vrot.slane %v2198_v28, %v2206_v30 }
 0x2ab   : > { %v1895_v40 = vsel %vm1861_vm6, %v1841_v35, %v1894_v39 }
 0x2ac   : > { %v1896_v41 = vsel %vm1863_vm7, %v1842_v37, %v1895_v40  ;;  %2299 = vmatpush1.bf16.msra.mxu0 %v3360_v52 }
 0x2ad   : > { %v1900_v25 = vpack.c.bf16 %v1896_v41, %v1896_v41  ;;  %2300 = vmatprep.subr.bf16.mxu0 %v3365_v53 }
 0x2af   : > { %3131 = vmatmul.mubr.bf16.vlgmr.msra.gmra.mrb[32].mxu1 %v1900_v25 }
 0x2b0   : > { %3045 = vmatpush3.bf16.msra.mxu1 %v3373_v55  ;;  %2301 = vmatpush1.bf16.msra.mxu0 %v3363_v57 }
 0x2b1   : > { %3046 = vmatprep.subr.bf16.mxu1 %v3374_v56  ;;  %2302 = vmatprep.subr.bf16.mxu0 %v3368_v59 }
 0x2b4   : > { %3047 = vmatpush3.bf16.msra.mxu1 %v3375_v58  ;;  %2303 = vmatpush1.bf16.msra.mxu0 %v3366_v61 }
 0x2b5   : > { %3048 = vmatprep.subr.bf16.mxu1 %v3376_v60  ;;  %2304 = vmatprep.subr.bf16.mxu0 %v3371_v63 }
 0x2b8   : > { %3049 = vmatpush3.bf16.msra.mxu1 %v3377_v62  ;;  %2305 = vmatpush1.bf16.msra.mxu0 %v3369_v1 }
 0x2b9   : > { %3050 = vmatprep.subr.bf16.mxu1 %v3378_v0 }
 0x2bc   : > { %3051 = vmatpush3.bf16.msra.mxu1 %v3379_v2 }
 0x2bd   : > { %3052 = vmatprep.subr.bf16.mxu1 %v3380_v3 }
 0x2c0   : > { %3053 = vmatpush3.bf16.msra.mxu1 %v3381_v4 }
 0x2c1   : > { %3054 = vmatprep.subr.bf16.mxu1 %v3382_v5 }
 0x2c4   : > { %3055 = vmatpush3.bf16.msra.mxu1 %v3383_v6 }
 0x2c5   : > { %3056 = vmatprep.subr.bf16.mxu1 %v3384_v21 }
 0x2c8   : > { %3057 = vmatpush3.bf16.msra.mxu1 %v3385_v22 }
 0x2c9   : > { %3058 = vmatprep.subr.bf16.mxu1 %v3386_v23 }
 0x2cc   : > { %3059 = vmatpush3.bf16.msra.mxu1 %v3387_v24 }
 0x36e   : > { %v3029_v7 = vpop.f32.mrb[16].mxu0 }
 0x36f   : > { %v3030_v8 = vpop.f32.mrb[17].mxu0 }
 0x370   : > { %v3031_v9 = vadd.f32 %v3030_v8, %v3029_v7  ;;  %v3032_v12 = vpop.f32.mrb[18].mxu0 }
 0x371   : > { %v3033_v10 = vpop.f32.mrb[19].mxu0 }
 0x372   : > { %v2135_v11 = vadd.f32 %v3031_v9, %v2838_v29 }
 0x382   : > { %v2174_v13 = vpop.f32.mrb[32].mxu1 }
 0x383   : > { %v3132_v14 = vpop.f32.mrb[33].mxu1  ;;  %v2175_v15 = vadd.f32 %v2174_v13, %v2135_v11 }
 0x384   : > { %v2177_v17 = vpop.f32.mrb[34].mxu1 }
 0x385   : > { %v3133_v18 = vpop.f32.mrb[35].mxu1  ;;  %3388 = vtanh.f32 %v2175_v15 }
 0x38f   : > { %v3389_v19 = vpop.eup %3388 }
 0x390   : > { %v2181_v20 = vpack.c.bf16 %v3389_v19, %v3389_v19 }
 0x392   : > { %2323 = vmatmul.mubr.bf16.vlgmr.msra.gmra.mrb[20].mxu0 %v2181_v20 }
 0x465   : > { %v2324_v33 = vpop.f32.mrb[20].mxu0 }
 0x466   : > { %v2325_v34 = vadd.f32 %v2324_v33, %v2203_v31  ;;  %v2326_v35 = vpop.f32.mrb[21].mxu0 }
 0x467   : > { %v2327_v36 = vadd.f32 %v2326_v35, %v2207_v32  ;;  %v2328_v37 = vpop.f32.mrb[22].mxu0 }
 0x468   : > { %v2331_v38 = vmax.f32 %v2325_v34, 0.0  ;;  %v2329_v39 = vpop.f32.mrb[23].mxu0 }
 0x469   : > { %v2332_v40 = vmax.f32 %v2327_v36, 0.0 }
 0x46a   : > { %v2333_v25 = vpack.c.bf16 %v2331_v38, %v2331_v38 }
 0x46b   : > { %v2334_v41 = vpack.c.bf16 %v2332_v40, %v2332_v40 }
 0x46d   : > { %2502 = vmatprep.mubr.bf16.mxu1 %v2334_v41 }
 0x46e   : > { %2503 = vmatmul.mubr.bf16.vlgmr.msra.gmra.mrb[36].mxu1 %v2333_v25 }
 0x541   : > { %v3060_v42 = vpop.f32.mrb[36].mxu1 }
 0x542   : > { %v3061_v44 = vpop.f32.mrb[37].mxu1 }
 0x543   : > { %v3062_v45 = vadd.f32 %v3061_v44, %v3060_v42  ;;  %v3063_v46 = vpop.f32.mrb[38].mxu1 }
 0x544   : > { %v3064_v47 = vpop.f32.mrb[39].mxu1 }
 0x545   : > { %v2505_v48 = vadd.f32 %v3062_v45, %v2879_v43 }
 0x547   : > { %2510 = vst [vmem:[%s659_s19] sm:$0xff] %v2505_v48 }
 0x548   : > { %3671 = shalt.err (!%p3668_p3)
}
 0x549   : > { %s3672_s1 = scalar_lea.hbm %s4502_s18, 128  ;;  %s3676_s4 = scalar_lea.hbm %s4658_s17, 256 }
 0x54a   : > { %p3673_p5 = scmp.ne.s32.totalorder %s4502_s18, %s3672_s1  ;;  %p3677_p13 = scmp.lt.u32.totalorder %s4502_s18, %s4658_s17 }
 0x54b   : > { %p3678_p6 = scmp.lt.u32.totalorder %s3676_s4, %s3672_s1  ;;  %p3680_p1 = scmp.lt.u32.totalorder %s3672_s1, %s4502_s18 }
 0x54c   : > { %p3674_p7 = pnand %p3673_p5, %p4659_p4 }
 0x54d   : > { %p3679_p10 = por %p3678_p6, %p3677_p13 }
 0x54e   : > { %p3675_p0 = pneg %p3674_p7 }
 0x54f   : > { %p3681_p12 = por %p3680_p1, %p3679_p10 }
 0x551   : > { %p3682_p9 = pnand %p3681_p12, %p3675_p0 }
 0x553   : > { %3685 = shalt.err (!%p3682_p9)
}
 0x554   : > { %3166 = dma.vmem_to_hbm [thread:$0]  (%p4659_p4), %s4504_s28, 128, %s4502_s18, %s2512_s6  }
 0x555 PF: > { %s4660_s13 = sld [smem:[#allocation30_spill]]  ;;  %s4661_s8 = sld [smem:[#allocation36_spill]] }
 0x556   : > { %p4663_p8 = scmp.ge.s32.totalorder %s3750_s29, 2 }
 0x55b   : > { %s2537_s21 = sand.u32 1, %s4660_s13   ;;  %p4662_p2 = scmp.ne.s32.totalorder %s4661_s8, 0 }
 0x55c   : > { %s2538_s24 = scalar_lea.sflag [#allocation7], %s2537_s21 }
 0x55d   : > { %p3198_p11 = pnand %p4663_p8, %p4662_p2 }
 0x55f   : > { %3733 = dma.done.wait (!%p3198_p11), %s2538_s24, 128  }
 0x560   : > { %3735 = vsyncadd (!%p3198_p11), %s2538_s24, 4294967168  ;;  %s4664_s29 = sld [smem:[#allocation33_spill]]  ;;  %s4665_s26 = sld [smem:[#allocation31_spill]] }
 0x561   : > { %s4666_s27 = sld [smem:[#allocation32_spill]]  ;;  %s4667_s28 = sld [smem:[#allocation34_spill]] }
 0x566   : > { %p39_p3 = scmp.ge.s32.totalorder %s4664_s29, 4  }
 0x568   :  { %41 = sbr.rel (!%p39_p3) target bundleno = 35 (0x23), region = 228 }
 0x56f   :  { %2543 = vsyncpa [#allocation6], 1 }
 0x570   :  { %2545 = vsyncpa [#allocation6 + $0x1], 1 }
 0x571   :  { %2546 = vsyncpa [#allocation9], 1 }
 0x572   :  { %2547 = vsyncpa [#allocation13], 1 }
 0x573   :  { %2548 = vsyncpa [#allocation16], 1 }
 0x574   :  { %2549 = vsyncpa [#allocation19], 1 }
 0x575   :  { %2550 = vsyncpa [#allocation7], 1 }
 0x576   :  { %2552 = vsyncpa [#allocation7 + $0x1], 1 }

</bundles_post_ra>
